<compile_context>
chip_gen: v7x
topology: tpu7x:2x2x1
jax: 0.10.0
libtpu: 0.0.40
codegen_flags: <defaults>
</compile_context>

<pallas_src>
import jax
import jax.numpy as jnp
from jax import lax
from jax.experimental import pallas as pl
from jax.experimental.pallas import tpu as pltpu


def deepxml_kernel(xw_ref,    # VMEM (TB, S) f32   feature weights (batch tile)
                   xind_ref,  # VMEM (TB, S) i32   feature indices (batch tile)
                   emb_ref,   # VMEM (V, D)  f32   embedding table, resident
                   w_ref,     # VMEM (D, D)  f32   residual projection, resident
                   b_ref,     # VMEM (1, D)  f32   bias, resident
                   o_ref):    # VMEM (TB, D) f32   output block
    tb, s_max = xw_ref.shape
    v, _ = emb_ref.shape

    xw = xw_ref[...]                     # (TB, S) f32
    xind = xind_ref[...]                 # (TB, S) i32

    # Weighted one-hot scatter on the VPU (exact f32):
    #   acc[i, t] = sum_s xw[i, s] * [xind[i, s] == t]
    token_iota = lax.broadcasted_iota(jnp.int32, (tb, v), 1)
    acc = jnp.zeros((tb, v), jnp.float32)
    for s in range(s_max):               # S is small; static unroll
        idx_col = xind[:, s:s + 1]       # (TB, 1) i32
        w_col = xw[:, s:s + 1]           # (TB, 1) f32
        acc = acc + jnp.where(token_iota == idx_col, w_col, 0.0)

    # Embedding bag = one MXU contraction against the VMEM-resident table.
    # Row 0 of the table is zero, so padding indices contribute nothing.
    h = jnp.dot(acc, emb_ref[...], preferred_element_type=jnp.float32)   # (TB, D)

    # Residual transform block (classifier = identity).
    z = jnp.dot(h, w_ref[...], preferred_element_type=jnp.float32) + b_ref[...]
    o_ref[...] = jnp.maximum(z, 0.0) + h


def deepxml_forward(xw, xind, emb, w, b, *, tb=128):
    B, S = xw.shape
    V, D = emb.shape

    # Pad the batch up to a multiple of the MXU-aligned batch tile.
    b_pad = pl.cdiv(B, tb) * tb
    if b_pad != B:
        xw = jnp.pad(xw, ((0, b_pad - B), (0, 0)))
        xind = jnp.pad(xind, ((0, b_pad - B), (0, 0)))   # pads with index 0 (padding row)
    xind = xind.astype(jnp.int32)

    cost = pl.CostEstimate(
        flops=2 * b_pad * V * D          # bag contraction
        + 2 * b_pad * D * D              # residual projection
        + 2 * b_pad * S * V,             # one-hot build (VPU)
        transcendentals=0,
        bytes_accessed=(b_pad * S * 8    # weights + indices
                        + V * D * 4      # embedding table
                        + D * D * 4 + D * 4
                        + b_pad * D * 4),
    )

    out = pl.pallas_call(
        deepxml_kernel,
        out_shape=jax.ShapeDtypeStruct((b_pad, D), jnp.float32),
        grid_spec=pltpu.PrefetchScalarGridSpec(
            num_scalar_prefetch=0,
            grid=(b_pad // tb,),
            in_specs=[
                pl.BlockSpec((tb, S), lambda i: (i, 0)),   # xw, per batch tile
                pl.BlockSpec((tb, S), lambda i: (i, 0)),   # xind, per batch tile
                pl.BlockSpec((V, D), lambda i: (0, 0)),    # emb, VMEM-resident
                pl.BlockSpec((D, D), lambda i: (0, 0)),    # W, resident
                pl.BlockSpec((1, D), lambda i: (0, 0)),    # b, resident
            ],
            out_specs=pl.BlockSpec((tb, D), lambda i: (i, 0)),
        ),
        compiler_params=pltpu.CompilerParams(
            dimension_semantics=("parallel",),   # shard batch tiles across TCs
            vmem_limit_bytes=8 * 1024 * 1024,
        ),
        cost_estimate=cost,
    )(xw, xind, emb, w, b)

    return out[:B]


def reference_forward(xw, xind, emb, w, b):
    # Pure-JAX f32 reference: weighted embedding-bag + residual block.
    gathered = emb[xind]                              # (B, S, D)
    h = jnp.sum(gathered * xw[:, :, None], axis=1)    # (B, D)
    return jnp.maximum(h @ w + b, 0.0) + h


if __name__ == "__main__":
    B, S = 200, 8        # batch (not a tile multiple, exercises padding), features/doc
    V, D = 512, 128      # vocabulary_dims, embedding_dims (= representation_dims)

    key = jax.random.PRNGKey(0)
    k1, k2, k3, k4, k5 = jax.random.split(key, 5)

    # Deterministic parameter init (synthetic, not a checkpoint load).
    emb = jax.random.normal(k1, (V, D), dtype=jnp.float32) * 0.05
    emb = emb.at[0].set(0.0)                          # padding_idx = 0
    w = jax.random.normal(k2, (D, D), dtype=jnp.float32) * 0.05
    b = jax.random.normal(k3, (1, D), dtype=jnp.float32) * 0.01

    # batch_data['X'] (feature weights) and batch_data['X_ind'] (indices).
    xw = jax.random.uniform(k4, (B, S), dtype=jnp.float32)
    xind = jax.random.randint(k5, (B, S), 1, V, dtype=jnp.int32)
    xind = xind.at[:, -2:].set(0)                     # some padding positions
    xw = xw.at[:, -2:].set(0.0)

    out = deepxml_forward(xw, xind, emb, w, b)
    out = jax.block_until_ready(out)

    ref = reference_forward(xw, xind, emb, w, b)
    assert out.shape == (B, D)
    # The two contractions run on the MXU (f32 operands); allow MXU-emulation
    # level tolerance against the pure-f32 reference.
    assert jnp.allclose(out, ref, atol=1e-2, rtol=5e-2), "mismatch vs reference"

    print("KERNEL_OK")
</pallas_src>

<mosaic_0001>
module attributes {stable_mosaic.version = 11 : i64} {
  func.func @deepxml_kernel(%arg0: i32, %arg1: memref<128x8xf32, #tpu.memory_space<vmem>>, %arg2: memref<128x8xi32, #tpu.memory_space<vmem>>, %arg3: memref<512x128xf32, #tpu.memory_space<vmem>>, %arg4: memref<128x128xf32, #tpu.memory_space<vmem>>, %arg5: memref<1x128xf32, #tpu.memory_space<vmem>>, %arg6: memref<128x128xf32, #tpu.memory_space<vmem>>) attributes {dimension_semantics = [#tpu.dimension_semantics<parallel>], iteration_bounds = array<i64: 2>, scalar_prefetch = 0 : i64, scratch_operands = 0 : i64, tpu.core_type = #tpu.core_type<tc>, window_params = [{transform_indices = @transform_0, window_bounds = array<i64: 128, 8>}, {transform_indices = @transform_1, window_bounds = array<i64: 128, 8>}, {pipeline_mode = #tpu.pipeline_mode<synchronous>, transform_indices = @transform_2, window_bounds = array<i64: 512, 128>}, {pipeline_mode = #tpu.pipeline_mode<synchronous>, transform_indices = @transform_3, window_bounds = array<i64: 128, 128>}, {pipeline_mode = #tpu.pipeline_mode<synchronous>, transform_indices = @transform_4, window_bounds = array<i64: 1, 128>}, {transform_indices = @transform_5, window_bounds = array<i64: 128, 128>}]} {
    %c0 = arith.constant 0 : index
    %c0_0 = arith.constant 0 : index
    %0 = vector.load %arg1[%c0, %c0_0] : memref<128x8xf32, #tpu.memory_space<vmem>>, vector<128x8xf32>
    %c0_1 = arith.constant 0 : index
    %c0_2 = arith.constant 0 : index
    %1 = vector.load %arg2[%c0_1, %c0_2] : memref<128x8xi32, #tpu.memory_space<vmem>>, vector<128x8xi32>
    %2 = tpu.iota {dimensions = array<i32: 1>} : vector<128x512xi32>
    %cst = arith.constant 0.000000e+00 : f32
    %3 = vector.broadcast %cst : f32 to vector<128x512xf32>
    %4 = vector.extract_strided_slice %1 {offsets = [0, 0], sizes = [128, 1], strides = [1, 1]} : vector<128x8xi32> to vector<128x1xi32>
    %5 = vector.extract_strided_slice %0 {offsets = [0, 0], sizes = [128, 1], strides = [1, 1]} : vector<128x8xf32> to vector<128x1xf32>
    %6 = vector.broadcast %4 : vector<128x1xi32> to vector<128x512xi32>
    %7 = arith.cmpi eq, %2, %6 : vector<128x512xi32>
    %cst_3 = arith.constant 0.000000e+00 : f32
    %8 = vector.shape_cast %5 : vector<128x1xf32> to vector<128x1xf32>
    %9 = vector.broadcast %8 : vector<128x1xf32> to vector<128x512xf32>
    %10 = vector.broadcast %cst_3 : f32 to vector<128x512xf32>
    %11 = arith.select %7, %9, %10 : vector<128x512xi1>, vector<128x512xf32>
    %12 = arith.addf %3, %11 : vector<128x512xf32>
    %13 = vector.extract_strided_slice %1 {offsets = [0, 1], sizes = [128, 1], strides = [1, 1]} : vector<128x8xi32> to vector<128x1xi32>
    %14 = vector.extract_strided_slice %0 {offsets = [0, 1], sizes = [128, 1], strides = [1, 1]} : vector<128x8xf32> to vector<128x1xf32>
    %15 = vector.broadcast %13 : vector<128x1xi32> to vector<128x512xi32>
    %16 = arith.cmpi eq, %2, %15 : vector<128x512xi32>
    %cst_4 = arith.constant 0.000000e+00 : f32
    %17 = vector.shape_cast %14 : vector<128x1xf32> to vector<128x1xf32>
    %18 = vector.broadcast %17 : vector<128x1xf32> to vector<128x512xf32>
    %19 = vector.broadcast %cst_4 : f32 to vector<128x512xf32>
    %20 = arith.select %16, %18, %19 : vector<128x512xi1>, vector<128x512xf32>
    %21 = arith.addf %12, %20 : vector<128x512xf32>
    %22 = vector.extract_strided_slice %1 {offsets = [0, 2], sizes = [128, 1], strides = [1, 1]} : vector<128x8xi32> to vector<128x1xi32>
    %23 = vector.extract_strided_slice %0 {offsets = [0, 2], sizes = [128, 1], strides = [1, 1]} : vector<128x8xf32> to vector<128x1xf32>
    %24 = vector.broadcast %22 : vector<128x1xi32> to vector<128x512xi32>
    %25 = arith.cmpi eq, %2, %24 : vector<128x512xi32>
    %cst_5 = arith.constant 0.000000e+00 : f32
    %26 = vector.shape_cast %23 : vector<128x1xf32> to vector<128x1xf32>
    %27 = vector.broadcast %26 : vector<128x1xf32> to vector<128x512xf32>
    %28 = vector.broadcast %cst_5 : f32 to vector<128x512xf32>
    %29 = arith.select %25, %27, %28 : vector<128x512xi1>, vector<128x512xf32>
    %30 = arith.addf %21, %29 : vector<128x512xf32>
    %31 = vector.extract_strided_slice %1 {offsets = [0, 3], sizes = [128, 1], strides = [1, 1]} : vector<128x8xi32> to vector<128x1xi32>
    %32 = vector.extract_strided_slice %0 {offsets = [0, 3], sizes = [128, 1], strides = [1, 1]} : vector<128x8xf32> to vector<128x1xf32>
    %33 = vector.broadcast %31 : vector<128x1xi32> to vector<128x512xi32>
    %34 = arith.cmpi eq, %2, %33 : vector<128x512xi32>
    %cst_6 = arith.constant 0.000000e+00 : f32
    %35 = vector.shape_cast %32 : vector<128x1xf32> to vector<128x1xf32>
    %36 = vector.broadcast %35 : vector<128x1xf32> to vector<128x512xf32>
    %37 = vector.broadcast %cst_6 : f32 to vector<128x512xf32>
    %38 = arith.select %34, %36, %37 : vector<128x512xi1>, vector<128x512xf32>
    %39 = arith.addf %30, %38 : vector<128x512xf32>
    %40 = vector.extract_strided_slice %1 {offsets = [0, 4], sizes = [128, 1], strides = [1, 1]} : vector<128x8xi32> to vector<128x1xi32>
    %41 = vector.extract_strided_slice %0 {offsets = [0, 4], sizes = [128, 1], strides = [1, 1]} : vector<128x8xf32> to vector<128x1xf32>
    %42 = vector.broadcast %40 : vector<128x1xi32> to vector<128x512xi32>
    %43 = arith.cmpi eq, %2, %42 : vector<128x512xi32>
    %cst_7 = arith.constant 0.000000e+00 : f32
    %44 = vector.shape_cast %41 : vector<128x1xf32> to vector<128x1xf32>
    %45 = vector.broadcast %44 : vector<128x1xf32> to vector<128x512xf32>
    %46 = vector.broadcast %cst_7 : f32 to vector<128x512xf32>
    %47 = arith.select %43, %45, %46 : vector<128x512xi1>, vector<128x512xf32>
    %48 = arith.addf %39, %47 : vector<128x512xf32>
    %49 = vector.extract_strided_slice %1 {offsets = [0, 5], sizes = [128, 1], strides = [1, 1]} : vector<128x8xi32> to vector<128x1xi32>
    %50 = vector.extract_strided_slice %0 {offsets = [0, 5], sizes = [128, 1], strides = [1, 1]} : vector<128x8xf32> to vector<128x1xf32>
    %51 = vector.broadcast %49 : vector<128x1xi32> to vector<128x512xi32>
    %52 = arith.cmpi eq, %2, %51 : vector<128x512xi32>
    %cst_8 = arith.constant 0.000000e+00 : f32
    %53 = vector.shape_cast %50 : vector<128x1xf32> to vector<128x1xf32>
    %54 = vector.broadcast %53 : vector<128x1xf32> to vector<128x512xf32>
    %55 = vector.broadcast %cst_8 : f32 to vector<128x512xf32>
    %56 = arith.select %52, %54, %55 : vector<128x512xi1>, vector<128x512xf32>
    %57 = arith.addf %48, %56 : vector<128x512xf32>
    %58 = vector.extract_strided_slice %1 {offsets = [0, 6], sizes = [128, 1], strides = [1, 1]} : vector<128x8xi32> to vector<128x1xi32>
    %59 = vector.extract_strided_slice %0 {offsets = [0, 6], sizes = [128, 1], strides = [1, 1]} : vector<128x8xf32> to vector<128x1xf32>
    %60 = vector.broadcast %58 : vector<128x1xi32> to vector<128x512xi32>
    %61 = arith.cmpi eq, %2, %60 : vector<128x512xi32>
    %cst_9 = arith.constant 0.000000e+00 : f32
    %62 = vector.shape_cast %59 : vector<128x1xf32> to vector<128x1xf32>
    %63 = vector.broadcast %62 : vector<128x1xf32> to vector<128x512xf32>
    %64 = vector.broadcast %cst_9 : f32 to vector<128x512xf32>
    %65 = arith.select %61, %63, %64 : vector<128x512xi1>, vector<128x512xf32>
    %66 = arith.addf %57, %65 : vector<128x512xf32>
    %67 = vector.extract_strided_slice %1 {offsets = [0, 7], sizes = [128, 1], strides = [1, 1]} : vector<128x8xi32> to vector<128x1xi32>
    %68 = vector.extract_strided_slice %0 {offsets = [0, 7], sizes = [128, 1], strides = [1, 1]} : vector<128x8xf32> to vector<128x1xf32>
    %69 = vector.broadcast %67 : vector<128x1xi32> to vector<128x512xi32>
    %70 = arith.cmpi eq, %2, %69 : vector<128x512xi32>
    %cst_10 = arith.constant 0.000000e+00 : f32
    %71 = vector.shape_cast %68 : vector<128x1xf32> to vector<128x1xf32>
    %72 = vector.broadcast %71 : vector<128x1xf32> to vector<128x512xf32>
    %73 = vector.broadcast %cst_10 : f32 to vector<128x512xf32>
    %74 = arith.select %70, %72, %73 : vector<128x512xi1>, vector<128x512xf32>
    %75 = arith.addf %66, %74 : vector<128x512xf32>
    %c0_11 = arith.constant 0 : index
    %c0_12 = arith.constant 0 : index
    %76 = vector.load %arg3[%c0_11, %c0_12] : memref<512x128xf32, #tpu.memory_space<vmem>>, vector<512x128xf32>
    %cst_13 = arith.constant dense<0.000000e+00> : vector<128x128xf32>
    %77 = tpu.matmul %75, %76, %cst_13 {dimension_numbers = #tpu.dot_dimension_numbers<[1], [0], [0], [1], [0, 0, 1, 1], [], []>} : vector<128x512xf32>, vector<512x128xf32>, vector<128x128xf32> -> vector<128x128xf32>
    %c0_14 = arith.constant 0 : index
    %c0_15 = arith.constant 0 : index
    %78 = vector.load %arg4[%c0_14, %c0_15] : memref<128x128xf32, #tpu.memory_space<vmem>>, vector<128x128xf32>
    %cst_16 = arith.constant dense<0.000000e+00> : vector<128x128xf32>
    %79 = tpu.matmul %77, %78, %cst_16 {dimension_numbers = #tpu.dot_dimension_numbers<[1], [0], [0], [1], [0, 0, 1, 1], [], []>} : vector<128x128xf32>, vector<128x128xf32>, vector<128x128xf32> -> vector<128x128xf32>
    %c0_17 = arith.constant 0 : index
    %c0_18 = arith.constant 0 : index
    %80 = vector.load %arg5[%c0_17, %c0_18] : memref<1x128xf32, #tpu.memory_space<vmem>>, vector<1x128xf32>
    %81 = vector.broadcast %80 : vector<1x128xf32> to vector<128x128xf32>
    %82 = arith.addf %79, %81 : vector<128x128xf32>
    %cst_19 = arith.constant 0.000000e+00 : f32
    %83 = vector.broadcast %cst_19 : f32 to vector<128x128xf32>
    %84 = arith.maximumf %82, %83 : vector<128x128xf32>
    %85 = arith.addf %84, %77 : vector<128x128xf32>
    %c0_20 = arith.constant 0 : index
    %c0_21 = arith.constant 0 : index
    %86 = vector.load %arg6[%c0_20, %c0_21] : memref<128x128xf32, #tpu.memory_space<vmem>>, vector<128x128xf32>
    tpu.vector_store %arg6[%c0_20, %c0_21], %85 {strides = array<i32>} : memref<128x128xf32, #tpu.memory_space<vmem>>, vector<128x128xf32>,
    return
  }
  func.func @transform_0(%arg0: i32) -> (i32, i32) {
    %c0_i32 = arith.constant 0 : i32
    %c0_i32_0 = arith.constant 0 : i32
    return %arg0, %c0_i32 : i32, i32
  }
  func.func @transform_1(%arg0: i32) -> (i32, i32) {
    %c0_i32 = arith.constant 0 : i32
    %c0_i32_0 = arith.constant 0 : i32
    return %arg0, %c0_i32 : i32, i32
  }
  func.func @transform_2(%arg0: i32) -> (i32, i32) {
    %c0_i32 = arith.constant 0 : i32
    %c0_i32_0 = arith.constant 0 : i32
    %c0_i32_1 = arith.constant 0 : i32
    return %c0_i32, %c0_i32_0 : i32, i32
  }
  func.func @transform_3(%arg0: i32) -> (i32, i32) {
    %c0_i32 = arith.constant 0 : i32
    %c0_i32_0 = arith.constant 0 : i32
    %c0_i32_1 = arith.constant 0 : i32
    return %c0_i32, %c0_i32_0 : i32, i32
  }
  func.func @transform_4(%arg0: i32) -> (i32, i32) {
    %c0_i32 = arith.constant 0 : i32
    %c0_i32_0 = arith.constant 0 : i32
    %c0_i32_1 = arith.constant 0 : i32
    return %c0_i32, %c0_i32_0 : i32, i32
  }
  func.func @transform_5(%arg0: i32) -> (i32, i32) {
    %c0_i32 = arith.constant 0 : i32
    %c0_i32_0 = arith.constant 0 : i32
    return %arg0, %c0_i32 : i32, i32
  }
}

</mosaic_0001>

<bundles_post_ra>
// kernel: tpu_custom_call.1
= control target key start
LH: loop header
LB: loop body
LE: loop exit
PB: predicated region body
PF: predicated region fallthrough
CT: control target
= control target key end

     0   :  { %10 = vsyncpa [#allocation3], 0  ;;  %s7717_s0 = inlined_call_operand.vmem [shape: f32[256,8], index: 0, kind: input, shape index: {}]   ;;  %s7718_s1 = inlined_call_operand.vmem [shape: s32[256,8], index: 1, kind: input, shape index: {}]   ;;  %s7719_s2 = inlined_call_operand.vmem [shape: f32[512,128], index: 2, kind: input, shape index: {}]   ;;  %s7720_s3 = inlined_call_operand.hbm [shape: f32[128,128], index: 3, kind: input, shape index: {}]   ;;  %s7721_s4 = inlined_call_operand.vmem [shape: f32[1,128], index: 4, kind: input, shape index: {}]   ;;  %s7722_s5 = inlined_call_operand.hbm [shape: f32[256,128], index: 5, kind: output, shape index: {}]  }
   0x1   :  { %11 = vsyncpa [#allocation4], 0 }
   0x2   :  { %13 = vsyncpa [#allocation4 + $0x1], 0  ;;  %s4131_s18 = smov 0   ;;  %s4133_s19 = smov 0  }
   0x3   :  { %s4135_s20 = smov 0   ;;  %s4137_s21 = smov 0  }
   0x4 LB: > { %s4152_s22 = sadd.s32 4294967295, %s4085_s21   ;;  %s3418_s23 = sadd.s32 4294967294, %s4085_s21   ;;  %s4085_s21 = sphi %s4137_s21, %s8122_s21   ;;  %s4081_s20 = sphi %s4135_s20, %s8121_s20   ;;  %s4077_s19 = sphi %s4133_s19, %s8120_s19   ;;  %s4073_s18 = sphi %s4131_s18, %s8119_s18  }
   0x5   : > { %s4156_s24 = sadd.s32 1, %s4085_s21   ;;  %s141_s25 = sadd.s32 1, %s4081_s20 }
   0x6   : > { %s138_s26 = ssub.s32 %s4085_s21, %s4156_s24  ;;  %p151_p0 = scmp.ne.s32.totalorder %s4081_s20, %s4077_s19 }
   0x7   : > { %p139_p1 = scmp.eq.s32.totalorder %s138_s26, 0  ;;  %p152_p2 = scmp.eq.s32.totalorder %s4152_s22, 1 }
   0x8   : > { %p157_p3 = scmp.ne.s32.totalorder %s4077_s19, %s4073_s18  ;;  %p158_p4 = scmp.eq.s32.totalorder %s3418_s23, 1 }
   0x9   : > { %s4167_s27 = scalar_select %p139_p1, %s4081_s20, %s141_s25  }
   0xa   : > { %p4169_p5 = por %p152_p2, %p151_p0  ;;  %p4173_p6 = por %p158_p4, %p157_p3 }
   0xb   : > { %p3419_p7 = scmp.ge.s32.totalorder %s4085_s21, 1  ;;  %p165_p8 = scmp.lt.s32.totalorder %s4085_s21, 3 }
   0xc   : > { %s7849_s28 = scalar_select %p4169_p5, 1, 0 }
   0xd   : > { %s7850_s29 = scalar_select %p4173_p6, 1, 0 }
   0xe   : > { %p7723_p9 = scmp.eq.s32.totalorder %s4152_s22, 0  ;;  %p4180_p10 = pnand %p3419_p7, %p165_p8 }
   0xf   : > { %s4087_s6 = smov [#allocation2]   ;;  %s3991_s11 = scalar_lea.hbm %s7720_s3, 2048 }
  0x10   : > { %s7851_s30 = scalar_select %p4180_p10, 1, 0 }
  0x11   : > { %s180_s7 = sshll.u32 %s4087_s6, 4  ;;  %p3802_p11 = pneg %p4180_p10  ;;  %s181_s7 = int_to_ptr.vmem [resolvable:$true] %s180_s7 }
  0x12   : > { %p3992_p13 = scmp.ne.s32.totalorder %s7720_s3, %s3991_s11  ;;  %p3998_p3 = scmp.lt.u32.totalorder %s3991_s11, %s7720_s3 }
  0x13   : > { %p4188_p12 = pnand %p7723_p9, %p3802_p11 }
  0x15   : > { %p3993_p0 = pneg %p4188_p12 }
  0x17   : > { %p3994_p1 = pnand %p3993_p0, %p3992_p13 }
  0x19   : > { %p3995_p2 = pneg %p3994_p1 }
  0x1b   : > { %p4000_p4 = pnand %p3998_p3, %p3995_p2 }
  0x1d   : > { %4003 = shalt.err (!%p4000_p4)
}
  0x1e   : > { %s4004_s16 = scalar_lea.vmem %s181_s7, 2048  ;;  %p4012_p9 = scmp.lt.s32.totalorder %s181_s7, %s181_s7 }
  0x1f   : > { %p4005_p7 = scmp.ne.s32.totalorder %s181_s7, %s4004_s16  ;;  %p4013_p6 = scmp.lt.s32.totalorder %s4004_s16, %s4004_s16 }
  0x21   : > { %p4007_p8 = pnand %p4005_p7, %p3993_p0  ;;  %p4014_p5 = por %p4013_p6, %p4012_p9 }
  0x23   : > { %p4008_p11 = pneg %p4007_p8 }
  0x25   : > { %p4015_p10 = pnand %p4014_p5, %p4008_p11 }
  0x27   : > { %4018 = shalt.err (!%p4015_p10)
}
  0x28   : > { %s4088_s17 = smov 128   ;;  %s4089_s23 = smov 8  }
  0x29   : > { %3805 = dma.hbm_to_vmem [thread:$0]  (!%p4188_p12), %s7720_s3, 2048, %s181_s7, [#allocation3], %s4088_s17, %s4088_s17, %s4089_s23  }
  0x2a   : > { %p7853_p13 = scmp.ne.s32.totalorder %s7851_s30, 0 }
  0x2c   : > { %217 = sbr.rel (%p7853_p13) target bundleno = 1352 (0x548), region = 40 }
  0x33   : > { %p7854_p1 = scmp.eq.s32.totalorder %s4152_s22, 0 }
  0x35   : > { %4064 = dma.done.wait (%p7854_p1), [#allocation3], 2048   ;;  %p7855_p0 = pmov %p7854_p1 }
  0x36   : > { %s3425_s6 = sshll.u32 %s4152_s22, 4  ;;  %v4090_v0 = vmov 0   ;;  %v4091_v33 = vmov 1   ;;  %v4092_v36 = vmov 2   ;;  %s3435_s23 = sshll.u32 %s4152_s22, 11 }
  0x37   : > { %4066 = vsyncadd (%p7855_p0), [#allocation3], 4294965248  ;;  %3859 = vset.pattern.permute.xlu1 %v4090_v0  ;;  %3858 = vset.pattern.permute.xlu0 %v4090_v0  ;;  %p251_p5 = scmp.lt.s32.totalorder %s3425_s6, 31  ;;  %p8117_p9 = scmp.ne.s32.totalorder %s7849_s28, 0 }
  0x38   : > { %s4098_s8 = smov [#allocation5]  }
  0x39   : > { %s8124_s6 = smov (!%p251_p5, %s3425_s6), 31  ;;  %s4023_s10 = sshll.u32 %s4098_s8, 4  ;;  %s4024_s10 = int_to_ptr.vmem [resolvable:$false] %s4023_s10 }
  0x3a   : > { %s3426_s7 = sshll.u32 %s8124_s6, 3  ;;  %s4025_s11 = scalar_lea.vmem %s4024_s10, 4096 }
  0x3b   : > { %s4223_s9 = scalar_lea.vmem %s7718_s1, %s3426_s7  ;;  %s4292_s12 = scalar_lea.vmem %s7717_s0, %s3426_s7 }
  0x3c   : > { %v4226_v1 = vld [vmem:[%s4223_s9 + $0x10] sm:$0xff]  ;;  %v4229_v2 = vld [vmem:[%s4223_s9] sm:$0xff]  ;;  %v4234_v3 = vld [vmem:[%s4223_s9 + $0x18] sm:$0xff]  ;;  %s7667_s7 = scalar_lea.hbm %s7722_s5, %s3435_s23 }
  0x3d   : > { %307 = vperm.xlu1 %3859, %v4226_v1   ;;  %301 = vperm.xlu0 %3858, %v4229_v2   ;;  %v4237_v4 = vld [vmem:[%s4223_s9 + $0x8] sm:$0xff]  ;;  %v4245_v6 = vld [vmem:[%s4223_s9 + $0x20] sm:$0xff]  ;;  %v4250_v7 = vld [vmem:[%s4223_s9 + $0x38] sm:$0xff] }
  0x3e   : > { %v4242_v5 = vld [vmem:[%s4223_s9 + $0x28] sm:$0xff]  ;;  %v4253_v8 = vld [vmem:[%s4223_s9 + $0x30] sm:$0xff]  ;;  %v4261_v10 = vld [vmem:[%s4223_s9 + $0x40] sm:$0xff] }
  0x3f   : > { %v4258_v9 = vld [vmem:[%s4223_s9 + $0x48] sm:$0xff]  ;;  %v4266_v11 = vld [vmem:[%s4223_s9 + $0x58] sm:$0xff]  ;;  %v4269_v12 = vld [vmem:[%s4223_s9 + $0x50] sm:$0xff] }
  0x40   : > { %v4274_v13 = vld [vmem:[%s4223_s9 + $0x68] sm:$0xff]  ;;  %v4277_v14 = vld [vmem:[%s4223_s9 + $0x60] sm:$0xff]  ;;  %v4282_v15 = vld [vmem:[%s4223_s9 + $0x78] sm:$0xff] }
  0x41   : > { %310 = vperm.xlu1 %3859, %v4234_v3   ;;  %304 = vperm.xlu0 %3858, %v4237_v4   ;;  %v4285_v16 = vld [vmem:[%s4223_s9 + $0x70] sm:$0xff]  ;;  %v4297_v17 = vld [vmem:[%s4292_s12 + $0x8] sm:$0xff]  ;;  %v4300_v18 = vld [vmem:[%s4292_s12] sm:$0xff] }
  0x42   : > { %v4305_v19 = vld [vmem:[%s4292_s12 + $0x18] sm:$0xff]  ;;  %v4308_v20 = vld [vmem:[%s4292_s12 + $0x10] sm:$0xff]  ;;  %v4313_v21 = vld [vmem:[%s4292_s12 + $0x28] sm:$0xff] }
  0x43   : > { %v4316_v22 = vld [vmem:[%s4292_s12 + $0x20] sm:$0xff]  ;;  %v4321_v23 = vld [vmem:[%s4292_s12 + $0x38] sm:$0xff]  ;;  %v4324_v24 = vld [vmem:[%s4292_s12 + $0x30] sm:$0xff] }
  0x44   : > { %v4329_v25 = vld [vmem:[%s4292_s12 + $0x48] sm:$0xff]  ;;  %v4332_v26 = vld [vmem:[%s4292_s12 + $0x40] sm:$0xff]  ;;  %v4337_v27 = vld [vmem:[%s4292_s12 + $0x58] sm:$0xff] }
  0x45   : > { %316 = vperm.xlu1 %3859, %v4242_v5   ;;  %313 = vperm.xlu0 %3858, %v4245_v6   ;;  %v4340_v28 = vld [vmem:[%s4292_s12 + $0x50] sm:$0xff]  ;;  %v4345_v29 = vld [vmem:[%s4292_s12 + $0x68] sm:$0xff]  ;;  %v4348_v30 = vld [vmem:[%s4292_s12 + $0x60] sm:$0xff] }
  0x46   : > { %v4353_v31 = vld [vmem:[%s4292_s12 + $0x78] sm:$0xff]  ;;  %v4356_v32 = vld [vmem:[%s4292_s12 + $0x70] sm:$0xff] }
  0x49   : > { %322 = vperm.xlu1 %3859, %v4250_v7   ;;  %319 = vperm.xlu0 %3858, %v4253_v8  }
  0x4d   : > { %328 = vperm.xlu1 %3859, %v4258_v9   ;;  %325 = vperm.xlu0 %3858, %v4261_v10  }
  0x51   : > { %334 = vperm.xlu1 %3859, %v4266_v11   ;;  %331 = vperm.xlu0 %3858, %v4269_v12  }
  0x55   : > { %340 = vperm.xlu1 %3859, %v4274_v13   ;;  %337 = vperm.xlu0 %3858, %v4277_v14  }
  0x59   : > { %346 = vperm.xlu1 %3859, %v4282_v15   ;;  %343 = vperm.xlu0 %3858, %v4285_v16  }
  0x5d   : > { %419 = vperm.xlu1 %3859, %v4297_v17   ;;  %414 = vperm.xlu0 %3858, %v4300_v18  }
  0x61   : > { %429 = vperm.xlu1 %3859, %v4305_v19   ;;  %424 = vperm.xlu0 %3858, %v4308_v20  }
  0x65   : > { %439 = vperm.xlu1 %3859, %v4313_v21   ;;  %434 = vperm.xlu0 %3858, %v4316_v22  }
  0x69   : > { %449 = vperm.xlu1 %3859, %v4321_v23   ;;  %444 = vperm.xlu0 %3858, %v4324_v24  }
  0x6d   : > { %459 = vperm.xlu1 %3859, %v4329_v25   ;;  %454 = vperm.xlu0 %3858, %v4332_v26  }
  0x71   : > { %469 = vperm.xlu1 %3859, %v4337_v27   ;;  %464 = vperm.xlu0 %3858, %v4340_v28  }
  0x75   : > { %479 = vperm.xlu1 %3859, %v4345_v29   ;;  %474 = vperm.xlu0 %3858, %v4348_v30  }
  0x79   : > { %489 = vperm.xlu1 %3859, %v4353_v31   ;;  %484 = vperm.xlu0 %3858, %v4356_v32  }
  0x7d   : > { %3861 = vset.pattern.permute.xlu1 %v4091_v33  ;;  %3860 = vset.pattern.permute.xlu0 %v4091_v33 }
  0x7e   : > { %624 = vperm.xlu1 %3861, %v4237_v4   ;;  %621 = vperm.xlu0 %3860, %v4229_v2  }
  0x82   : > { %627 = vperm.xlu1 %3861, %v4226_v1   ;;  %630 = vperm.xlu0 %3860, %v4234_v3  }
  0x86   : > { %633 = vperm.xlu1 %3861, %v4245_v6   ;;  %636 = vperm.xlu0 %3860, %v4242_v5  }
  0x8a   : > { %639 = vperm.xlu1 %3861, %v4253_v8   ;;  %642 = vperm.xlu0 %3860, %v4250_v7  }
  0x8e   : > { %645 = vperm.xlu1 %3861, %v4261_v10   ;;  %648 = vperm.xlu0 %3860, %v4258_v9  }
  0x92   : > { %651 = vperm.xlu1 %3861, %v4269_v12   ;;  %654 = vperm.xlu0 %3860, %v4266_v11  }
  0x96   : > { %657 = vperm.xlu1 %3861, %v4277_v14   ;;  %660 = vperm.xlu0 %3860, %v4274_v13  }
  0x9a   : > { %663 = vperm.xlu1 %3861, %v4285_v16   ;;  %666 = vperm.xlu0 %3860, %v4282_v15  }
  0x9e   : > { %733 = vperm.xlu1 %3861, %v4300_v18   ;;  %737 = vperm.xlu0 %3860, %v4297_v17  }
  0xa2   : > { %741 = vperm.xlu1 %3861, %v4308_v20   ;;  %745 = vperm.xlu0 %3860, %v4305_v19  }
  0xa6   : > { %749 = vperm.xlu1 %3861, %v4316_v22   ;;  %753 = vperm.xlu0 %3860, %v4313_v21  }
  0xaa   : > { %757 = vperm.xlu1 %3861, %v4324_v24   ;;  %761 = vperm.xlu0 %3860, %v4321_v23  }
  0xae   : > { %765 = vperm.xlu1 %3861, %v4332_v26   ;;  %769 = vperm.xlu0 %3860, %v4329_v25  }
  0xb2   : > { %773 = vperm.xlu1 %3861, %v4340_v28   ;;  %777 = vperm.xlu0 %3860, %v4337_v27  }
  0xb6   : > { %781 = vperm.xlu1 %3861, %v4348_v30   ;;  %785 = vperm.xlu0 %3860, %v4345_v29  }
  0xba   : > { %789 = vperm.xlu1 %3861, %v4356_v32   ;;  %793 = vperm.xlu0 %3860, %v4353_v31  }
  0xbc   : > { %v4392_v34 = vpop.permute.xlu1 %307  ;;  %v4394_v35 = vpop.permute.xlu0 %301 }
  0xbe   : > { %3862 = vset.pattern.permute.xlu1 %v4092_v36  ;;  %3863 = vset.pattern.permute.xlu0 %v4092_v36 }
  0xbf   : > { %925 = vperm.xlu1 %3862, %v4229_v2   ;;  %928 = vperm.xlu0 %3863, %v4237_v4  }
  0xc0   : > { %v4398_v37 = vpop.permute.xlu1 %310  ;;  %v4400_v38 = vpop.permute.xlu0 %304 }
  0xc3   : > { %931 = vperm.xlu1 %3862, %v4226_v1   ;;  %937 = vperm.xlu0 %3863, %v4245_v6  }
  0xc4   : > { %v4404_v39 = vpop.permute.xlu1 %316  ;;  %v4406_v40 = vpop.permute.xlu0 %313 }
  0xc7   : > { %934 = vperm.xlu1 %3862, %v4234_v3   ;;  %943 = vperm.xlu0 %3863, %v4253_v8  }
  0xc8   : > { %v4410_v41 = vpop.permute.xlu1 %322  ;;  %v4412_v42 = vpop.permute.xlu0 %319 }
  0xc9   : > { %7856 = vst [vmem:[#allocation8_spill] sm:$0xff] %v4410_v41  ;;  %7857 = vst [vmem:[#allocation9_spill] sm:$0xff] %v4412_v42  ;;  %v7762_v41 = vmov 5   ;;  %v2764_v42 = vld [vmem:[%s7719_s2 + $0x80] sm:$0xff] }
  0xcb   : > { %940 = vperm.xlu1 %3862, %v4242_v5   ;;  %949 = vperm.xlu0 %3863, %v4261_v10  }
  0xcc   : > { %v4416_v43 = vpop.permute.xlu1 %328  ;;  %v4418_v44 = vpop.permute.xlu0 %325 }
  0xcd   : > { %7858 = vst [vmem:[#allocation10_spill] sm:$0xff] %v4416_v43  ;;  %7859 = vst [vmem:[#allocation11_spill] sm:$0xff] %v4418_v44 }
  0xcf   : > { %946 = vperm.xlu1 %3862, %v4250_v7   ;;  %955 = vperm.xlu0 %3863, %v4269_v12  }
  0xd0   : > { %v4422_v45 = vpop.permute.xlu1 %334  ;;  %v4424_v46 = vpop.permute.xlu0 %331 }
  0xd1   : > { %7860 = vst [vmem:[#allocation12_spill] sm:$0xff] %v4422_v45  ;;  %7861 = vst [vmem:[#allocation13_spill] sm:$0xff] %v4424_v46 }
  0xd3   : > { %952 = vperm.xlu1 %3862, %v4258_v9   ;;  %961 = vperm.xlu0 %3863, %v4277_v14  }
  0xd4   : > { %v4428_v47 = vpop.permute.xlu1 %340  ;;  %v4430_v48 = vpop.permute.xlu0 %337 }
  0xd5   : > { %7862 = vst [vmem:[#allocation14_spill] sm:$0xff] %v4428_v47  ;;  %7863 = vst [vmem:[#allocation15_spill] sm:$0xff] %v4430_v48  ;;  %v7738_v47 = vmov 3  }
  0xd7   : > { %958 = vperm.xlu1 %3862, %v4266_v11   ;;  %967 = vperm.xlu0 %3863, %v4285_v16  }
  0xd8   : > { %v4434_v49 = vpop.permute.xlu1 %346  ;;  %v4436_v50 = vpop.permute.xlu0 %343 }
  0xd9   : > { %7864 = vst [vmem:[#allocation16_spill] sm:$0xff] %v4434_v49  ;;  %7865 = vst [vmem:[#allocation17_spill] sm:$0xff] %v4436_v50  ;;  %v7732_v49 = vmov 6  }
  0xdb   : > { %964 = vperm.xlu1 %3862, %v4274_v13   ;;  %1037 = vperm.xlu0 %3863, %v4300_v18  }
  0xdc   : > { %v4440_v51 = vpop.permute.xlu1 %419  ;;  %v4442_v52 = vpop.permute.xlu0 %414 }
  0xdf   : > { %970 = vperm.xlu1 %3862, %v4282_v15   ;;  %1045 = vperm.xlu0 %3863, %v4308_v20  }
  0xe0   : > { %v4446_v53 = vpop.permute.xlu1 %429  ;;  %v4448_v54 = vpop.permute.xlu0 %424 }
  0xe3   : > { %1041 = vperm.xlu1 %3862, %v4297_v17   ;;  %1053 = vperm.xlu0 %3863, %v4316_v22  }
  0xe4   : > { %v4452_v55 = vpop.permute.xlu1 %439  ;;  %v4454_v56 = vpop.permute.xlu0 %434 }
  0xe7   : > { %1049 = vperm.xlu1 %3862, %v4305_v19   ;;  %1061 = vperm.xlu0 %3863, %v4324_v24  }
  0xe8   : > { %v4458_v57 = vpop.permute.xlu1 %449  ;;  %v4460_v58 = vpop.permute.xlu0 %444 }
  0xe9   : > { %7866 = vst [vmem:[#allocation18_spill] sm:$0xff] %v4458_v57  ;;  %7867 = vst [vmem:[#allocation19_spill] sm:$0xff] %v4460_v58 }
  0xeb   : > { %1057 = vperm.xlu1 %3862, %v4313_v21   ;;  %1069 = vperm.xlu0 %3863, %v4332_v26  }
  0xec   : > { %v4464_v59 = vpop.permute.xlu1 %459  ;;  %v4466_v60 = vpop.permute.xlu0 %454 }
  0xed   : > { %7868 = vst [vmem:[#allocation20_spill] sm:$0xff] %v4464_v59  ;;  %7869 = vst [vmem:[#allocation21_spill] sm:$0xff] %v4466_v60 }
  0xef   : > { %1065 = vperm.xlu1 %3862, %v4321_v23   ;;  %1077 = vperm.xlu0 %3863, %v4340_v28  }
  0xf0   : > { %v4470_v61 = vpop.permute.xlu1 %469  ;;  %v4472_v62 = vpop.permute.xlu0 %464 }
  0xf1   : > { %7870 = vst [vmem:[#allocation22_spill] sm:$0xff] %v4470_v61  ;;  %7871 = vst [vmem:[#allocation23_spill] sm:$0xff] %v4472_v62 }
  0xf3   : > { %1073 = vperm.xlu1 %3862, %v4329_v25   ;;  %1085 = vperm.xlu0 %3863, %v4348_v30  }
  0xf4   : > { %v4476_v63 = vpop.permute.xlu1 %479  ;;  %v4478_v0 = vpop.permute.xlu0 %474 }
  0xf5   : > { %7872 = vst [vmem:[#allocation24_spill] sm:$0xff] %v4476_v63  ;;  %7873 = vst [vmem:[#allocation25_spill] sm:$0xff] %v4478_v0 }
  0xf7   : > { %1081 = vperm.xlu1 %3862, %v4337_v27   ;;  %1093 = vperm.xlu0 %3863, %v4356_v32  }
  0xf8   : > { %v4482_v33 = vpop.permute.xlu1 %489  ;;  %v4484_v36 = vpop.permute.xlu0 %484 }
  0xf9   : > { %7874 = vst [vmem:[#allocation26_spill] sm:$0xff] %v4482_v33  ;;  %7875 = vst [vmem:[#allocation27_spill] sm:$0xff] %v4484_v36 }
  0xfb   : > { %1089 = vperm.xlu1 %3862, %v4345_v29   ;;  %3868 = vset.pattern.permute.xlu0 %v7732_v49 }
  0xfc   : > { %2141 = vperm.xlu0 %3868, %v4229_v2  }
  0xfd   : > { %v4489_v50 = vpop.permute.xlu1 %624  ;;  %v4491_v63 = vpop.permute.xlu0 %621 }
  0xff   : > { %1097 = vperm.xlu1 %3862, %v4353_v31  }
 0x100   : > { %3869 = vset.pattern.permute.xlu0 %v7738_v47 }
 0x101   : > { %v4495_v0 = vpop.permute.xlu1 %627  ;;  %v4497_v33 = vpop.permute.xlu0 %630  ;;  %1229 = vperm.xlu0 %3869, %v4229_v2  }
 0x102   : > { %7876 = vst [vmem:[#allocation28_spill] sm:$0xff] %v4495_v0  ;;  %7877 = vst [vmem:[#allocation29_spill] sm:$0xff] %v4497_v33  ;;  %v2777_v0 = vld [vmem:[%s7719_s2 + $0xe8] sm:$0xff]  ;;  %v2808_v33 = vld [vmem:[%s7719_s2 + $0x1e0] sm:$0xff] }
 0x103   : > { %3864 = vset.pattern.permute.xlu1 %v7738_v47 }
 0x104   : > { %1232 = vperm.xlu1 %3864, %v4237_v4  }
 0x105   : > { %v4502_v49 = vpop.permute.xlu1 %633  ;;  %v4504_v36 = vpop.permute.xlu0 %636  ;;  %1238 = vperm.xlu0 %3869, %v4234_v3  }
 0x106   : > { %7878 = vst [vmem:[#allocation30_spill] sm:$0xff] %v4502_v49  ;;  %7879 = vst [vmem:[#allocation31_spill] sm:$0xff] %v4504_v36 }
 0x108   : > { %1235 = vperm.xlu1 %3864, %v4226_v1  }
 0x109   : > { %v4508_v48 = vpop.permute.xlu1 %639  ;;  %v4510_v61 = vpop.permute.xlu0 %642  ;;  %1244 = vperm.xlu0 %3869, %v4242_v5  }
 0x10a   : > { %7880 = vst [vmem:[#allocation32_spill] sm:$0xff] %v4508_v48  ;;  %7881 = vst [vmem:[#allocation33_spill] sm:$0xff] %v4510_v61 }
 0x10c   : > { %1241 = vperm.xlu1 %3864, %v4245_v6  }
 0x10d   : > { %v4514_v45 = vpop.permute.xlu1 %645  ;;  %v4516_v47 = vpop.permute.xlu0 %648  ;;  %1250 = vperm.xlu0 %3869, %v4250_v7  }
 0x10e   : > { %7882 = vst [vmem:[#allocation34_spill] sm:$0xff] %v4514_v45  ;;  %7883 = vst [vmem:[#allocation35_spill] sm:$0xff] %v4516_v47  ;;  %v7757_v45 = vmov 4  }
 0x110   : > { %1247 = vperm.xlu1 %3864, %v4253_v8  }
 0x111   : > { %v4520_v62 = vpop.permute.xlu1 %651  ;;  %v4522_v46 = vpop.permute.xlu0 %654  ;;  %1256 = vperm.xlu0 %3869, %v4258_v9  }
 0x112   : > { %7884 = vst [vmem:[#allocation36_spill] sm:$0xff] %v4520_v62  ;;  %7885 = vst [vmem:[#allocation37_spill] sm:$0xff] %v4522_v46 }
 0x114   : > { %1253 = vperm.xlu1 %3864, %v4261_v10  }
 0x115   : > { %v4526_v59 = vpop.permute.xlu1 %657  ;;  %v4528_v43 = vpop.permute.xlu0 %660  ;;  %1262 = vperm.xlu0 %3869, %v4266_v11  }
 0x116   : > { %7886 = vst [vmem:[#allocation38_spill] sm:$0xff] %v4526_v59  ;;  %7887 = vst [vmem:[#allocation39_spill] sm:$0xff] %v4528_v43 }
 0x118   : > { %1259 = vperm.xlu1 %3864, %v4269_v12  }
 0x119   : > { %v4532_v47 = vpop.permute.xlu1 %663  ;;  %v4534_v60 = vpop.permute.xlu0 %666  ;;  %1268 = vperm.xlu0 %3869, %v4274_v13  }
 0x11a   : > { %7888 = vst [vmem:[#allocation40_spill] sm:$0xff] %v4532_v47  ;;  %7889 = vst [vmem:[#allocation41_spill] sm:$0xff] %v4534_v60 }
 0x11c   : > { %1265 = vperm.xlu1 %3864, %v4277_v14  }
 0x11d   : > { %v4538_v46 = vpop.permute.xlu1 %733  ;;  %v4540_v62 = vpop.permute.xlu0 %737  ;;  %1274 = vperm.xlu0 %3869, %v4282_v15  }
 0x11e   : > { %7890 = vst [vmem:[#allocation42_spill] sm:$0xff] %v4540_v62 }
 0x120   : > { %1271 = vperm.xlu1 %3864, %v4285_v16  }
 0x121   : > { %v4544_v43 = vpop.permute.xlu1 %741  ;;  %v4546_v59 = vpop.permute.xlu0 %745  ;;  %1345 = vperm.xlu0 %3869, %v4297_v17  }
 0x122   : > { %7891 = vst [vmem:[#allocation43_spill] sm:$0xff] %v4544_v43  ;;  %7892 = vst [vmem:[#allocation44_spill] sm:$0xff] %v4546_v59 }
 0x124   : > { %1341 = vperm.xlu1 %3864, %v4300_v18  }
 0x125   : > { %v4550_v60 = vpop.permute.xlu1 %749  ;;  %v4552_v47 = vpop.permute.xlu0 %753  ;;  %1353 = vperm.xlu0 %3869, %v4305_v19  }
 0x126   : > { %7893 = vst [vmem:[#allocation45_spill] sm:$0xff] %v4550_v60  ;;  %7894 = vst [vmem:[#allocation46_spill] sm:$0xff] %v4552_v47  ;;  %v2796_v47 = vld [vmem:[%s7719_s2 + $0x180] sm:$0xff] }
 0x128   : > { %3865 = vset.pattern.permute.xlu1 %v7757_v45 }
 0x129   : > { %1645 = vperm.xlu1 %3865, %v4300_v18   ;;  %v4557_v44 = vpop.permute.xlu1 %757  ;;  %v4559_v57 = vpop.permute.xlu0 %761  ;;  %1357 = vperm.xlu0 %3869, %v4316_v22  }
 0x12a   : > { %7895 = vst [vmem:[#allocation47_spill] sm:$0xff] %v4557_v44  ;;  %7896 = vst [vmem:[#allocation48_spill] sm:$0xff] %v4559_v57 }
 0x12d   : > { %3866 = vset.pattern.permute.xlu1 %v7762_v41  ;;  %v4563_v61 = vpop.permute.xlu1 %765  ;;  %v4565_v58 = vpop.permute.xlu0 %769  ;;  %1361 = vperm.xlu0 %3869, %v4313_v21   ;;  %v7903_v41 = vmov 4  }
 0x12e   : > { %7897 = vst [vmem:[#allocation49_spill] sm:$0xff] %v4563_v61  ;;  %7898 = vst [vmem:[#allocation50_spill] sm:$0xff] %v4565_v58  ;;  %1837 = vperm.xlu1 %3866, %v4229_v2  }
 0x131   : > { %v4569_v45 = vpop.permute.xlu1 %773  ;;  %v4571_v48 = vpop.permute.xlu0 %777  ;;  %1365 = vperm.xlu0 %3869, %v4324_v24  }
 0x132   : > { %7899 = vst [vmem:[#allocation51_spill] sm:$0xff] %v4569_v45  ;;  %7900 = vst [vmem:[#allocation52_spill] sm:$0xff] %v4571_v48  ;;  %1949 = vperm.xlu1 %3866, %v4300_v18  }
 0x135   : > { %v4575_v57 = vpop.permute.xlu1 %781  ;;  %v4577_v44 = vpop.permute.xlu0 %785  ;;  %1369 = vperm.xlu0 %3869, %v4321_v23  }
 0x136   : > { %7901 = vst [vmem:[#allocation53_spill] sm:$0xff] %v4575_v57  ;;  %7902 = vst [vmem:[#allocation54_spill] sm:$0xff] %v4577_v44  ;;  %3867 = vset.pattern.permute.xlu1 %v7903_v41  ;;  %v7907_v44 = vmov 6  }
 0x137   : > { %1536 = vperm.xlu1 %3867, %v4237_v4  }
 0x139   : > { %v4582_v58 = vpop.permute.xlu1 %789  ;;  %v4584_v61 = vpop.permute.xlu0 %793  ;;  %1373 = vperm.xlu0 %3869, %v4332_v26  }
 0x13a   : > { %7904 = vst [vmem:[#allocation55_spill] sm:$0xff] %v4582_v58  ;;  %7905 = vst [vmem:[#allocation56_spill] sm:$0xff] %v4584_v61  ;;  %v7776_v61 = vmov 7  }
 0x13b   : > { %1649 = vperm.xlu1 %3867, %v4297_v17  }
 0x13d   : > { %1377 = vperm.xlu0 %3869, %v4329_v25  }
 0x13e   : > { %v4589_v48 = vpop.permute.xlu1 %925  ;;  %v4591_v57 = vpop.permute.xlu0 %928 }
 0x13f   : > { %7906 = vst [vmem:[#allocation57_spill] sm:$0xff] %v4591_v57  ;;  %3870 = vset.pattern.permute.xlu1 %v7907_v44  ;;  %v2765_v57 = vld [vmem:[%s7719_s2 + $0x88] sm:$0xff] }
 0x140   : > { %2253 = vperm.xlu1 %3870, %v4300_v18  }
 0x141   : > { %1381 = vperm.xlu0 %3869, %v4340_v28   ;;  %v3684_v28 = vpack.c.bf16 %v2765_v57, %v2764_v42  ;;  %v2780_v42 = vld [vmem:[%s7719_s2 + $0x100] sm:$0xff]  ;;  %v2781_v57 = vld [vmem:[%s7719_s2 + $0x108] sm:$0xff] }
 0x142   : > { %v4596_v45 = vpop.permute.xlu1 %931  ;;  %v4598_v58 = vpop.permute.xlu0 %937 }
 0x143   : > { %7908 = vst [vmem:[#allocation58_spill] sm:$0xff] %v4596_v45  ;;  %7909 = vst [vmem:[#allocation59_spill] sm:$0xff] %v4598_v58  ;;  %v2797_v58 = vld [vmem:[%s7719_s2 + $0x188] sm:$0xff]  ;;  %3685 = vmatprep.subr.bf16.mxu0 %v3684_v28  ;;  %v2750_v28 = vld [vmem:[%s7719_s2 + $0x10] sm:$0xff] }
 0x144   : > { %3871 = vset.pattern.permute.xlu1 %v7776_v61  ;;  %v2748_v61 = vld [vmem:[%s7719_s2] sm:$0xff]  ;;  %v2749_v45 = vld [vmem:[%s7719_s2 + $0x8] sm:$0xff]  ;;  %v3716_v59 = vpack.c.bf16 %v2797_v58, %v2796_v47  ;;  %v2798_v47 = vld [vmem:[%s7719_s2 + $0x190] sm:$0xff]  ;;  %v7912_v58 = vmov 3  }
 0x145   : > { %2445 = vperm.xlu1 %3871, %v4229_v2   ;;  %1385 = vperm.xlu0 %3869, %v4337_v27   ;;  %v3686_v43 = vpack.c.bf16 %v2749_v45, %v2748_v61  ;;  %v2766_v27 = vld [vmem:[%s7719_s2 + $0x90] sm:$0xff]  ;;  %v2767_v45 = vld [vmem:[%s7719_s2 + $0x98] sm:$0xff]  ;;  %v3718_v61 = vpack.c.bf16 %v2781_v57, %v2780_v42 }
 0x146   : > { %v4621_v60 = vpop.permute.xlu1 %934  ;;  %v4629_v36 = vpop.permute.xlu0 %943  ;;  %3717 = vmatprep.subr.bf16.mxu1 %v3716_v59  ;;  %v2799_v59 = vld [vmem:[%s7719_s2 + $0x198] sm:$0xff]  ;;  %v2782_v57 = vld [vmem:[%s7719_s2 + $0x110] sm:$0xff] }
 0x147   : > { %7910 = vst [vmem:[#allocation60_spill] sm:$0xff] %v4621_v60  ;;  %7911 = vst [vmem:[#allocation61_spill] sm:$0xff] %v4629_v36  ;;  %3687 = vmatpush3.bf16.msra.mxu0 %v3686_v43  ;;  %v3688_v60 = vpack.c.bf16 %v2767_v45, %v2766_v27  ;;  %v2751_v36 = vld [vmem:[%s7719_s2 + $0x18] sm:$0xff]  ;;  %v3720_v43 = vpack.c.bf16 %v2799_v59, %v2798_v47  ;;  %3719 = vmatpush3.bf16.msra.mxu1 %v3718_v61  ;;  %v2800_v47 = vld [vmem:[%s7719_s2 + $0x1a0] sm:$0xff] }
 0x148   : > { %v3690_v42 = vpack.c.bf16 %v2751_v36, %v2750_v28  ;;  %v2783_v27 = vld [vmem:[%s7719_s2 + $0x118] sm:$0xff]  ;;  %v2769_v36 = vld [vmem:[%s7719_s2 + $0xa8] sm:$0xff]  ;;  %v2752_v61 = vld [vmem:[%s7719_s2 + $0x20] sm:$0xff] }
 0x149   : > { %3872 = vset.pattern.permute.xlu1 %v7912_v58  ;;  %1389 = vperm.xlu0 %3869, %v4348_v30   ;;  %v2768_v30 = vld [vmem:[%s7719_s2 + $0xa0] sm:$0xff]  ;;  %v3722_v59 = vpack.c.bf16 %v2783_v27, %v2782_v57 }
 0x14a   : > { %1349 = vperm.xlu1 %3872, %v4308_v20   ;;  %v4652_v58 = vpop.permute.xlu1 %940  ;;  %v4660_v45 = vpop.permute.xlu0 %949  ;;  %3689 = vmatprep.subr.bf16.mxu0 %v3688_v60  ;;  %v3692_v28 = vpack.c.bf16 %v2769_v36, %v2768_v30  ;;  %v2801_v60 = vld [vmem:[%s7719_s2 + $0x1a8] sm:$0xff]  ;;  %v2784_v27 = vld [vmem:[%s7719_s2 + $0x120] sm:$0xff] }
 0x14b   : > { %7913 = vst [vmem:[#allocation62_spill] sm:$0xff] %v4652_v58  ;;  %7914 = vst [vmem:[#allocation63_spill] sm:$0xff] %v4660_v45  ;;  %3721 = vmatprep.subr.bf16.mxu1 %v3720_v43  ;;  %3691 = vmatpush3.bf16.msra.mxu0 %v3690_v42  ;;  %v2753_v45 = vld [vmem:[%s7719_s2 + $0x28] sm:$0xff]  ;;  %v7915_v58 = vmov 7   ;;  %v3724_v42 = vpack.c.bf16 %v2801_v60, %v2800_v47  ;;  %v2802_v47 = vld [vmem:[%s7719_s2 + $0x1b0] sm:$0xff] }
 0x14c   : > { %v3694_v57 = vpack.c.bf16 %v2753_v45, %v2752_v61  ;;  %v2785_v30 = vld [vmem:[%s7719_s2 + $0x128] sm:$0xff]  ;;  %3723 = vmatpush3.bf16.msra.mxu1 %v3722_v59  ;;  %v2771_v45 = vld [vmem:[%s7719_s2 + $0xb8] sm:$0xff]  ;;  %3693 = vmatprep.subr.bf16.mxu0 %v3692_v28  ;;  %v2754_v59 = vld [vmem:[%s7719_s2 + $0x30] sm:$0xff] }
 0x14d   : > { %1393 = vperm.xlu0 %3869, %v4345_v29   ;;  %v2770_v29 = vld [vmem:[%s7719_s2 + $0xb0] sm:$0xff]  ;;  %3725 = vmatprep.subr.bf16.mxu1 %v3724_v42  ;;  %v3726_v60 = vpack.c.bf16 %v2785_v30, %v2784_v27  ;;  %v2787_v27 = vld [vmem:[%s7719_s2 + $0x138] sm:$0xff] }
 0x14e   : > { %3873 = vset.pattern.permute.xlu1 %v7915_v58  ;;  %v4682_v43 = vpop.permute.xlu1 %946  ;;  %v4690_v36 = vpop.permute.xlu0 %955  ;;  %v3696_v61 = vpack.c.bf16 %v2771_v45, %v2770_v29  ;;  %v2786_v42 = vld [vmem:[%s7719_s2 + $0x130] sm:$0xff]  ;;  %v2804_v45 = vld [vmem:[%s7719_s2 + $0x1c0] sm:$0xff] }
 0x14f   : > { %7916 = vst [vmem:[#allocation64_spill] sm:$0xff] %v4682_v43  ;;  %7917 = vst [vmem:[#allocation65_spill] sm:$0xff] %v4690_v36  ;;  %2557 = vperm.xlu1 %3873, %v4300_v18   ;;  %v2803_v18 = vld [vmem:[%s7719_s2 + $0x1b8] sm:$0xff]  ;;  %3695 = vmatpush3.bf16.msra.mxu0 %v3694_v57  ;;  %v2773_v57 = vld [vmem:[%s7719_s2 + $0xc8] sm:$0xff] }
 0x150   : > { %v2755_v36 = vld [vmem:[%s7719_s2 + $0x38] sm:$0xff]  ;;  %v3728_v28 = vpack.c.bf16 %v2803_v18, %v2802_v47  ;;  %3727 = vmatpush3.bf16.msra.mxu1 %v3726_v60  ;;  %3697 = vmatprep.subr.bf16.mxu0 %v3696_v61  ;;  %v3730_v47 = vpack.c.bf16 %v2787_v27, %v2786_v42  ;;  %v2756_v18 = vld [vmem:[%s7719_s2 + $0x40] sm:$0xff]  ;;  %v2789_v27 = vld [vmem:[%s7719_s2 + $0x148] sm:$0xff] }
 0x151   : > { %1397 = vperm.xlu0 %3869, %v4356_v32   ;;  %v3698_v29 = vpack.c.bf16 %v2755_v36, %v2754_v59  ;;  %v2772_v32 = vld [vmem:[%s7719_s2 + $0xc0] sm:$0xff]  ;;  %v2805_v36 = vld [vmem:[%s7719_s2 + $0x1c8] sm:$0xff] }
 0x152   : > { %v4712_v43 = vpop.permute.xlu1 %952  ;;  %v4720_v30 = vpop.permute.xlu0 %961  ;;  %v2757_v59 = vld [vmem:[%s7719_s2 + $0x48] sm:$0xff]  ;;  %3729 = vmatprep.subr.bf16.mxu1 %v3728_v28  ;;  %v3700_v60 = vpack.c.bf16 %v2773_v57, %v2772_v32  ;;  %v2788_v42 = vld [vmem:[%s7719_s2 + $0x140] sm:$0xff]  ;;  %v2774_v28 = vld [vmem:[%s7719_s2 + $0xd0] sm:$0xff] }
 0x153   : > { %7918 = vst [vmem:[#allocation66_spill] sm:$0xff] %v4712_v43  ;;  %7919 = vst [vmem:[#allocation67_spill] sm:$0xff] %v4720_v30  ;;  %3874 = vset.pattern.permute.xlu1 %v7907_v44  ;;  %3699 = vmatpush3.bf16.msra.mxu0 %v3698_v29  ;;  %v3732_v43 = vpack.c.bf16 %v2805_v36, %v2804_v45  ;;  %v3702_v49 = vpack.c.bf16 %v2757_v59, %v2756_v18  ;;  %v2775_v29 = vld [vmem:[%s7719_s2 + $0xd8] sm:$0xff]  ;;  %v2806_v32 = vld [vmem:[%s7719_s2 + $0x1d0] sm:$0xff] }
 0x154   : > { %2144 = vperm.xlu1 %3874, %v4237_v4   ;;  %3731 = vmatpush3.bf16.msra.mxu1 %v3730_v47  ;;  %v2807_v57 = vld [vmem:[%s7719_s2 + $0x1d8] sm:$0xff]  ;;  %v3734_v36 = vpack.c.bf16 %v2789_v27, %v2788_v42  ;;  %v2758_v47 = vld [vmem:[%s7719_s2 + $0x50] sm:$0xff]  ;;  %v3704_v42 = vpack.c.bf16 %v2775_v29, %v2774_v28  ;;  %v2760_v29 = vld [vmem:[%s7719_s2 + $0x60] sm:$0xff] }
 0x155   : > { %1401 = vperm.xlu0 %3869, %v4353_v31   ;;  %3701 = vmatprep.subr.bf16.mxu0 %v3700_v60  ;;  %v2759_v18 = vld [vmem:[%s7719_s2 + $0x58] sm:$0xff]  ;;  %v3736_v27 = vpack.c.bf16 %v2807_v57, %v2806_v32  ;;  %v2761_v57 = vld [vmem:[%s7719_s2 + $0x68] sm:$0xff] }
 0x156   : > { %v4743_v30 = vpop.permute.xlu1 %958  ;;  %v4745_v61 = vpop.permute.xlu0 %967  ;;  %v2791_v60 = vld [vmem:[%s7719_s2 + $0x158] sm:$0xff]  ;;  %3733 = vmatprep.subr.bf16.mxu1 %v3732_v43  ;;  %v3710_v62 = vpack.c.bf16 %v2761_v57, %v2760_v29  ;;  %v2810_v29 = vld [vmem:[%s7719_s2 + $0x1f0] sm:$0xff] }
 0x157   : > { %7920 = vst [vmem:[#allocation68_spill] sm:$0xff] %v4743_v30  ;;  %7921 = vst [vmem:[#allocation69_spill] sm:$0xff] %v4745_v61  ;;  %v2790_v61 = vld [vmem:[%s7719_s2 + $0x150] sm:$0xff]  ;;  %3703 = vmatpush3.bf16.msra.mxu0 %v3702_v49  ;;  %v7924_v30 = vmov 5   ;;  %v2809_v49 = vld [vmem:[%s7719_s2 + $0x1e8] sm:$0xff] }
 0x158   : > { %3875 = vset.pattern.permute.xlu1 %v7903_v41  ;;  %3735 = vmatpush3.bf16.msra.mxu1 %v3734_v36  ;;  %v3738_v28 = vpack.c.bf16 %v2791_v60, %v2790_v61  ;;  %v2793_v61 = vld [vmem:[%s7719_s2 + $0x168] sm:$0xff]  ;;  %v2778_v60 = vld [vmem:[%s7719_s2 + $0xf0] sm:$0xff] }
 0x159   : > { %1653 = vperm.xlu1 %3875, %v4308_v20   ;;  %3950 = vset.pattern.permute.xlu0 %v7903_v41 }
 0x15a   : > { %v4768_v45 = vpop.permute.xlu1 %964  ;;  %1533 = vperm.xlu0 %3950, %v4229_v2   ;;  %v4777_v59 = vpop.permute.xlu0 %1037  ;;  %v3706_v2 = vpack.c.bf16 %v2759_v18, %v2758_v47  ;;  %v2792_v47 = vld [vmem:[%s7719_s2 + $0x160] sm:$0xff]  ;;  %3705 = vmatprep.subr.bf16.mxu0 %v3704_v42  ;;  %v3740_v18 = vpack.c.bf16 %v2809_v49, %v2808_v33 }
 0x15b   : > { %7922 = vst [vmem:[#allocation70_spill] sm:$0xff] %v4768_v45  ;;  %7923 = vst [vmem:[#allocation71_spill] sm:$0xff] %v4777_v59  ;;  %v2776_v45 = vld [vmem:[%s7719_s2 + $0xe0] sm:$0xff]  ;;  %3737 = vmatprep.subr.bf16.mxu1 %v3736_v27  ;;  %v3742_v59 = vpack.c.bf16 %v2793_v61, %v2792_v47  ;;  %v2762_v47 = vld [vmem:[%s7719_s2 + $0x70] sm:$0xff] }
 0x15c   : > { %v3708_v36 = vpack.c.bf16 %v2777_v0, %v2776_v45  ;;  %3707 = vmatpush3.bf16.msra.mxu0 %v3706_v2  ;;  %3739 = vmatpush3.bf16.msra.mxu1 %v3738_v28  ;;  %v2794_v61 = vld [vmem:[%s7719_s2 + $0x170] sm:$0xff] }
 0x15d   : > { %3876 = vset.pattern.permute.xlu1 %v7924_v30  ;;  %3741 = vmatprep.subr.bf16.mxu1 %v3740_v18 }
 0x15e   : > { %1843 = vperm.xlu1 %3876, %v4226_v1   ;;  %v4799_v43 = vpop.permute.xlu1 %970  ;;  %1539 = vperm.xlu0 %3950, %v4226_v1   ;;  %v4805_v32 = vpop.permute.xlu0 %1045 }
 0x15f   : > { %7925 = vst [vmem:[#allocation72_spill] sm:$0xff] %v4799_v43  ;;  %7926 = vst [vmem:[#allocation73_spill] sm:$0xff] %v4805_v32  ;;  %v2779_v43 = vld [vmem:[%s7719_s2 + $0xf8] sm:$0xff]  ;;  %3709 = vmatprep.subr.bf16.mxu0 %v3708_v36 }
 0x160   : > { %v3712_v33 = vpack.c.bf16 %v2779_v43, %v2778_v60  ;;  %3711 = vmatpush3.bf16.msra.mxu0 %v3710_v62  ;;  %3743 = vmatpush3.bf16.msra.mxu1 %v3742_v59  ;;  %v2795_v36 = vld [vmem:[%s7719_s2 + $0x178] sm:$0xff] }
 0x162   : > { %3877 = vset.pattern.permute.xlu1 %v7915_v58  ;;  %v4823_v32 = vpop.permute.xlu1 %1041  ;;  %1542 = vperm.xlu0 %3950, %v4234_v3   ;;  %v4826_v0 = vpop.permute.xlu0 %1053 }
 0x163   : > { %7927 = vst [vmem:[#allocation74_spill] sm:$0xff] %v4826_v0  ;;  %2448 = vperm.xlu1 %3877, %v4237_v4   ;;  %3713 = vmatprep.subr.bf16.mxu0 %v3712_v33 }
 0x166   : > { %v4829_v45 = vpop.permute.xlu1 %1049  ;;  %1545 = vperm.xlu0 %3950, %v4245_v6   ;;  %v4832_v42 = vpop.permute.xlu0 %1061 }
 0x167   : > { %7928 = vst [vmem:[#allocation75_spill] sm:$0xff] %v4832_v42  ;;  %3878 = vset.pattern.permute.xlu1 %v7924_v30 }
 0x168   : > { %1957 = vperm.xlu1 %3878, %v4308_v20  }
 0x16a   : > { %v4836_v27 = vpop.permute.xlu1 %1057  ;;  %1548 = vperm.xlu0 %3950, %v4242_v5   ;;  %v4839_v2 = vpop.permute.xlu0 %1069 }
 0x16b   : > { %7929 = vst [vmem:[#allocation76_spill] sm:$0xff] %v4836_v27  ;;  %7930 = vst [vmem:[#allocation77_spill] sm:$0xff] %v4839_v2 }
 0x16c   : > { %3879 = vset.pattern.permute.xlu1 %v7915_v58 }
 0x16d   : > { %2561 = vperm.xlu1 %3879, %v4297_v17  }
 0x16e   : > { %v4843_v62 = vpop.permute.xlu1 %1065  ;;  %1551 = vperm.xlu0 %3950, %v4253_v8   ;;  %v4846_v59 = vpop.permute.xlu0 %1077 }
 0x16f   : > { %7931 = vst [vmem:[#allocation78_spill] sm:$0xff] %v4843_v62  ;;  %7932 = vst [vmem:[#allocation79_spill] sm:$0xff] %v4846_v59 }
 0x171   : > { %3880 = vset.pattern.permute.xlu1 %v7907_v44 }
 0x172   : > { %2147 = vperm.xlu1 %3880, %v4226_v1   ;;  %v4850_v49 = vpop.permute.xlu1 %1073  ;;  %1554 = vperm.xlu0 %3950, %v4250_v7   ;;  %v4853_v43 = vpop.permute.xlu0 %1085  ;;  %v2811_v7 = vld [vmem:[%s7719_s2 + $0x1f8] sm:$0xff] }
 0x173   : > { %7933 = vst [vmem:[#allocation80_spill] sm:$0xff] %v4850_v49  ;;  %7934 = vst [vmem:[#allocation81_spill] sm:$0xff] %v4853_v43  ;;  %v3744_v60 = vpack.c.bf16 %v2811_v7, %v2810_v29 }
 0x175   : > { %3745 = vmatprep.subr.bf16.mxu1 %v3744_v60 }
 0x176   : > { %3881 = vset.pattern.permute.xlu1 %v7903_v41  ;;  %v4856_v28 = vpop.permute.xlu1 %1081  ;;  %1557 = vperm.xlu0 %3950, %v4261_v10   ;;  %v4860_v8 = vpop.permute.xlu0 %1093  ;;  %v2763_v10 = vld [vmem:[%s7719_s2 + $0x78] sm:$0xff] }
 0x177   : > { %7935 = vst [vmem:[#allocation82_spill] sm:$0xff] %v4856_v28  ;;  %1657 = vperm.xlu1 %3881, %v4305_v19   ;;  %7936 = vst [vmem:[#allocation83_spill] sm:$0xff] %v4860_v8  ;;  %v3714_v33 = vpack.c.bf16 %v2763_v10, %v2762_v47 }
 0x179   : > { %3715 = vmatpush3.bf16.msra.mxu0 %v3714_v33 }
 0x17a   : > { %v4865_v57 = vpop.permute.xlu1 %1089  ;;  %1560 = vperm.xlu0 %3950, %v4258_v9  }
 0x17b   : > { %7937 = vst [vmem:[#allocation84_spill] sm:$0xff] %v4865_v57  ;;  %3882 = vset.pattern.permute.xlu1 %v7924_v30  ;;  %v4885_v18 = vpop.permute.xlu0 %2141  ;;  %v3746_v57 = vpack.c.bf16 %v2795_v36, %v2794_v61 }
 0x17c   : > { %1846 = vperm.xlu1 %3882, %v4234_v3  }
 0x17d   : > { %3747 = vmatpush3.bf16.msra.mxu1 %v3746_v57 }
 0x17e   : > { %v4887_v8 = vpop.permute.xlu1 %1097  ;;  %1563 = vperm.xlu0 %3950, %v4269_v12  }
 0x17f   : > { %7938 = vst [vmem:[#allocation85_spill] sm:$0xff] %v4887_v8 }
 0x180   : > { %3883 = vset.pattern.permute.xlu1 %v7915_v58  ;;  %v4891_v9 = vpop.permute.xlu0 %1229 }
 0x181   : > { %2451 = vperm.xlu1 %3883, %v4226_v1  }
 0x182   : > { %1566 = vperm.xlu0 %3950, %v4266_v11  }
 0x183   : > { %v4895_v43 = vpop.permute.xlu1 %1232 }
 0x184   : > { %7939 = vst [vmem:[#allocation86_spill] sm:$0xff] %v4895_v43  ;;  %v4897_v29 = vpop.permute.xlu0 %1238 }
 0x185   : > { %3884 = vset.pattern.permute.xlu1 %v7924_v30 }
 0x186   : > { %1961 = vperm.xlu1 %3884, %v4305_v19   ;;  %1569 = vperm.xlu0 %3950, %v4277_v14  }
 0x187   : > { %v4902_v12 = vpop.permute.xlu1 %1235 }
 0x188   : > { %7940 = vst [vmem:[#allocation87_spill] sm:$0xff] %v4902_v12  ;;  %v4904_v7 = vpop.permute.xlu0 %1244  ;;  %v3967_v12 = vld [vmem:[%s4292_s12 + $0x60] sm:$0xff] }
 0x189   : > { %7941 = vst [vmem:[#allocation88_spill] sm:$0xff] %v4904_v7 }
 0x18a   : > { %3885 = vset.pattern.permute.xlu1 %v7915_v58  ;;  %1572 = vperm.xlu0 %3950, %v4274_v13  }
 0x18b   : > { %2565 = vperm.xlu1 %3885, %v4308_v20   ;;  %v4909_v1 = vpop.permute.xlu1 %1241 }
 0x18c   : > { %7942 = vst [vmem:[#allocation89_spill] sm:$0xff] %v4909_v1  ;;  %v4911_v11 = vpop.permute.xlu0 %1250 }
 0x18d   : > { %7943 = vst [vmem:[#allocation90_spill] sm:$0xff] %v4911_v11  ;;  %v3963_v11 = vld [vmem:[%s4292_s12 + $0x50] sm:$0xff] }
 0x18e   : > { %1575 = vperm.xlu0 %3950, %v4285_v16  }
 0x18f   : > { %3886 = vset.pattern.permute.xlu1 %v7907_v44  ;;  %v4915_v57 = vpop.permute.xlu1 %1247 }
 0x190   : > { %7944 = vst [vmem:[#allocation91_spill] sm:$0xff] %v4915_v57  ;;  %2150 = vperm.xlu1 %3886, %v4234_v3   ;;  %v4918_v14 = vpop.permute.xlu0 %1256 }
 0x191   : > { %7945 = vst [vmem:[#allocation92_spill] sm:$0xff] %v4918_v14 }
 0x192   : > { %1578 = vperm.xlu0 %3950, %v4282_v15  }
 0x193   : > { %v4921_v47 = vpop.permute.xlu1 %1253 }
 0x194   : > { %7946 = vst [vmem:[#allocation93_spill] sm:$0xff] %v4921_v47  ;;  %3887 = vset.pattern.permute.xlu1 %v7903_v41  ;;  %v4924_v13 = vpop.permute.xlu0 %1262 }
 0x195   : > { %7947 = vst [vmem:[#allocation94_spill] sm:$0xff] %v4924_v13  ;;  %1661 = vperm.xlu1 %3887, %v4316_v22   ;;  %v295_v13 = vlaneseq }
 0x196   : > { %3953 = vset.pattern.permute.xlu0 %v7924_v30 }
 0x197   : > { %v4928_v16 = vpop.permute.xlu1 %1259  ;;  %1840 = vperm.xlu0 %3953, %v4237_v4  }
 0x198   : > { %7948 = vst [vmem:[#allocation95_spill] sm:$0xff] %v4928_v16  ;;  %v4931_v10 = vpop.permute.xlu0 %1268  ;;  %v4988_v16 = vand.u32 127, %v295_v13 }
 0x199   : > { %3888 = vset.pattern.permute.xlu1 %v7924_v30 }
 0x19a   : > { %1849 = vperm.xlu1 %3888, %v4245_v6   ;;  %v4996_v14 = vadd.s32 128, %v4988_v16  ;;  %vm348_vm4 = vcmp.eq.s32.totalorder %v4988_v16, %v4394_v35  ;;  %vm352_vm8 = vcmp.eq.s32.totalorder %v4988_v16, %v4400_v38  ;;  %vm360_vm12 = vcmp.eq.s32.totalorder %v4988_v16, %v4398_v37 }
 0x19b   : > { %v4935_v15 = vpop.permute.xlu1 %1265  ;;  %1953 = vperm.xlu0 %3953, %v4297_v17   ;;  %vm368_vm3 = vcmp.eq.s32.totalorder %v4988_v16, %v4404_v39 }
 0x19c   : > { %7949 = vst [vmem:[#allocation96_spill] sm:$0xff] %v4935_v15  ;;  %v4938_v61 = vpop.permute.xlu0 %1274  ;;  %vm349_vm5 = vcmp.eq.s32.totalorder %v4996_v14, %v4394_v35  ;;  %vm353_vm9 = vcmp.eq.s32.totalorder %v4996_v14, %v4400_v38  ;;  %vm361_vm13 = vcmp.eq.s32.totalorder %v4996_v14, %v4398_v37  ;;  %vm369_vm2 = vcmp.eq.s32.totalorder %v4996_v14, %v4404_v39 }
 0x19e   : > { %3889 = vset.pattern.permute.xlu1 %v7915_v58 }
 0x19f   : > { %2454 = vperm.xlu1 %3889, %v4234_v3   ;;  %v4942_v36 = vpop.permute.xlu1 %1271  ;;  %2009 = vperm.xlu0 %3953, %v4353_v31  }
 0x1a0   : > { %7950 = vst [vmem:[#allocation97_spill] sm:$0xff] %v4942_v36  ;;  %v4945_v4 = vpop.permute.xlu0 %1345 }
 0x1a1   : > { %7951 = vst [vmem:[#allocation98_spill] sm:$0xff] %v4945_v4  ;;  %v5251_v4 = vld [vmem:[%s4292_s12 + $0x30] sm:$0xff] }
 0x1a3   : > { %3890 = vset.pattern.permute.xlu1 %v7924_v30  ;;  %v4948_v60 = vpop.permute.xlu1 %1341  ;;  %3958 = vset.pattern.permute.xlu0 %v7907_v44 }
 0x1a4   : > { %1965 = vperm.xlu1 %3890, %v4316_v22   ;;  %2257 = vperm.xlu0 %3958, %v4297_v17   ;;  %v4953_v33 = vpop.permute.xlu0 %1353 }
 0x1a8   : > { %3891 = vset.pattern.permute.xlu1 %v7915_v58  ;;  %v4956_v3 = vpop.permute.xlu1 %1645  ;;  %2261 = vperm.xlu0 %3958, %v4308_v20   ;;  %v4959_v31 = vpop.permute.xlu0 %1357 }
 0x1a9   : > { %7952 = vst [vmem:[#allocation99_spill] sm:$0xff] %v4959_v31  ;;  %2569 = vperm.xlu1 %3891, %v4305_v19  }
 0x1ac   : > { %2265 = vperm.xlu0 %3958, %v4305_v19   ;;  %v4963_v8 = vpop.permute.xlu0 %1361 }
 0x1ad   : > { %7953 = vst [vmem:[#allocation100_spill] sm:$0xff] %v4963_v8  ;;  %3892 = vset.pattern.permute.xlu1 %v7907_v44  ;;  %v4966_v36 = vpop.permute.xlu1 %1837 }
 0x1ae   : > { %2153 = vperm.xlu1 %3892, %v4245_v6  }
 0x1b0   : > { %2269 = vperm.xlu0 %3958, %v4316_v22   ;;  %v4970_v17 = vpop.permute.xlu0 %1365 }
 0x1b1   : > { %7954 = vst [vmem:[#allocation101_spill] sm:$0xff] %v4970_v17  ;;  %v4972_v15 = vpop.permute.xlu1 %1949 }
 0x1b2   : > { %3893 = vset.pattern.permute.xlu1 %v7903_v41 }
 0x1b3   : > { %1665 = vperm.xlu1 %3893, %v4313_v21  }
 0x1b4   : > { %v4976_v20 = vpop.permute.xlu0 %1369  ;;  %2273 = vperm.xlu0 %3958, %v4313_v21  }
 0x1b5   : > { %7955 = vst [vmem:[#allocation102_spill] sm:$0xff] %v4976_v20 }
 0x1b6   : > { %v4979_v19 = vpop.permute.xlu1 %1536 }
 0x1b7   : > { %7956 = vst [vmem:[#allocation103_spill] sm:$0xff] %v4979_v19  ;;  %3894 = vset.pattern.permute.xlu1 %v7924_v30 }
 0x1b8   : > { %1852 = vperm.xlu1 %3894, %v4242_v5   ;;  %v4983_v22 = vpop.permute.xlu0 %1373  ;;  %2277 = vperm.xlu0 %3958, %v4324_v24   ;;  %v4999_v5 = vadd.s32 256, %v4988_v16  ;;  %v5002_v24 = vadd.s32 384, %v4988_v16 }
 0x1b9   : > { %7957 = vst [vmem:[#allocation104_spill] sm:$0xff] %v4983_v22  ;;  %v493_v22 = vsel %vm349_vm5, %v4442_v52, 0.0 }
 0x1ba   : > { %v4986_v28 = vpop.permute.xlu1 %1649  ;;  %vm350_vm6 = vcmp.eq.s32.totalorder %v4999_v5, %v4394_v35  ;;  %vm351_vm7 = vcmp.eq.s32.totalorder %v5002_v24, %v4394_v35  ;;  %vm354_vm10 = vcmp.eq.s32.totalorder %v4999_v5, %v4400_v38  ;;  %vm355_vm11 = vcmp.eq.s32.totalorder %v5002_v24, %v4400_v38 }
 0x1bb   : > { %7958 = vst [vmem:[#allocation105_spill] sm:$0xff] %v4986_v28  ;;  %vm370_vm1 = vcmp.eq.s32.totalorder %v4999_v5, %v4404_v39  ;;  %vm371_vm0 = vcmp.eq.s32.totalorder %v5002_v24, %v4404_v39  ;;  %v494_v47 = vsel %vm350_vm6, %v4442_v52, 0.0  ;;  %v495_v38 = vsel %vm351_vm7, %v4442_v52, 0.0  ;;  %v3965_v28 = vld [vmem:[%s4292_s12 + $0x58] sm:$0xff] }
 0x1bc   : > { %3895 = vset.pattern.permute.xlu1 %v7915_v58  ;;  %v4991_v59 = vpop.permute.xlu0 %1377  ;;  %2281 = vperm.xlu0 %3958, %v4321_v23   ;;  %v5065_v23 = vsel %vm352_vm8, %v4440_v51, 0.0  ;;  %vm7963_vm5 = vcmp.eq.s32.totalorder %v5002_v24, %v4398_v37  ;;  %vm668_vm6 = vcmp.eq.s32.totalorder %v4988_v16, %v4491_v63  ;;  %vm669_vm7 = vcmp.eq.s32.totalorder %v4996_v14, %v4491_v63 }
 0x1bd   : > { %7959 = vst [vmem:[#allocation106_spill] sm:$0xff] %v4991_v59  ;;  %2457 = vperm.xlu1 %3895, %v4245_v6   ;;  %v492_v59 = vsel %vm348_vm4, %v4442_v52, 0.0  ;;  %vm7962_vm4 = vcmp.eq.s32.totalorder %v4999_v5, %v4398_v37  ;;  %v5124_v35 = vsel %vm7963_vm5, %v4446_v53, 0.0  ;;  %vm670_vm8 = vcmp.eq.s32.totalorder %v4999_v5, %v4491_v63 }
 0x1be   : > { %v5118_v2 = vsel %vm7962_vm4, %v4446_v53, 0.0  ;;  %vm7966_vm4 = vcmp.eq.s32.totalorder %v4988_v16, %v4392_v34  ;;  %vm7967_vm5 = vcmp.eq.s32.totalorder %v4996_v14, %v4392_v34  ;;  %vm7968_vm15 = vcmp.eq.s32.totalorder %v4999_v5, %v4392_v34 }
 0x1bf   : > { %v5004_v49 = vpop.permute.xlu1 %2253  ;;  %v5152_v37 = vsel %vm7966_vm4, %v4448_v54, 0.0  ;;  %vm7969_vm14 = vcmp.eq.s32.totalorder %v5002_v24, %v4392_v34  ;;  %v796_v62 = vsel %vm668_vm6, %v4538_v46, 0.0  ;;  %v797_v17 = vsel %vm669_vm7, %v4538_v46, 0.0 }
 0x1c0   : > { %v5006_v13 = vpop.permute.xlu0 %1381  ;;  %2285 = vperm.xlu0 %3958, %v4332_v26   ;;  %v5077_v26 = vsel %vm354_vm10, %v4440_v51, 0.0  ;;  %vm1328_vm10 = vcmp.eq.s32.totalorder %v4988_v16, %v4931_v10  ;;  %v798_v57 = vsel %vm670_vm8, %v4538_v46, 0.0  ;;  %vm673_vm6 = vcmp.eq.s32.totalorder %v4996_v14, %v4489_v50 }
 0x1c1   : > { %7960 = vst [vmem:[#allocation107_spill] sm:$0xff] %v5006_v13  ;;  %3896 = vset.pattern.permute.xlu1 %v7924_v30  ;;  %v3962_v13 = vld [vmem:[%s4292_s12 + $0x20] sm:$0xff]  ;;  %v862_v8 = vadd.f32 %v798_v57, %v494_v47  ;;  %vm973_vm7 = vcmp.eq.s32.totalorder %v4996_v14, %v4589_v48  ;;  %vm974_vm8 = vcmp.eq.s32.totalorder %v4999_v5, %v4589_v48 }
 0x1c2   : > { %1969 = vperm.xlu1 %3896, %v4313_v21   ;;  %vm1276_vm4 = vcmp.eq.s32.totalorder %v4988_v16, %v4891_v9 }
 0x1c4   : > { %v5035_v6 = vpop.permute.xlu1 %2445  ;;  %v5045_v21 = vpop.permute.xlu0 %1385  ;;  %2289 = vperm.xlu0 %3958, %v4329_v25   ;;  %v5071_v25 = vsel %vm353_vm9, %v4440_v51, 0.0  ;;  %vm671_vm9 = vcmp.eq.s32.totalorder %v5002_v24, %v4491_v63  ;;  %v5164_v63 = vsel %vm7968_vm15, %v4448_v54, 0.0  ;;  %vm366_vm15 = vcmp.eq.s32.totalorder %v4999_v5, %v4406_v40 }
 0x1c5   : > { %7961 = vst [vmem:[#allocation108_spill] sm:$0xff] %v5045_v21  ;;  %v5083_v21 = vsel %vm355_vm11, %v4440_v51, 0.0  ;;  %v5106_v51 = vsel %vm360_vm12, %v4446_v53, 0.0  ;;  %vm1329_vm11 = vcmp.eq.s32.totalorder %v4996_v14, %v4931_v10  ;;  %vm1330_vm12 = vcmp.eq.s32.totalorder %v4999_v5, %v4931_v10 }
 0x1c6   : > { %3897 = vset.pattern.permute.xlu1 %v7915_v58  ;;  %v799_v42 = vsel %vm671_vm9, %v4538_v46, 0.0  ;;  %vm975_vm9 = vcmp.eq.s32.totalorder %v5002_v24, %v4589_v48  ;;  %v5333_v27 = vsel %vm366_vm15, %v4454_v56, 0.0 }
 0x1c7   : > { %2573 = vperm.xlu1 %3897, %v3962_v13   ;;  %v5112_v13 = vsel %vm361_vm13, %v4446_v53, 0.0  ;;  %vm1331_vm13 = vcmp.eq.s32.totalorder %v5002_v24, %v4931_v10  ;;  %v5158_v53 = vsel %vm7967_vm5, %v4448_v54, 0.0  ;;  %v5223_v10 = vsel %vm370_vm1, %v4452_v55, 0.0 }
 0x1c8   : > { %v5126_v52 = vpop.permute.xlu0 %1389  ;;  %2293 = vperm.xlu0 %3958, %v3963_v11   ;;  %v5170_v11 = vsel %vm7969_vm14, %v4448_v54, 0.0  ;;  %vm367_vm14 = vcmp.eq.s32.totalorder %v5002_v24, %v4406_v40  ;;  %v863_v7 = vadd.f32 %v799_v42, %v495_v38  ;;  %vm972_vm1 = vcmp.eq.s32.totalorder %v4988_v16, %v4589_v48  ;;  %v7978_v48 = vld [vmem:[#allocation71_spill] sm:$0xff] }
 0x1c9   : > { %7964 = vst [vmem:[#allocation109_spill] sm:$0xff] %v5126_v52  ;;  %v5128_v20 = vpop.permute.xlu1 %1349  ;;  %v5173_v52 = vld [vmem:[%s4223_s9 + $0x28] sm:$0xff]  ;;  %vm1277_vm5 = vcmp.eq.s32.totalorder %v4996_v14, %v4891_v9  ;;  %v1103_v57 = vsel %vm975_vm9, %v7978_v48, 0.0  ;;  %v5339_v0 = vsel %vm367_vm14, %v4454_v56, 0.0  ;;  %vm2190_vm9 = vcmp.eq.s32.totalorder %v4999_v5, %v4885_v18 }
 0x1ca   : > { %7965 = vst [vmem:[#allocation110_spill] sm:$0xff] %v5128_v20  ;;  %v1167_v1 = vadd.f32 %v1103_v57, %v863_v7 }
 0x1cb   : > { %3898 = vset.pattern.permute.xlu1 %v7907_v44 }
 0x1cc   : > { %2156 = vperm.xlu1 %3898, %v5173_v52   ;;  %v1394_v20 = vpop.permute.xlu0 %1393  ;;  %2297 = vperm.xlu0 %3958, %v3965_v28  }
 0x1cd   : > { %v5188_v34 = vsel %vm1328_vm10, %v1394_v20, 0.0  ;;  %v5193_v54 = vsel %vm1329_vm11, %v1394_v20, 0.0  ;;  %v5198_v46 = vsel %vm1330_vm12, %v1394_v20, 0.0  ;;  %v5203_v28 = vsel %vm1331_vm13, %v1394_v20, 0.0 }
 0x1ce   : > { %7970 = vst [vmem:[#allocation111_spill] sm:$0xff] %v5188_v34  ;;  %7971 = vst [vmem:[#allocation112_spill] sm:$0xff] %v5193_v54  ;;  %v5205_v19 = vpop.permute.xlu1 %2557  ;;  %v5211_v34 = vsel %vm368_vm3, %v4452_v55, 0.0  ;;  %v5229_v20 = vsel %vm371_vm0, %v4452_v55, 0.0  ;;  %vm7974_vm3 = vcmp.eq.s32.totalorder %v4988_v16, %v4406_v40  ;;  %v860_v54 = vadd.f32 %v796_v62, %v492_v59 }
 0x1cf   : > { %7972 = vst [vmem:[#allocation113_spill] sm:$0xff] %v5198_v46  ;;  %7973 = vst [vmem:[#allocation114_spill] sm:$0xff] %v5203_v28  ;;  %v5217_v46 = vsel %vm369_vm2, %v4452_v55, 0.0  ;;  %v5235_v28 = vsel %vm7974_vm3, %v4454_v56, 0.0  ;;  %vm672_vm2 = vcmp.eq.s32.totalorder %v4988_v16, %v4489_v50  ;;  %vm7975_vm0 = vcmp.eq.s32.totalorder %v4996_v14, %v4406_v40 }
 0x1d0   : > { %3899 = vset.pattern.permute.xlu1 %v7903_v41  ;;  %v5246_v39 = vsel %vm7975_vm0, %v4454_v56, 0.0  ;;  %v861_v55 = vadd.f32 %v797_v17, %v493_v22  ;;  %v5248_v31 = vpop.permute.xlu0 %1397  ;;  %2301 = vperm.xlu0 %3958, %v3967_v12   ;;  %vm1336_vm10 = vcmp.eq.s32.totalorder %v4988_v16, %v4938_v61  ;;  %vm1337_vm11 = vcmp.eq.s32.totalorder %v4996_v14, %v4938_v61  ;;  %v3968_v17 = vld [vmem:[%s4292_s12 + $0x68] sm:$0xff] }
 0x1d1   : > { %7976 = vst [vmem:[#allocation115_spill] sm:$0xff] %v5248_v31  ;;  %1669 = vperm.xlu1 %3899, %v5251_v4   ;;  %vm1338_vm12 = vcmp.eq.s32.totalorder %v4999_v5, %v4938_v61  ;;  %vm1339_vm13 = vcmp.eq.s32.totalorder %v5002_v24, %v4938_v61  ;;  %vm1278_vm3 = vcmp.eq.s32.totalorder %v4999_v5, %v4891_v9  ;;  %v1100_v62 = vsel %vm972_vm1, %v7978_v48, 0.0 }
 0x1d2   : > { %vm1279_vm0 = vcmp.eq.s32.totalorder %v5002_v24, %v4891_v9  ;;  %v1101_v59 = vsel %vm973_vm7, %v7978_v48, 0.0  ;;  %v1102_v12 = vsel %vm974_vm8, %v7978_v48, 0.0  ;;  %v1406_v61 = vsel %vm1278_vm3, %v4948_v60, 0.0  ;;  %v7984_v9 = vld [vmem:[#allocation42_spill] sm:$0xff] }
 0x1d3   : > { %v5271_v42 = vpop.permute.xlu1 %2144  ;;  %v5351_v7 = vsel %vm673_vm6, %v7984_v9, 0.0  ;;  %vm2189_vm6 = vcmp.eq.s32.totalorder %v4996_v14, %v4885_v18  ;;  %vm2191_vm7 = vcmp.eq.s32.totalorder %v5002_v24, %v4885_v18  ;;  %vm2188_vm8 = vcmp.eq.s32.totalorder %v4988_v16, %v4885_v18 }
 0x1d4   : > { %7977 = vst [vmem:[#allocation116_spill] sm:$0xff] %v5271_v42  ;;  %v1402_v47 = vpop.permute.xlu0 %1401  ;;  %2305 = vperm.xlu0 %3958, %v3968_v17   ;;  %v5308_v17 = vld [vmem:[%s4223_s9 + $0x30] sm:$0xff]  ;;  %v1166_v42 = vadd.f32 %v1102_v12, %v862_v8  ;;  %v5345_v8 = vsel %vm672_vm2, %v7984_v9, 0.0 }
 0x1d5   : > { %3900 = vset.pattern.permute.xlu1 %v7924_v30  ;;  %v5290_v22 = vsel %vm1336_vm10, %v1402_v47, 0.0  ;;  %v5295_v38 = vsel %vm1337_vm11, %v1402_v47, 0.0  ;;  %v5300_v31 = vsel %vm1338_vm12, %v1402_v47, 0.0  ;;  %v5305_v48 = vsel %vm1339_vm13, %v1402_v47, 0.0 }
 0x1d6   : > { %7979 = vst [vmem:[#allocation71_spill] sm:$0xff] %v5290_v22  ;;  %7980 = vst [vmem:[#allocation117_spill] sm:$0xff] %v5295_v38  ;;  %1855 = vperm.xlu1 %3900, %v5308_v17   ;;  %v1404_v38 = vsel %vm1276_vm4, %v4948_v60, 0.0  ;;  %v1407_v47 = vsel %vm1279_vm0, %v4948_v60, 0.0  ;;  %v1165_v22 = vadd.f32 %v1101_v59, %v861_v55  ;;  %v1470_v55 = vadd.f32 %v1406_v61, %v1166_v42 }
 0x1d7   : > { %7981 = vst [vmem:[#allocation118_spill] sm:$0xff] %v5300_v31  ;;  %7982 = vst [vmem:[#allocation119_spill] sm:$0xff] %v5305_v48  ;;  %v1405_v31 = vsel %vm1277_vm5, %v4948_v60, 0.0  ;;  %v1164_v48 = vadd.f32 %v1100_v62, %v860_v54  ;;  %v3970_v60 = vld [vmem:[%s4292_s12 + $0x70] sm:$0xff]  ;;  %v1471_v56 = vadd.f32 %v1407_v47, %v1167_v1  ;;  %v3971_v1 = vld [vmem:[%s4292_s12 + $0x78] sm:$0xff]  ;;  %vm674_vm10 = vcmp.eq.s32.totalorder %v4999_v5, %v4489_v50 }
 0x1d8   : > { %v5327_v43 = vpop.permute.xlu1 %1653  ;;  %2309 = vperm.xlu0 %3958, %v3970_v60   ;;  %v1469_v40 = vadd.f32 %v1405_v31, %v1165_v22  ;;  %vm675_vm11 = vcmp.eq.s32.totalorder %v5002_v24, %v4489_v50  ;;  %v7987_v47 = vld [vmem:[#allocation28_spill] sm:$0xff]  ;;  %vm1885_vm5 = vcmp.eq.s32.totalorder %v4996_v14, %v4966_v36  ;;  %vm1887_vm4 = vcmp.eq.s32.totalorder %v5002_v24, %v4966_v36 }
 0x1d9   : > { %7983 = vst [vmem:[#allocation120_spill] sm:$0xff] %v5327_v43  ;;  %v1468_v54 = vadd.f32 %v1404_v38, %v1164_v48  ;;  %v1534_v62 = vpop.permute.xlu0 %1533  ;;  %vm676_vm3 = vcmp.eq.s32.totalorder %v4988_v16, %v7987_v47  ;;  %vm677_vm0 = vcmp.eq.s32.totalorder %v4996_v14, %v7987_v47 }
 0x1da   : > { %3901 = vset.pattern.permute.xlu1 %v7915_v58  ;;  %vm1580_vm15 = vcmp.eq.s32.totalorder %v4988_v16, %v1534_v62  ;;  %vm1581_vm14 = vcmp.eq.s32.totalorder %v4996_v14, %v1534_v62  ;;  %vm1582_vm2 = vcmp.eq.s32.totalorder %v4999_v5, %v1534_v62  ;;  %vm1583_vm1 = vcmp.eq.s32.totalorder %v5002_v24, %v1534_v62 }
 0x1db   : > { %2460 = vperm.xlu1 %3901, %v5173_v52   ;;  %v1708_v59 = vsel %vm1580_vm15, %v4956_v3, 0.0  ;;  %v1709_v42 = vsel %vm1581_vm14, %v4956_v3, 0.0  ;;  %v1710_v12 = vsel %vm1582_vm2, %v4956_v3, 0.0  ;;  %v1711_v31 = vsel %vm1583_vm1, %v4956_v3, 0.0  ;;  %v7986_v3 = vld [vmem:[#allocation29_spill] sm:$0xff] }
 0x1dc   : > { %2313 = vperm.xlu0 %3958, %v3971_v1   ;;  %v1772_v52 = vadd.f32 %v1708_v59, %v1468_v54  ;;  %v1774_v22 = vadd.f32 %v1710_v12, %v1470_v55  ;;  %v1773_v48 = vadd.f32 %v1709_v42, %v1469_v40  ;;  %v1775_v61 = vadd.f32 %v1711_v31, %v1471_v56  ;;  %v7988_v40 = vld [vmem:[#allocation30_spill] sm:$0xff] }
 0x1dd   : > { %v5364_v57 = vpop.permute.xlu1 %1843  ;;  %v5387_v38 = vpop.permute.xlu0 %1539  ;;  %vm678_vm15 = vcmp.eq.s32.totalorder %v4999_v5, %v7987_v47  ;;  %vm679_vm14 = vcmp.eq.s32.totalorder %v5002_v24, %v7987_v47  ;;  %vm1884_vm2 = vcmp.eq.s32.totalorder %v4988_v16, %v4966_v36  ;;  %vm1886_vm1 = vcmp.eq.s32.totalorder %v4999_v5, %v4966_v36 }
 0x1de   : > { %7985 = vst [vmem:[#allocation42_spill] sm:$0xff] %v5364_v57  ;;  %v2012_v60 = vsel %vm1884_vm2, %v4972_v15, 0.0  ;;  %v2014_v54 = vsel %vm1886_vm1, %v4972_v15, 0.0  ;;  %v2013_v55 = vsel %vm1885_vm5, %v4972_v15, 0.0  ;;  %v2015_v62 = vsel %vm1887_vm4, %v4972_v15, 0.0 }
 0x1df   : > { %3902 = vset.pattern.permute.xlu1 %v7924_v30  ;;  %vm684_vm13 = vcmp.eq.s32.totalorder %v4988_v16, %v7988_v40  ;;  %vm685_vm12 = vcmp.eq.s32.totalorder %v4996_v14, %v7988_v40  ;;  %v2317_v36 = vsel %vm2189_vm6, %v5004_v49, 0.0  ;;  %v2319_v56 = vsel %vm2191_vm7, %v5004_v49, 0.0 }
 0x1e0   : > { %1973 = vperm.xlu1 %3902, %v5251_v4   ;;  %v2316_v15 = vsel %vm2188_vm8, %v5004_v49, 0.0  ;;  %v2318_v59 = vsel %vm2190_vm9, %v5004_v49, 0.0  ;;  %3961 = vset.pattern.permute.xlu0 %v7915_v58  ;;  %v2077_v31 = vadd.f32 %v2013_v55, %v1773_v48  ;;  %v2079_v1 = vadd.f32 %v2015_v62, %v1775_v61  ;;  %v7989_v55 = vld [vmem:[#allocation31_spill] sm:$0xff] }
 0x1e1   : > { %v5434_v12 = vpop.permute.xlu0 %1542  ;;  %v2076_v57 = vadd.f32 %v2012_v60, %v1772_v52  ;;  %v2078_v43 = vadd.f32 %v2014_v54, %v1774_v22  ;;  %vm2493_vm6 = vcmp.eq.s32.totalorder %v4996_v14, %v5035_v6  ;;  %vm2495_vm7 = vcmp.eq.s32.totalorder %v5002_v24, %v5035_v6  ;;  %v3972_v60 = vld [vmem:[%s4292_s12 + $0x28] sm:$0xff] }
 0x1e2   : > { %v5432_v42 = vpop.permute.xlu1 %2448  ;;  %vm2492_vm8 = vcmp.eq.s32.totalorder %v4988_v16, %v5035_v6  ;;  %vm2494_vm9 = vcmp.eq.s32.totalorder %v4999_v5, %v5035_v6  ;;  %vm686_vm4 = vcmp.eq.s32.totalorder %v4999_v5, %v7988_v40  ;;  %vm687_vm5 = vcmp.eq.s32.totalorder %v5002_v24, %v7988_v40 }
 0x1e3   : > { %v2381_v49 = vadd.f32 %v2317_v36, %v2077_v31  ;;  %v2383_v18 = vadd.f32 %v2319_v56, %v2079_v1  ;;  %v2380_v52 = vadd.f32 %v2316_v15, %v2076_v57  ;;  %v2382_v22 = vadd.f32 %v2318_v59, %v2078_v43 }
 0x1e4   : > { %3903 = vset.pattern.permute.xlu1 %v7915_v58  ;;  %v2621_v48 = vsel %vm2493_vm6, %v5205_v19, 0.0  ;;  %v2623_v61 = vsel %vm2495_vm7, %v5205_v19, 0.0  ;;  %v2620_v6 = vsel %vm2492_vm8, %v5205_v19, 0.0  ;;  %v2622_v54 = vsel %vm2494_vm9, %v5205_v19, 0.0 }
 0x1e5   : > { %2577 = vperm.xlu1 %3903, %v3972_v60   ;;  %vm688_vm2 = vcmp.eq.s32.totalorder %v4988_v16, %v7989_v55  ;;  %vm689_vm1 = vcmp.eq.s32.totalorder %v4996_v14, %v7989_v55  ;;  %v2685_v62 = vadd.f32 %v2621_v48, %v2381_v49  ;;  %v2687_v36 = vadd.f32 %v2623_v61, %v2383_v18  ;;  %v5458_v56 = vpop.permute.xlu0 %1545  ;;  %v7990_v49 = vld [vmem:[#allocation43_spill] sm:$0xff]  ;;  %v7996_v61 = vld [vmem:[#allocation45_spill] sm:$0xff] }
 0x1e6   : > { %v2684_v57 = vadd.f32 %v2620_v6, %v2380_v52  ;;  %v2686_v43 = vadd.f32 %v2622_v54, %v2382_v22  ;;  %v802_v15 = vsel %vm674_vm10, %v7984_v9, 0.0  ;;  %v803_v19 = vsel %vm675_vm11, %v7984_v9, 0.0  ;;  %v7991_v9 = vld [vmem:[#allocation44_spill] sm:$0xff] }
 0x1e7   : > { %v5470_v59 = vadd.f32 %v5345_v8, %v5065_v23  ;;  %v5474_v31 = vadd.f32 %v5351_v7, %v5071_v25  ;;  %v5476_v1 = vpop.permute.xlu1 %1957  ;;  %v804_v18 = vsel %vm676_vm3, %v7990_v49, 0.0  ;;  %v805_v50 = vsel %vm677_vm0, %v7990_v49, 0.0  ;;  %2876 = vmatprep.mubr.f32.mxu0 %v2685_v62  ;;  %3021 = vmatprep.mubr.f32.mxu1 %v2687_v36 }
 0x1e8   : > { %v806_v23 = vsel %vm678_vm15, %v7990_v49, 0.0  ;;  %v807_v25 = vsel %vm679_vm14, %v7990_v49, 0.0  ;;  %vm7992_vm10 = vcmp.eq.s32.totalorder %v4988_v16, %v7986_v3  ;;  %vm7993_vm11 = vcmp.eq.s32.totalorder %v4996_v14, %v7986_v3  ;;  %2877 = vmatmul.mubr.f32.vlgmr.msra.gmra.mrb[0].mxu0 %v2684_v57  ;;  %3022 = vmatmul.mubr.f32.vlgmr.msra.gmra.mrb[0].mxu1 %v2686_v43 }
 0x1e9   : > { %v808_v8 = vsel %vm7992_vm10, %v7991_v9, 0.0  ;;  %v809_v7 = vsel %vm7993_vm11, %v7991_v9, 0.0  ;;  %vm7994_vm3 = vcmp.eq.s32.totalorder %v4999_v5, %v7986_v3  ;;  %vm7995_vm0 = vcmp.eq.s32.totalorder %v5002_v24, %v7986_v3  ;;  %3904 = vset.pattern.permute.xlu1 %v7907_v44  ;;  %v5529_v6 = vpop.permute.xlu0 %1548 }
 0x1ea   : > { %v810_v52 = vsel %vm7994_vm3, %v7991_v9, 0.0  ;;  %v811_v47 = vsel %vm7995_vm0, %v7991_v9, 0.0  ;;  %vm690_vm15 = vcmp.eq.s32.totalorder %v4999_v5, %v7989_v55  ;;  %vm691_vm14 = vcmp.eq.s32.totalorder %v5002_v24, %v7989_v55  ;;  %2159 = vperm.xlu1 %3904, %v5308_v17  }
 0x1eb   : > { %v5515_v22 = vadd.f32 %v802_v15, %v5077_v26  ;;  %v5518_v48 = vadd.f32 %v803_v19, %v5083_v21  ;;  %v812_v3 = vsel %vm684_vm13, %v7996_v61, 0.0  ;;  %v813_v60 = vsel %vm685_vm12, %v7996_v61, 0.0  ;;  %v5588_v19 = vld [vmem:[%s4292_s12 + $0x38] sm:$0xff] }
 0x1ec   : > { %v5532_v26 = vadd.f32 %v804_v18, %v5152_v37  ;;  %v5535_v21 = vadd.f32 %v805_v50, %v5158_v53  ;;  %v5538_v54 = vadd.f32 %v806_v23, %v5164_v63  ;;  %v5541_v62 = vadd.f32 %v807_v25, %v5170_v11  ;;  %v5548_v15 = vpop.permute.xlu1 %2561  ;;  %v7998_v18 = vld [vmem:[#allocation46_spill] sm:$0xff] }
 0x1ed   : > { %v872_v36 = vadd.f32 %v808_v8, %v5106_v51  ;;  %v873_v57 = vadd.f32 %v809_v7, %v5112_v13  ;;  %v874_v43 = vadd.f32 %v810_v52, %v5118_v2  ;;  %v875_v37 = vadd.f32 %v811_v47, %v5124_v35  ;;  %v7997_v13 = vld [vmem:[#allocation60_spill] sm:$0xff]  ;;  %v5572_v35 = vpop.permute.xlu0 %1551 }
 0x1ee   : > { %v814_v53 = vsel %vm686_vm4, %v7996_v61, 0.0  ;;  %v815_v63 = vsel %vm687_vm5, %v7996_v61, 0.0  ;;  %v5559_v51 = vadd.f32 %v812_v3, %v5235_v28  ;;  %v5562_v2 = vadd.f32 %v813_v60, %v5246_v39  ;;  %3905 = vset.pattern.permute.xlu1 %v7903_v41 }
 0x1ef   : > { %vm984_vm12 = vcmp.eq.s32.totalorder %v4988_v16, %v7997_v13  ;;  %vm985_vm13 = vcmp.eq.s32.totalorder %v4996_v14, %v7997_v13  ;;  %vm986_vm6 = vcmp.eq.s32.totalorder %v4999_v5, %v7997_v13  ;;  %vm987_vm7 = vcmp.eq.s32.totalorder %v5002_v24, %v7997_v13  ;;  %1673 = vperm.xlu1 %3905, %v5588_v19  }
 0x1f0   : > { %v1112_v11 = vsel %vm984_vm12, %v4829_v45, 0.0  ;;  %v1113_v28 = vsel %vm985_vm13, %v4829_v45, 0.0  ;;  %v1114_v39 = vsel %vm986_vm6, %v4829_v45, 0.0  ;;  %v1115_v40 = vsel %vm987_vm7, %v4829_v45, 0.0 }
 0x1f1   : > { %vm1288_vm8 = vcmp.eq.s32.totalorder %v4988_v16, %v4897_v29  ;;  %vm1289_vm9 = vcmp.eq.s32.totalorder %v4996_v14, %v4897_v29  ;;  %vm1290_vm4 = vcmp.eq.s32.totalorder %v4999_v5, %v4897_v29  ;;  %vm1291_vm5 = vcmp.eq.s32.totalorder %v5002_v24, %v4897_v29  ;;  %v5605_v25 = vpop.permute.xlu1 %2147  ;;  %v5607_v52 = vpop.permute.xlu0 %1554 }
 0x1f2   : > { %v5592_v45 = vadd.f32 %v814_v53, %v5333_v27  ;;  %v5595_v49 = vadd.f32 %v815_v63, %v5339_v0  ;;  %v816_v50 = vsel %vm688_vm2, %v7998_v18, 0.0  ;;  %v817_v23 = vsel %vm689_vm1, %v7998_v18, 0.0  ;;  %7999 = vst [vmem:[#allocation29_spill] sm:$0xff] %v5607_v52  ;;  %v8022_v52 = vld [vmem:[#allocation110_spill] sm:$0xff] }
 0x1f3   : > { %v1176_v9 = vadd.f32 %v1112_v11, %v872_v36  ;;  %v1177_v8 = vadd.f32 %v1113_v28, %v873_v57  ;;  %v1178_v7 = vadd.f32 %v1114_v39, %v874_v43  ;;  %v1179_v27 = vadd.f32 %v1115_v40, %v875_v37  ;;  %3906 = vset.pattern.permute.xlu1 %v7924_v30  ;;  %v5649_v57 = vld [vmem:[%s4223_s9 + $0x38] sm:$0xff] }
 0x1f4   : > { %v1416_v0 = vsel %vm1288_vm8, %v4953_v33, 0.0  ;;  %v1417_v47 = vsel %vm1289_vm9, %v4953_v33, 0.0  ;;  %v1418_v61 = vsel %vm1290_vm4, %v4953_v33, 0.0  ;;  %v1419_v3 = vsel %vm1291_vm5, %v4953_v33, 0.0  ;;  %1858 = vperm.xlu1 %3906, %v5649_v57  }
 0x1f5   : > { %vm1592_vm2 = vcmp.eq.s32.totalorder %v4988_v16, %v5434_v12  ;;  %vm1593_vm1 = vcmp.eq.s32.totalorder %v4996_v14, %v5434_v12  ;;  %vm1594_vm10 = vcmp.eq.s32.totalorder %v4999_v5, %v5434_v12  ;;  %vm1595_vm11 = vcmp.eq.s32.totalorder %v5002_v24, %v5434_v12  ;;  %v5652_v11 = vpop.permute.xlu0 %1557  ;;  %v8002_v12 = vld [vmem:[#allocation58_spill] sm:$0xff] }
 0x1f6   : > { %v818_v29 = vsel %vm690_vm15, %v7998_v18, 0.0  ;;  %v819_v33 = vsel %vm691_vm14, %v7998_v18, 0.0  ;;  %v5643_v60 = vadd.f32 %v816_v50, %v5211_v34  ;;  %v5646_v36 = vadd.f32 %v817_v23, %v5217_v46  ;;  %v1658_v13 = vpop.permute.xlu1 %1657  ;;  %8000 = vst [vmem:[#allocation28_spill] sm:$0xff] %v5652_v11 }
 0x1f7   : > { %v1480_v43 = vadd.f32 %v1416_v0, %v1176_v9  ;;  %v1481_v37 = vadd.f32 %v1417_v47, %v1177_v8  ;;  %v1482_v53 = vadd.f32 %v1418_v61, %v1178_v7  ;;  %v1483_v63 = vadd.f32 %v1419_v3, %v1179_v27  ;;  %v8001_v8 = vld [vmem:[#allocation57_spill] sm:$0xff]  ;;  %v8005_v47 = vld [vmem:[#allocation59_spill] sm:$0xff]  ;;  %v8006_v3 = vld [vmem:[#allocation62_spill] sm:$0xff] }
 0x1f8   : > { %v1720_v55 = vsel %vm1592_vm2, %v1658_v13, 0.0  ;;  %v1721_v34 = vsel %vm1593_vm1, %v1658_v13, 0.0  ;;  %v1722_v46 = vsel %vm1594_vm10, %v1658_v13, 0.0  ;;  %v1723_v28 = vsel %vm1595_vm11, %v1658_v13, 0.0  ;;  %3907 = vset.pattern.permute.xlu1 %v7915_v58 }
 0x1f9   : > { %v5666_v39 = vadd.f32 %v1720_v55, %v1480_v43  ;;  %v5668_v40 = vadd.f32 %v1721_v34, %v1481_v37  ;;  %v5670_v18 = vadd.f32 %v1722_v46, %v1482_v53  ;;  %v5672_v50 = vadd.f32 %v1723_v28, %v1483_v63  ;;  %2463 = vperm.xlu1 %3907, %v5308_v17   ;;  %v8009_v28 = vld [vmem:[#allocation76_spill] sm:$0xff] }
 0x1fa   : > { %v882_v23 = vadd.f32 %v818_v29, %v5223_v10  ;;  %v883_v9 = vadd.f32 %v819_v33, %v5229_v20  ;;  %vm976_vm3 = vcmp.eq.s32.totalorder %v4988_v16, %v8001_v8  ;;  %vm977_vm0 = vcmp.eq.s32.totalorder %v4996_v14, %v8001_v8  ;;  %v5690_v10 = vpop.permute.xlu0 %1560  ;;  %v8004_v20 = vld [vmem:[#allocation73_spill] sm:$0xff] }
 0x1fb   : > { %vm978_vm15 = vcmp.eq.s32.totalorder %v4999_v5, %v8001_v8  ;;  %vm979_vm14 = vcmp.eq.s32.totalorder %v5002_v24, %v8001_v8  ;;  %vm980_vm12 = vcmp.eq.s32.totalorder %v4988_v16, %v8002_v12  ;;  %vm981_vm13 = vcmp.eq.s32.totalorder %v4996_v14, %v8002_v12  ;;  %8003 = vst [vmem:[#allocation30_spill] sm:$0xff] %v5690_v10  ;;  %v5698_v0 = vpop.permute.xlu1 %1846 }
 0x1fc   : > { %vm982_vm6 = vcmp.eq.s32.totalorder %v4999_v5, %v8002_v12  ;;  %vm983_vm7 = vcmp.eq.s32.totalorder %v5002_v24, %v8002_v12  ;;  %v1108_v7 = vsel %vm980_vm12, %v8004_v20, 0.0  ;;  %v1109_v27 = vsel %vm981_vm13, %v8004_v20, 0.0 }
 0x1fd   : > { %vm988_vm8 = vcmp.eq.s32.totalorder %v4988_v16, %v8005_v47  ;;  %vm989_vm9 = vcmp.eq.s32.totalorder %v4996_v14, %v8005_v47  ;;  %v1110_v17 = vsel %vm982_vm6, %v8004_v20, 0.0  ;;  %v1111_v61 = vsel %vm983_vm7, %v8004_v20, 0.0  ;;  %3908 = vset.pattern.permute.xlu1 %v7924_v30 }
 0x1fe   : > { %vm990_vm4 = vcmp.eq.s32.totalorder %v4999_v5, %v8005_v47  ;;  %vm991_vm5 = vcmp.eq.s32.totalorder %v5002_v24, %v8005_v47  ;;  %vm992_vm2 = vcmp.eq.s32.totalorder %v4988_v16, %v8006_v3  ;;  %vm993_vm1 = vcmp.eq.s32.totalorder %v4996_v14, %v8006_v3  ;;  %v5725_v43 = vpop.permute.xlu0 %1563  ;;  %1977 = vperm.xlu1 %3908, %v5588_v19  }
 0x1ff   : > { %vm994_vm10 = vcmp.eq.s32.totalorder %v4999_v5, %v8006_v3  ;;  %vm995_vm11 = vcmp.eq.s32.totalorder %v5002_v24, %v8006_v3  ;;  %v5719_v29 = vadd.f32 %v1108_v7, %v5532_v26  ;;  %v5722_v33 = vadd.f32 %v1109_v27, %v5535_v21  ;;  %8007 = vst [vmem:[#allocation31_spill] sm:$0xff] %v5725_v43 }
 0x200   : > { %v5728_v37 = vadd.f32 %v1110_v17, %v5538_v54  ;;  %v5731_v53 = vadd.f32 %v1111_v61, %v5541_v62  ;;  %v1104_v63 = vsel %vm976_vm3, %v4823_v32, 0.0  ;;  %v1105_v26 = vsel %vm977_vm0, %v4823_v32, 0.0  ;;  %v8008_v62 = vld [vmem:[#allocation74_spill] sm:$0xff]  ;;  %v5758_v34 = vpop.permute.xlu1 %2451 }
 0x201   : > { %v1106_v21 = vsel %vm978_vm15, %v4823_v32, 0.0  ;;  %v1107_v54 = vsel %vm979_vm14, %v4823_v32, 0.0  ;;  %v1116_v13 = vsel %vm988_vm8, %v8008_v62, 0.0  ;;  %v1117_v55 = vsel %vm989_vm9, %v8008_v62, 0.0 }
 0x202   : > { %v1118_v46 = vsel %vm990_vm4, %v8008_v62, 0.0  ;;  %v1119_v32 = vsel %vm991_vm5, %v8008_v62, 0.0  ;;  %v1120_v8 = vsel %vm992_vm2, %v8009_v28, 0.0  ;;  %v1121_v12 = vsel %vm993_vm1, %v8009_v28, 0.0  ;;  %v5786_v17 = vpop.permute.xlu0 %1566  ;;  %3909 = vset.pattern.permute.xlu1 %v7915_v58 }
 0x203   : > { %v1122_v20 = vsel %vm994_vm10, %v8009_v28, 0.0  ;;  %v1123_v7 = vsel %vm995_vm11, %v8009_v28, 0.0  ;;  %v1168_v27 = vadd.f32 %v1104_v63, %v5470_v59  ;;  %v1169_v47 = vadd.f32 %v1105_v26, %v5474_v31  ;;  %8010 = vst [vmem:[#allocation43_spill] sm:$0xff] %v5786_v17  ;;  %2581 = vperm.xlu1 %3909, %v5251_v4   ;;  %v8011_v63 = vld [vmem:[#allocation86_spill] sm:$0xff]  ;;  %v8016_v26 = vld [vmem:[#allocation99_spill] sm:$0xff] }
 0x204   : > { %v1170_v61 = vadd.f32 %v1106_v21, %v5515_v22  ;;  %v1171_v62 = vadd.f32 %v1107_v54, %v5518_v48  ;;  %v1180_v43 = vadd.f32 %v1116_v13, %v5559_v51  ;;  %v1181_v10 = vadd.f32 %v1117_v55, %v5562_v2  ;;  %v8012_v2 = vld [vmem:[#allocation89_spill] sm:$0xff]  ;;  %v8017_v13 = vld [vmem:[#allocation88_spill] sm:$0xff] }
 0x205   : > { %v1182_v11 = vadd.f32 %v1118_v46, %v5592_v45  ;;  %v1183_v3 = vadd.f32 %v1119_v32, %v5595_v49  ;;  %v1184_v59 = vadd.f32 %v1120_v8, %v5643_v60  ;;  %v1185_v31 = vadd.f32 %v1121_v12, %v5646_v36  ;;  %v5802_v51 = vpop.permute.xlu1 %1961  ;;  %v8014_v45 = vld [vmem:[#allocation87_spill] sm:$0xff]  ;;  %v8015_v49 = vld [vmem:[#allocation98_spill] sm:$0xff] }
 0x206   : > { %vm1280_vm3 = vcmp.eq.s32.totalorder %v4988_v16, %v8011_v63  ;;  %vm1281_vm0 = vcmp.eq.s32.totalorder %v4996_v14, %v8011_v63  ;;  %v1186_v22 = vadd.f32 %v1122_v20, %v882_v23  ;;  %v1187_v48 = vadd.f32 %v1123_v7, %v883_v9  ;;  %v5812_v4 = vpop.permute.xlu0 %1569 }
 0x207   : > { %vm1282_vm15 = vcmp.eq.s32.totalorder %v4999_v5, %v8011_v63  ;;  %vm1283_vm14 = vcmp.eq.s32.totalorder %v5002_v24, %v8011_v63  ;;  %vm1292_vm12 = vcmp.eq.s32.totalorder %v4988_v16, %v8012_v2  ;;  %vm1293_vm13 = vcmp.eq.s32.totalorder %v4996_v14, %v8012_v2  ;;  %8013 = vst [vmem:[#allocation44_spill] sm:$0xff] %v5812_v4 }
 0x208   : > { %vm1284_vm6 = vcmp.eq.s32.totalorder %v4988_v16, %v8014_v45  ;;  %vm1285_vm7 = vcmp.eq.s32.totalorder %v4996_v14, %v8014_v45  ;;  %v1408_v60 = vsel %vm1280_vm3, %v8015_v49, 0.0  ;;  %v1409_v36 = vsel %vm1281_vm0, %v8015_v49, 0.0  ;;  %3910 = vset.pattern.permute.xlu1 %v7907_v44 }
 0x209   : > { %v1410_v23 = vsel %vm1282_vm15, %v8015_v49, 0.0  ;;  %v1411_v9 = vsel %vm1283_vm14, %v8015_v49, 0.0  ;;  %v1420_v21 = vsel %vm1292_vm12, %v8016_v26, 0.0  ;;  %v1421_v54 = vsel %vm1293_vm13, %v8016_v26, 0.0  ;;  %2162 = vperm.xlu1 %3910, %v5649_v57   ;;  %v8019_v49 = vld [vmem:[#allocation100_spill] sm:$0xff] }
 0x20a   : > { %vm1296_vm8 = vcmp.eq.s32.totalorder %v4988_v16, %v8017_v13  ;;  %vm1297_vm9 = vcmp.eq.s32.totalorder %v4996_v14, %v8017_v13  ;;  %vm1294_vm4 = vcmp.eq.s32.totalorder %v4999_v5, %v8012_v2  ;;  %vm1295_vm5 = vcmp.eq.s32.totalorder %v5002_v24, %v8012_v2  ;;  %v5842_v8 = vpop.permute.xlu1 %2565  ;;  %v5844_v12 = vpop.permute.xlu0 %1572 }
 0x20b   : > { %vm1298_vm2 = vcmp.eq.s32.totalorder %v4999_v5, %v8017_v13  ;;  %vm1299_vm1 = vcmp.eq.s32.totalorder %v5002_v24, %v8017_v13  ;;  %vm1286_vm10 = vcmp.eq.s32.totalorder %v4999_v5, %v8014_v45  ;;  %vm1287_vm11 = vcmp.eq.s32.totalorder %v5002_v24, %v8014_v45  ;;  %8018 = vst [vmem:[#allocation45_spill] sm:$0xff] %v5844_v12 }
 0x20c   : > { %v1472_v55 = vadd.f32 %v1408_v60, %v1168_v27  ;;  %v1473_v46 = vadd.f32 %v1409_v36, %v1169_v47  ;;  %v1474_v32 = vadd.f32 %v1410_v23, %v1170_v61  ;;  %v1475_v28 = vadd.f32 %v1411_v9, %v1171_v62  ;;  %v8021_v61 = vld [vmem:[#allocation105_spill] sm:$0xff]  ;;  %v5878_v9 = vld [vmem:[%s4292_s12 + $0x40] sm:$0xff] }
 0x20d   : > { %v1422_v20 = vsel %vm1294_vm4, %v8016_v26, 0.0  ;;  %v1423_v7 = vsel %vm1295_vm5, %v8016_v26, 0.0  ;;  %v1484_v63 = vadd.f32 %v1420_v21, %v1180_v43  ;;  %v1485_v2 = vadd.f32 %v1421_v54, %v1181_v10  ;;  %v8020_v43 = vld [vmem:[#allocation103_spill] sm:$0xff]  ;;  %3911 = vset.pattern.permute.xlu1 %v7903_v41 }
 0x20e   : > { %v1424_v4 = vsel %vm1296_vm8, %v8019_v49, 0.0  ;;  %v1425_v27 = vsel %vm1297_vm9, %v8019_v49, 0.0  ;;  %v1426_v47 = vsel %vm1298_vm2, %v8019_v49, 0.0  ;;  %v1427_v10 = vsel %vm1299_vm1, %v8019_v49, 0.0  ;;  %1677 = vperm.xlu1 %3911, %v5878_v9   ;;  %v5881_v26 = vpop.permute.xlu0 %1575 }
 0x20f   : > { %vm1584_vm3 = vcmp.eq.s32.totalorder %v4988_v16, %v8020_v43  ;;  %vm1585_vm0 = vcmp.eq.s32.totalorder %v4996_v14, %v8020_v43  ;;  %vm1586_vm15 = vcmp.eq.s32.totalorder %v4999_v5, %v8020_v43  ;;  %vm1587_vm14 = vcmp.eq.s32.totalorder %v5002_v24, %v8020_v43  ;;  %v5887_v43 = vpop.permute.xlu1 %2150 }
 0x210   : > { %v1712_v62 = vsel %vm1584_vm3, %v8021_v61, 0.0  ;;  %v1713_v60 = vsel %vm1585_vm0, %v8021_v61, 0.0  ;;  %v1714_v36 = vsel %vm1586_vm15, %v8021_v61, 0.0  ;;  %v1715_v23 = vsel %vm1587_vm14, %v8021_v61, 0.0 }
 0x211   : > { %v1486_v21 = vadd.f32 %v1422_v20, %v1182_v11  ;;  %v1487_v54 = vadd.f32 %v1423_v7, %v1183_v3  ;;  %v5883_v13 = vadd.f32 %v1424_v4, %v1184_v59  ;;  %v5885_v49 = vadd.f32 %v1425_v27, %v1185_v31 }
 0x212   : > { %v5889_v12 = vadd.f32 %v1426_v47, %v1186_v22  ;;  %v5891_v17 = vadd.f32 %v1427_v10, %v1187_v48  ;;  %v1412_v61 = vsel %vm1284_vm6, %v8022_v52, 0.0  ;;  %v1413_v11 = vsel %vm1285_vm7, %v8022_v52, 0.0  ;;  %3912 = vset.pattern.permute.xlu1 %v7924_v30  ;;  %v5918_v48 = vpop.permute.xlu0 %1578 }
 0x213   : > { %v5901_v3 = vadd.f32 %v1712_v62, %v1472_v55  ;;  %v5903_v59 = vadd.f32 %v1713_v60, %v1473_v46  ;;  %v5905_v31 = vadd.f32 %v1714_v36, %v1474_v32  ;;  %v5907_v22 = vadd.f32 %v1715_v23, %v1475_v28  ;;  %v5931_v28 = vld [vmem:[%s4223_s9 + $0x40] sm:$0xff] }
 0x214   : > { %vm1596_vm12 = vcmp.eq.s32.totalorder %v4988_v16, %v5458_v56  ;;  %vm1597_vm13 = vcmp.eq.s32.totalorder %v4996_v14, %v5458_v56  ;;  %vm1598_vm6 = vcmp.eq.s32.totalorder %v4999_v5, %v5458_v56  ;;  %vm1599_vm7 = vcmp.eq.s32.totalorder %v5002_v24, %v5458_v56  ;;  %1861 = vperm.xlu1 %3912, %v5931_v28   ;;  %v8023_v36 = vld [vmem:[#allocation120_spill] sm:$0xff] }
 0x215   : > { %v1414_v4 = vsel %vm1286_vm10, %v8022_v52, 0.0  ;;  %v1415_v55 = vsel %vm1287_vm11, %v8022_v52, 0.0  ;;  %v1476_v46 = vadd.f32 %v1412_v61, %v5719_v29  ;;  %v1477_v32 = vadd.f32 %v1413_v11, %v5722_v33  ;;  %v1662_v52 = vpop.permute.xlu1 %1661  ;;  %v8024_v11 = vld [vmem:[#allocation42_spill] sm:$0xff] }
 0x216   : > { %vm1588_vm8 = vcmp.eq.s32.totalorder %v4988_v16, %v5387_v38  ;;  %vm1589_vm9 = vcmp.eq.s32.totalorder %v4996_v14, %v5387_v38  ;;  %vm1590_vm4 = vcmp.eq.s32.totalorder %v4999_v5, %v5387_v38  ;;  %vm1591_vm5 = vcmp.eq.s32.totalorder %v5002_v24, %v5387_v38  ;;  %v1841_v56 = vpop.permute.xlu0 %1840 }
 0x217   : > { %v1724_v29 = vsel %vm1596_vm12, %v1662_v52, 0.0  ;;  %v1725_v33 = vsel %vm1597_vm13, %v1662_v52, 0.0  ;;  %v1726_v45 = vsel %vm1598_vm6, %v1662_v52, 0.0  ;;  %v1727_v20 = vsel %vm1599_vm7, %v1662_v52, 0.0 }
 0x218   : > { %v5954_v7 = vadd.f32 %v1724_v29, %v1484_v63  ;;  %v5956_v27 = vadd.f32 %v1725_v33, %v1485_v2  ;;  %v5958_v47 = vadd.f32 %v1726_v45, %v1486_v21  ;;  %v5960_v10 = vadd.f32 %v1727_v20, %v1487_v54  ;;  %3913 = vset.pattern.permute.xlu1 %v7915_v58  ;;  %v8025_v33 = vld [vmem:[#allocation116_spill] sm:$0xff] }
 0x219   : > { %v1478_v62 = vadd.f32 %v1414_v4, %v5728_v37  ;;  %v1479_v60 = vadd.f32 %v1415_v55, %v5731_v53  ;;  %v1717_v23 = vsel %vm1589_vm9, %v8023_v36, 0.0  ;;  %v1719_v61 = vsel %vm1591_vm5, %v8023_v36, 0.0  ;;  %2466 = vperm.xlu1 %3913, %v5649_v57   ;;  %v5986_v21 = vpop.permute.xlu1 %1849 }
 0x21a   : > { %vm1893_vm2 = vcmp.eq.s32.totalorder %v4996_v14, %v8024_v11  ;;  %vm1895_vm1 = vcmp.eq.s32.totalorder %v5002_v24, %v8024_v11  ;;  %v1716_v37 = vsel %vm1588_vm8, %v8023_v36, 0.0  ;;  %v1718_v53 = vsel %vm1590_vm4, %v8023_v36, 0.0  ;;  %v1954_v29 = vpop.permute.xlu0 %1953 }
 0x21b   : > { %vm1892_vm10 = vcmp.eq.s32.totalorder %v4988_v16, %v8024_v11  ;;  %vm1894_vm11 = vcmp.eq.s32.totalorder %v4999_v5, %v8024_v11  ;;  %v2021_v63 = vsel %vm1893_vm2, %v5476_v1, 0.0  ;;  %v2023_v2 = vsel %vm1895_vm1, %v5476_v1, 0.0 }
 0x21c   : > { %v1781_v54 = vadd.f32 %v1717_v23, %v1477_v32  ;;  %v1783_v4 = vadd.f32 %v1719_v61, %v1479_v60  ;;  %v2020_v55 = vsel %vm1892_vm10, %v5476_v1, 0.0  ;;  %v2022_v38 = vsel %vm1894_vm11, %v5476_v1, 0.0 }
 0x21d   : > { %v1780_v52 = vadd.f32 %v1716_v37, %v1476_v46  ;;  %v1782_v57 = vadd.f32 %v1718_v53, %v1478_v62  ;;  %vm2497_vm3 = vcmp.eq.s32.totalorder %v4996_v14, %v5432_v42  ;;  %vm2499_vm0 = vcmp.eq.s32.totalorder %v5002_v24, %v5432_v42  ;;  %3914 = vset.pattern.permute.xlu1 %v7924_v30 }
 0x21e   : > { %vm2192_vm15 = vcmp.eq.s32.totalorder %v4988_v16, %v8025_v33  ;;  %vm2193_vm14 = vcmp.eq.s32.totalorder %v4996_v14, %v8025_v33  ;;  %vm2194_vm12 = vcmp.eq.s32.totalorder %v4999_v5, %v8025_v33  ;;  %vm2195_vm13 = vcmp.eq.s32.totalorder %v5002_v24, %v8025_v33  ;;  %1981 = vperm.xlu1 %3914, %v5878_v9   ;;  %v6022_v60 = vpop.permute.xlu1 %2454  ;;  %v6028_v36 = vpop.permute.xlu0 %2009 }
 0x21f   : > { %vm2496_vm6 = vcmp.eq.s32.totalorder %v4988_v16, %v5432_v42  ;;  %vm2498_vm7 = vcmp.eq.s32.totalorder %v4999_v5, %v5432_v42  ;;  %v6007_v1 = vadd.f32 %v2021_v63, %v1781_v54  ;;  %v6009_v46 = vadd.f32 %v2023_v2, %v1783_v4 }
 0x220   : > { %v2625_v32 = vsel %vm2497_vm3, %v5548_v15, 0.0  ;;  %v2627_v45 = vsel %vm2499_vm0, %v5548_v15, 0.0  ;;  %v6014_v20 = vadd.f32 %v2020_v55, %v1780_v52  ;;  %v6016_v62 = vadd.f32 %v2022_v38, %v1782_v57 }
 0x221   : > { %vm1888_vm8 = vcmp.eq.s32.totalorder %v4988_v16, %v1841_v56  ;;  %vm1889_vm9 = vcmp.eq.s32.totalorder %v4996_v14, %v1841_v56  ;;  %vm1890_vm4 = vcmp.eq.s32.totalorder %v4999_v5, %v1841_v56  ;;  %vm1891_vm5 = vcmp.eq.s32.totalorder %v5002_v24, %v1841_v56 }
 0x222   : > { %vm1897_vm2 = vcmp.eq.s32.totalorder %v4996_v14, %v5698_v0  ;;  %vm1899_vm1 = vcmp.eq.s32.totalorder %v5002_v24, %v5698_v0  ;;  %v2624_v23 = vsel %vm2496_vm6, %v5548_v15, 0.0  ;;  %v2626_v61 = vsel %vm2498_vm7, %v5548_v15, 0.0  ;;  %3915 = vset.pattern.permute.xlu1 %v7915_v58 }
 0x223   : > { %vm1896_vm10 = vcmp.eq.s32.totalorder %v4988_v16, %v5698_v0  ;;  %v2025_v11 = vsel %vm1897_vm2, %v5802_v51, 0.0  ;;  %v2027_v37 = vsel %vm1899_vm1, %v5802_v51, 0.0  ;;  %vm2196_vm11 = vcmp.eq.s32.totalorder %v4988_v16, %v5605_v25  ;;  %2585 = vperm.xlu1 %3915, %v5588_v19   ;;  %v6075_v54 = vpop.permute.xlu1 %1965  ;;  %v2258_v52 = vpop.permute.xlu0 %2257 }
 0x224   : > { %vm2197_vm3 = vcmp.eq.s32.totalorder %v4996_v14, %v5605_v25  ;;  %vm2198_vm0 = vcmp.eq.s32.totalorder %v4999_v5, %v5605_v25  ;;  %vm2199_vm6 = vcmp.eq.s32.totalorder %v5002_v24, %v5605_v25  ;;  %v2016_v42 = vsel %vm1888_vm8, %v1954_v29, 0.0 }
 0x225   : > { %v2017_v15 = vsel %vm1889_vm9, %v1954_v29, 0.0  ;;  %v2018_v53 = vsel %vm1890_vm4, %v1954_v29, 0.0  ;;  %v2019_v63 = vsel %vm1891_vm5, %v1954_v29, 0.0  ;;  %vm1898_vm7 = vcmp.eq.s32.totalorder %v4999_v5, %v5698_v0 }
 0x226   : > { %vm2501_vm2 = vcmp.eq.s32.totalorder %v4996_v14, %v5758_v34  ;;  %vm2503_vm8 = vcmp.eq.s32.totalorder %v5002_v24, %v5758_v34  ;;  %vm2500_vm9 = vcmp.eq.s32.totalorder %v4988_v16, %v5758_v34  ;;  %v2024_v56 = vsel %vm1896_vm10, %v5802_v51, 0.0 }
 0x227   : > { %v6073_v2 = vsel %vm1898_vm7, %v5802_v51, 0.0  ;;  %vm2502_vm4 = vcmp.eq.s32.totalorder %v4999_v5, %v5758_v34  ;;  %v6080_v19 = vadd.f32 %v2025_v11, %v5668_v40  ;;  %v6083_v4 = vadd.f32 %v2027_v37, %v5672_v50  ;;  %3916 = vset.pattern.permute.xlu1 %v7907_v44  ;;  %v2262_v37 = vpop.permute.xlu0 %2261 }
 0x228   : > { %v2080_v55 = vadd.f32 %v2016_v42, %v5901_v3  ;;  %v2081_v38 = vadd.f32 %v2017_v15, %v5903_v59  ;;  %v2082_v0 = vadd.f32 %v2018_v53, %v5905_v31  ;;  %v2083_v51 = vadd.f32 %v2019_v63, %v5907_v22  ;;  %2165 = vperm.xlu1 %3916, %v5931_v28   ;;  %v2570_v42 = vpop.permute.xlu1 %2569 }
 0x229   : > { %v2320_v57 = vsel %vm2192_vm15, %v2258_v52, 0.0  ;;  %v2321_v40 = vsel %vm2193_vm14, %v2258_v52, 0.0  ;;  %v2322_v50 = vsel %vm2194_vm12, %v2258_v52, 0.0  ;;  %v2323_v3 = vsel %vm2195_vm13, %v2258_v52, 0.0 }
 0x22a   : > { %v2385_v59 = vadd.f32 %v2321_v40, %v2081_v38  ;;  %v2387_v31 = vadd.f32 %v2323_v3, %v2083_v51  ;;  %v2384_v22 = vadd.f32 %v2320_v57, %v2080_v55  ;;  %v2386_v29 = vadd.f32 %v2322_v50, %v2082_v0 }
 0x22b   : > { %vm2200_vm15 = vcmp.eq.s32.totalorder %v4988_v16, %v5887_v43  ;;  %vm2201_vm14 = vcmp.eq.s32.totalorder %v4996_v14, %v5887_v43  ;;  %v2629_v33 = vsel %vm2501_vm2, %v5842_v8, 0.0  ;;  %v2088_v11 = vadd.f32 %v2024_v56, %v5666_v39 }
 0x22c   : > { %vm1600_vm12 = vcmp.eq.s32.totalorder %v4988_v16, %v5529_v6  ;;  %vm1601_vm13 = vcmp.eq.s32.totalorder %v4996_v14, %v5529_v6  ;;  %vm1602_vm5 = vcmp.eq.s32.totalorder %v4999_v5, %v5529_v6  ;;  %vm1603_vm1 = vcmp.eq.s32.totalorder %v5002_v24, %v5529_v6  ;;  %3917 = vset.pattern.permute.xlu1 %v7903_v41  ;;  %v8026_v6 = vld [vmem:[#allocation9_spill] sm:$0xff] }
 0x22d   : > { %v2689_v15 = vadd.f32 %v2625_v32, %v2385_v59  ;;  %v2691_v53 = vadd.f32 %v2627_v45, %v2387_v31  ;;  %v2688_v63 = vadd.f32 %v2624_v23, %v2384_v22  ;;  %v2690_v55 = vadd.f32 %v2626_v61, %v2386_v29  ;;  %v6163_v31 = vpop.permute.xlu1 %2153 }
 0x22e   : > { %v2324_v39 = vsel %vm2196_vm11, %v2262_v37, 0.0  ;;  %v2325_v56 = vsel %vm2197_vm3, %v2262_v37, 0.0  ;;  %v2326_v38 = vsel %vm2198_vm0, %v2262_v37, 0.0  ;;  %v2327_v32 = vsel %vm2199_vm6, %v2262_v37, 0.0 }
 0x22f   : > { %2881 = vmatprep.mubr.f32.mxu0 %v2689_v15  ;;  %3026 = vmatprep.mubr.f32.mxu1 %v2691_v53  ;;  %v2389_v45 = vadd.f32 %v2325_v56, %v6007_v1  ;;  %v2391_v23 = vadd.f32 %v2327_v32, %v6009_v46  ;;  %v2631_v61 = vsel %vm2503_vm8, %v5842_v8, 0.0  ;;  %v2388_v0 = vadd.f32 %v2324_v39, %v6014_v20  ;;  %v6150_v46 = vld [vmem:[%s4292_s12 + $0x48] sm:$0xff]  ;;  %v2266_v20 = vpop.permute.xlu0 %2265 }
 0x230   : > { %2882 = vmatmul.mubr.f32.gmra.mrb[2].mxu0 %v2688_v63  ;;  %vm2202_vm10 = vcmp.eq.s32.totalorder %v4999_v5, %v5887_v43  ;;  %vm2203_vm11 = vcmp.eq.s32.totalorder %v5002_v24, %v5887_v43  ;;  %v2628_v25 = vsel %vm2500_vm9, %v5842_v8, 0.0  ;;  %v2390_v1 = vadd.f32 %v2326_v38, %v6016_v62  ;;  %3027 = vmatmul.mubr.f32.gmra.mrb[2].mxu1 %v2690_v55 }
 0x231   : > { %1681 = vperm.xlu1 %3917, %v6150_v46   ;;  %v2693_v51 = vadd.f32 %v2629_v33, %v2389_v45  ;;  %v2695_v52 = vadd.f32 %v2631_v61, %v2391_v23  ;;  %v2692_v57 = vadd.f32 %v2628_v25, %v2388_v0  ;;  %v2630_v40 = vsel %vm2502_vm4, %v5842_v8, 0.0  ;;  %v8029_v0 = vld [vmem:[#allocation47_spill] sm:$0xff] }
 0x232   : > { %v2328_v50 = vsel %vm2200_vm15, %v2266_v20, 0.0  ;;  %v2329_v62 = vsel %vm2201_vm14, %v2266_v20, 0.0  ;;  %v2330_v3 = vsel %vm2202_vm10, %v2266_v20, 0.0  ;;  %v2331_v59 = vsel %vm2203_vm11, %v2266_v20, 0.0  ;;  %v1666_v63 = vpop.permute.xlu1 %1665 }
 0x233   : > { %2886 = vmatprep.mubr.f32.mxu0 %v2693_v51  ;;  %3031 = vmatprep.mubr.f32.mxu1 %v2695_v52  ;;  %v2694_v22 = vadd.f32 %v2630_v40, %v2390_v1  ;;  %vm2505_vm3 = vcmp.eq.s32.totalorder %v4996_v14, %v6022_v60  ;;  %v2090_v34 = vadd.f32 %v6073_v2, %v5670_v18  ;;  %v6179_v18 = vld [vmem:[%s4223_s9 + $0x48] sm:$0xff]  ;;  %v1730_v56 = vsel %vm1602_vm5, %v1666_v63, 0.0 }
 0x234   : > { %2887 = vmatmul.mubr.f32.gmra.mrb[4].mxu0 %v2692_v57  ;;  %v2393_v8 = vadd.f32 %v2329_v62, %v6080_v19  ;;  %v2395_v43 = vadd.f32 %v2331_v59, %v6083_v4  ;;  %vm2507_vm0 = vcmp.eq.s32.totalorder %v5002_v24, %v6022_v60  ;;  %vm2504_vm6 = vcmp.eq.s32.totalorder %v4988_v16, %v6022_v60  ;;  %v2270_v62 = vpop.permute.xlu0 %2269 }
 0x235   : > { %3032 = vmatmul.mubr.f32.gmra.mrb[4].mxu1 %v2694_v22  ;;  %3918 = vset.pattern.permute.xlu1 %v7924_v30  ;;  %v2392_v29 = vadd.f32 %v2328_v50, %v2088_v11  ;;  %v2394_v33 = vadd.f32 %v2330_v3, %v2090_v34  ;;  %vm2506_vm7 = vcmp.eq.s32.totalorder %v4999_v5, %v6022_v60  ;;  %v2633_v2 = vsel %vm2505_vm3, %v2570_v42, 0.0  ;;  %v8030_v34 = vld [vmem:[#allocation61_spill] sm:$0xff] }
 0x236   : > { %1864 = vperm.xlu1 %3918, %v6179_v18   ;;  %v2635_v19 = vsel %vm2507_vm0, %v2570_v42, 0.0  ;;  %v2632_v4 = vsel %vm2504_vm6, %v2570_v42, 0.0  ;;  %v2634_v37 = vsel %vm2506_vm7, %v2570_v42, 0.0  ;;  %v2697_v15 = vadd.f32 %v2633_v2, %v2393_v8 }
 0x237   : > { %v2699_v53 = vadd.f32 %v2635_v19, %v2395_v43  ;;  %v2696_v55 = vadd.f32 %v2632_v4, %v2392_v29  ;;  %v2698_v39 = vadd.f32 %v2634_v37, %v2394_v33  ;;  %v1728_v11 = vsel %vm1600_vm12, %v1666_v63, 0.0  ;;  %v8031_v37 = vld [vmem:[#allocation75_spill] sm:$0xff] }
 0x238   : > { %v1729_v60 = vsel %vm1601_vm13, %v1666_v63, 0.0  ;;  %v1731_v42 = vsel %vm1603_vm1, %v1666_v63, 0.0  ;;  %2891 = vmatprep.mubr.f32.mxu0 %v2697_v15  ;;  %v6195_v38 = vadd.f32 %v1728_v11, %v5883_v13  ;;  %v6201_v45 = vadd.f32 %v1730_v56, %v5889_v12  ;;  %v6212_v13 = vpop.permute.xlu1 %1852  ;;  %v8028_v12 = vld [vmem:[#allocation19_spill] sm:$0xff] }
 0x239   : > { %3036 = vmatprep.mubr.f32.mxu1 %v2699_v53  ;;  %v6198_v32 = vadd.f32 %v1729_v60, %v5885_v49  ;;  %v6204_v23 = vadd.f32 %v1731_v42, %v5891_v17  ;;  %2892 = vmatmul.mubr.f32.gmra.mrb[6].mxu0 %v2696_v55  ;;  %vm372_vm2 = vcmp.eq.s32.totalorder %v4988_v16, %v8026_v6  ;;  %v8027_v17 = vld [vmem:[#allocation32_spill] sm:$0xff] }
 0x23a   : > { %3037 = vmatmul.mubr.f32.gmra.mrb[6].mxu1 %v2698_v39  ;;  %3919 = vset.pattern.permute.xlu1 %v7915_v58  ;;  %vm373_vm8 = vcmp.eq.s32.totalorder %v4996_v14, %v8026_v6  ;;  %vm374_vm9 = vcmp.eq.s32.totalorder %v4999_v5, %v8026_v6  ;;  %vm375_vm4 = vcmp.eq.s32.totalorder %v5002_v24, %v8026_v6  ;;  %v516_v49 = vsel %vm372_vm2, %v8028_v12, 0.0 }
 0x23b   : > { %2469 = vperm.xlu1 %3919, %v5931_v28   ;;  %vm692_vm15 = vcmp.eq.s32.totalorder %v4988_v16, %v8027_v17  ;;  %vm693_vm14 = vcmp.eq.s32.totalorder %v4996_v14, %v8027_v17  ;;  %v517_v61 = vsel %vm373_vm8, %v8028_v12, 0.0  ;;  %v518_v1 = vsel %vm374_vm9, %v8028_v12, 0.0 }
 0x23c   : > { %v820_v28 = vsel %vm692_vm15, %v8029_v0, 0.0  ;;  %v821_v25 = vsel %vm693_vm14, %v8029_v0, 0.0  ;;  %v519_v20 = vsel %vm375_vm4, %v8028_v12, 0.0  ;;  %vm694_vm12 = vcmp.eq.s32.totalorder %v4999_v5, %v8027_v17  ;;  %v2458_v51 = vpop.permute.xlu1 %2457 }
 0x23d   : > { %vm695_vm13 = vcmp.eq.s32.totalorder %v5002_v24, %v8027_v17  ;;  %v822_v52 = vsel %vm694_vm12, %v8029_v0, 0.0  ;;  %v884_v40 = vadd.f32 %v820_v28, %v516_v49  ;;  %v885_v50 = vadd.f32 %v821_v25, %v517_v61 }
 0x23e   : > { %v823_v57 = vsel %vm695_vm13, %v8029_v0, 0.0  ;;  %vm1900_vm5 = vcmp.eq.s32.totalorder %v4988_v16, %v5986_v21  ;;  %vm1901_vm1 = vcmp.eq.s32.totalorder %v4996_v14, %v5986_v21  ;;  %vm1902_vm10 = vcmp.eq.s32.totalorder %v4999_v5, %v5986_v21 }
 0x23f   : > { %3920 = vset.pattern.permute.xlu1 %v7924_v30  ;;  %vm1903_vm11 = vcmp.eq.s32.totalorder %v5002_v24, %v5986_v21  ;;  %vm2204_vm3 = vcmp.eq.s32.totalorder %v4988_v16, %v6163_v31  ;;  %vm2205_vm0 = vcmp.eq.s32.totalorder %v4996_v14, %v6163_v31  ;;  %vm2206_vm6 = vcmp.eq.s32.totalorder %v4999_v5, %v6163_v31 }
 0x240   : > { %1985 = vperm.xlu1 %3920, %v6150_v46   ;;  %vm2207_vm7 = vcmp.eq.s32.totalorder %v5002_v24, %v6163_v31  ;;  %v2028_v3 = vsel %vm1900_vm5, %v6075_v54, 0.0  ;;  %v2029_v59 = vsel %vm1901_vm1, %v6075_v54, 0.0  ;;  %v2030_v22 = vsel %vm1902_vm10, %v6075_v54, 0.0 }
 0x241   : > { %v2031_v21 = vsel %vm1903_vm11, %v6075_v54, 0.0  ;;  %vm996_vm2 = vcmp.eq.s32.totalorder %v4988_v16, %v8030_v34  ;;  %vm997_vm8 = vcmp.eq.s32.totalorder %v4996_v14, %v8030_v34  ;;  %vm998_vm9 = vcmp.eq.s32.totalorder %v4999_v5, %v8030_v34  ;;  %v6266_v8 = vpop.permute.xlu1 %1969 }
 0x242   : > { %vm999_vm4 = vcmp.eq.s32.totalorder %v5002_v24, %v8030_v34  ;;  %v2332_v54 = vsel %vm2204_vm3, %v2270_v62, 0.0  ;;  %v2333_v43 = vsel %vm2205_vm0, %v2270_v62, 0.0  ;;  %v2334_v29 = vsel %vm2206_vm6, %v2270_v62, 0.0 }
 0x243   : > { %v2335_v33 = vsel %vm2207_vm7, %v2270_v62, 0.0  ;;  %v2095_v2 = vadd.f32 %v2031_v21, %v5960_v10  ;;  %v2092_v19 = vadd.f32 %v2028_v3, %v5954_v7  ;;  %v2094_v4 = vadd.f32 %v2030_v22, %v5958_v47  ;;  %v8032_v3 = vld [vmem:[#allocation91_spill] sm:$0xff] }
 0x244   : > { %3921 = vset.pattern.permute.xlu1 %v7915_v58  ;;  %v1124_v15 = vsel %vm996_vm2, %v8031_v37, 0.0  ;;  %v1125_v53 = vsel %vm997_vm8, %v8031_v37, 0.0  ;;  %v1126_v63 = vsel %vm998_vm9, %v8031_v37, 0.0  ;;  %v1127_v55 = vsel %vm999_vm4, %v8031_v37, 0.0 }
 0x245   : > { %2589 = vperm.xlu1 %3921, %v5878_v9   ;;  %v2093_v9 = vadd.f32 %v2029_v59, %v5956_v27  ;;  %v2399_v39 = vadd.f32 %v2335_v33, %v2095_v2  ;;  %v2396_v11 = vadd.f32 %v2332_v54, %v2092_v19  ;;  %v2398_v27 = vadd.f32 %v2334_v29, %v2094_v4  ;;  %v6323_v54 = vld [vmem:[%s4223_s9 + $0x50] sm:$0xff] }
 0x246   : > { %v2574_v10 = vpop.permute.xlu1 %2573  ;;  %vm2509_vm15 = vcmp.eq.s32.totalorder %v4996_v14, %v2458_v51  ;;  %vm2511_vm14 = vcmp.eq.s32.totalorder %v5002_v24, %v2458_v51  ;;  %vm2508_vm12 = vcmp.eq.s32.totalorder %v4988_v16, %v2458_v51  ;;  %vm2510_vm13 = vcmp.eq.s32.totalorder %v4999_v5, %v2458_v51  ;;  %v6298_v51 = vld [vmem:[%s4292_s12 + $0x50] sm:$0xff] }
 0x247   : > { %v2397_v31 = vadd.f32 %v2333_v43, %v2093_v9  ;;  %v2637_v7 = vsel %vm2509_vm15, %v2574_v10, 0.0  ;;  %v2639_v47 = vsel %vm2511_vm14, %v2574_v10, 0.0  ;;  %v2636_v60 = vsel %vm2508_vm12, %v2574_v10, 0.0 }
 0x248   : > { %v2638_v56 = vsel %vm2510_vm13, %v2574_v10, 0.0  ;;  %v2703_v6 = vadd.f32 %v2639_v47, %v2399_v39  ;;  %v2700_v17 = vadd.f32 %v2636_v60, %v2396_v11  ;;  %v886_v49 = vadd.f32 %v822_v52, %v518_v1  ;;  %v8033_v1 = vld [vmem:[#allocation101_spill] sm:$0xff]  ;;  %v8037_v10 = vld [vmem:[#allocation48_spill] sm:$0xff]  ;;  %v2274_v47 = vpop.permute.xlu0 %2273 }
 0x249   : > { %3922 = vset.pattern.permute.xlu1 %v7907_v44  ;;  %v2701_v42 = vadd.f32 %v2637_v7, %v2397_v31  ;;  %v2702_v12 = vadd.f32 %v2638_v56, %v2398_v27  ;;  %v887_v61 = vadd.f32 %v823_v57, %v519_v20  ;;  %v1188_v0 = vadd.f32 %v1124_v15, %v884_v40 }
 0x24a   : > { %2168 = vperm.xlu1 %3922, %v6179_v18   ;;  %v1189_v28 = vadd.f32 %v1125_v53, %v885_v50  ;;  %v1190_v25 = vadd.f32 %v1126_v63, %v886_v49  ;;  %vm1300_vm5 = vcmp.eq.s32.totalorder %v4988_v16, %v8032_v3  ;;  %3041 = vmatprep.mubr.f32.mxu1 %v2703_v6  ;;  %v8034_v53 = vld [vmem:[#allocation33_spill] sm:$0xff]  ;;  %v8035_v63 = vld [vmem:[#allocation8_spill] sm:$0xff] }
 0x24b   : > { %2896 = vmatprep.mubr.f32.mxu0 %v2701_v42  ;;  %v1191_v62 = vadd.f32 %v1127_v55, %v887_v61  ;;  %v6301_v59 = vpop.permute.xlu1 %2156  ;;  %vm1301_vm1 = vcmp.eq.s32.totalorder %v4996_v14, %v8032_v3  ;;  %vm1302_vm10 = vcmp.eq.s32.totalorder %v4999_v5, %v8032_v3  ;;  %vm1303_vm11 = vcmp.eq.s32.totalorder %v5002_v24, %v8032_v3 }
 0x24c   : > { %2897 = vmatmul.mubr.f32.gmra.mrb[8].mxu0 %v2700_v17  ;;  %3042 = vmatmul.mubr.f32.gmra.mrb[8].mxu1 %v2702_v12  ;;  %v1428_v20 = vsel %vm1300_vm5, %v8033_v1, 0.0  ;;  %v1429_v52 = vsel %vm1301_vm1, %v8033_v1, 0.0  ;;  %v1430_v57 = vsel %vm1302_vm10, %v8033_v1, 0.0  ;;  %v1431_v40 = vsel %vm1303_vm11, %v8033_v1, 0.0 }
 0x24d   : > { %vm1604_vm3 = vcmp.eq.s32.totalorder %v4988_v16, %v5572_v35  ;;  %vm1605_vm0 = vcmp.eq.s32.totalorder %v4996_v14, %v5572_v35  ;;  %vm1606_vm6 = vcmp.eq.s32.totalorder %v4999_v5, %v5572_v35  ;;  %vm1607_vm7 = vcmp.eq.s32.totalorder %v5002_v24, %v5572_v35 }
 0x24e   : > { %3923 = vset.pattern.permute.xlu1 %v7903_v41  ;;  %v1492_v50 = vadd.f32 %v1428_v20, %v1188_v0  ;;  %v1493_v22 = vadd.f32 %v1429_v52, %v1189_v28  ;;  %v1494_v21 = vadd.f32 %v1430_v57, %v1190_v25  ;;  %v1495_v34 = vadd.f32 %v1431_v40, %v1191_v62  ;;  %v8038_v40 = vld [vmem:[#allocation64_spill] sm:$0xff] }
 0x24f   : > { %1685 = vperm.xlu1 %3923, %v6298_v51   ;;  %vm696_vm2 = vcmp.eq.s32.totalorder %v4988_v16, %v8034_v53  ;;  %vm376_vm8 = vcmp.eq.s32.totalorder %v4988_v16, %v8035_v63  ;;  %vm377_vm9 = vcmp.eq.s32.totalorder %v4996_v14, %v8035_v63  ;;  %vm378_vm4 = vcmp.eq.s32.totalorder %v4999_v5, %v8035_v63 }
 0x250   : > { %v1670_v43 = vpop.permute.xlu1 %1669  ;;  %vm379_vm15 = vcmp.eq.s32.totalorder %v5002_v24, %v8035_v63  ;;  %vm697_vm14 = vcmp.eq.s32.totalorder %v4996_v14, %v8034_v53  ;;  %vm698_vm12 = vcmp.eq.s32.totalorder %v4999_v5, %v8034_v53  ;;  %vm699_vm13 = vcmp.eq.s32.totalorder %v5002_v24, %v8034_v53 }
 0x251   : > { %v1732_v29 = vsel %vm1604_vm3, %v1670_v43, 0.0  ;;  %v1733_v33 = vsel %vm1605_vm0, %v1670_v43, 0.0  ;;  %v1734_v9 = vsel %vm1606_vm6, %v1670_v43, 0.0  ;;  %v1735_v2 = vsel %vm1607_vm7, %v1670_v43, 0.0 }
 0x252   : > { %v6326_v19 = vadd.f32 %v1732_v29, %v1492_v50  ;;  %v6328_v4 = vadd.f32 %v1733_v33, %v1493_v22  ;;  %v6330_v35 = vadd.f32 %v1734_v9, %v1494_v21  ;;  %v6332_v37 = vadd.f32 %v1735_v2, %v1495_v34  ;;  %v8039_v2 = vld [vmem:[#allocation78_spill] sm:$0xff] }
 0x253   : > { %3924 = vset.pattern.permute.xlu1 %v7924_v30  ;;  %v824_v7 = vsel %vm696_vm2, %v8037_v10, 0.0  ;;  %vm1904_vm5 = vcmp.eq.s32.totalorder %v4988_v16, %v6212_v13  ;;  %vm1905_vm1 = vcmp.eq.s32.totalorder %v4996_v14, %v6212_v13  ;;  %vm1906_vm10 = vcmp.eq.s32.totalorder %v4999_v5, %v6212_v13 }
 0x254   : > { %1867 = vperm.xlu1 %3924, %v6323_v54   ;;  %vm1907_vm11 = vcmp.eq.s32.totalorder %v5002_v24, %v6212_v13  ;;  %vm2208_vm3 = vcmp.eq.s32.totalorder %v4988_v16, %v6301_v59  ;;  %vm2209_vm0 = vcmp.eq.s32.totalorder %v4996_v14, %v6301_v59  ;;  %vm2210_vm6 = vcmp.eq.s32.totalorder %v4999_v5, %v6301_v59 }
 0x255   : > { %v6336_v15 = vpop.permute.xlu1 %1855  ;;  %vm2211_vm7 = vcmp.eq.s32.totalorder %v5002_v24, %v6301_v59  ;;  %v2032_v60 = vsel %vm1904_vm5, %v6266_v8, 0.0  ;;  %v2033_v56 = vsel %vm1905_vm1, %v6266_v8, 0.0  ;;  %v2034_v42 = vsel %vm1906_vm10, %v6266_v8, 0.0 }
 0x256   : > { %v2035_v13 = vsel %vm1907_vm11, %v6266_v8, 0.0  ;;  %v825_v6 = vsel %vm697_vm14, %v8037_v10, 0.0  ;;  %v826_v17 = vsel %vm698_vm12, %v8037_v10, 0.0  ;;  %v827_v12 = vsel %vm699_vm13, %v8037_v10, 0.0 }
 0x257   : > { %v2336_v61 = vsel %vm2208_vm3, %v2274_v47, 0.0  ;;  %v2337_v0 = vsel %vm2209_vm0, %v2274_v47, 0.0  ;;  %v2338_v28 = vsel %vm2210_vm6, %v2274_v47, 0.0  ;;  %v2339_v25 = vsel %vm2211_vm7, %v2274_v47, 0.0 }
 0x258   : > { %3925 = vset.pattern.permute.xlu1 %v7915_v58  ;;  %v2099_v62 = vadd.f32 %v2035_v13, %v6204_v23  ;;  %v2096_v3 = vadd.f32 %v2032_v60, %v6195_v38  ;;  %v2098_v1 = vadd.f32 %v2034_v42, %v6201_v45  ;;  %vm1000_vm2 = vcmp.eq.s32.totalorder %v4988_v16, %v8038_v40  ;;  %v8041_v60 = vld [vmem:[#allocation102_spill] sm:$0xff] }
 0x259   : > { %2472 = vperm.xlu1 %3925, %v6179_v18   ;;  %v8036_v18 = vld [vmem:[#allocation18_spill] sm:$0xff]  ;;  %vm1001_vm14 = vcmp.eq.s32.totalorder %v4996_v14, %v8038_v40  ;;  %vm1002_vm12 = vcmp.eq.s32.totalorder %v4999_v5, %v8038_v40  ;;  %vm1003_vm13 = vcmp.eq.s32.totalorder %v5002_v24, %v8038_v40  ;;  %v1128_v53 = vsel %vm1000_vm2, %v8039_v2, 0.0 }
 0x25a   : > { %v520_v55 = vsel %vm376_vm8, %v8036_v18, 0.0  ;;  %v521_v31 = vsel %vm377_vm9, %v8036_v18, 0.0  ;;  %v522_v39 = vsel %vm378_vm4, %v8036_v18, 0.0  ;;  %v523_v11 = vsel %vm379_vm15, %v8036_v18, 0.0  ;;  %v2461_v27 = vpop.permute.xlu1 %2460 }
 0x25b   : > { %v888_v49 = vadd.f32 %v824_v7, %v520_v55  ;;  %v889_v20 = vadd.f32 %v825_v6, %v521_v31  ;;  %v890_v52 = vadd.f32 %v826_v17, %v522_v39  ;;  %v891_v57 = vadd.f32 %v827_v12, %v523_v11  ;;  %v8040_v31 = vld [vmem:[#allocation90_spill] sm:$0xff]  ;;  %v6444_v39 = vld [vmem:[%s4292_s12 + $0x58] sm:$0xff]  ;;  %v8042_v17 = vld [vmem:[#allocation29_spill] sm:$0xff] }
 0x25c   : > { %v2403_v22 = vadd.f32 %v2339_v25, %v2099_v62  ;;  %v2400_v59 = vadd.f32 %v2336_v61, %v2096_v3  ;;  %v2402_v21 = vadd.f32 %v2338_v28, %v2098_v1  ;;  %vm2513_vm8 = vcmp.eq.s32.totalorder %v4996_v14, %v2461_v27  ;;  %v6466_v12 = vld [vmem:[%s4223_s9 + $0x58] sm:$0xff] }
 0x25d   : > { %3926 = vset.pattern.permute.xlu1 %v7924_v30  ;;  %vm2515_vm9 = vcmp.eq.s32.totalorder %v5002_v24, %v2461_v27  ;;  %vm2512_vm4 = vcmp.eq.s32.totalorder %v4988_v16, %v2461_v27  ;;  %vm2514_vm15 = vcmp.eq.s32.totalorder %v4999_v5, %v2461_v27  ;;  %v1129_v63 = vsel %vm1001_vm14, %v8039_v2, 0.0 }
 0x25e   : > { %1989 = vperm.xlu1 %3926, %v6298_v51   ;;  %v1130_v18 = vsel %vm1002_vm12, %v8039_v2, 0.0  ;;  %v1131_v55 = vsel %vm1003_vm13, %v8039_v2, 0.0  ;;  %vm1304_vm5 = vcmp.eq.s32.totalorder %v4988_v16, %v8040_v31  ;;  %vm1305_vm1 = vcmp.eq.s32.totalorder %v4996_v14, %v8040_v31 }
 0x25f   : > { %v6395_v8 = vpop.permute.xlu1 %1973  ;;  %vm1306_vm10 = vcmp.eq.s32.totalorder %v4999_v5, %v8040_v31  ;;  %vm1307_vm11 = vcmp.eq.s32.totalorder %v5002_v24, %v8040_v31  ;;  %v1192_v27 = vadd.f32 %v1128_v53, %v888_v49  ;;  %v1193_v10 = vadd.f32 %v1129_v63, %v889_v20  ;;  %v2278_v53 = vpop.permute.xlu0 %2277  ;;  %v8047_v31 = vld [vmem:[#allocation63_spill] sm:$0xff] }
 0x260   : > { %v1194_v7 = vadd.f32 %v1130_v18, %v890_v52  ;;  %v1195_v47 = vadd.f32 %v1131_v55, %v891_v57  ;;  %v1433_v42 = vsel %vm1305_vm1, %v8041_v60, 0.0  ;;  %v1434_v13 = vsel %vm1306_vm10, %v8041_v60, 0.0 }
 0x261   : > { %v1435_v6 = vsel %vm1307_vm11, %v8041_v60, 0.0  ;;  %vm1608_vm3 = vcmp.eq.s32.totalorder %v4988_v16, %v8042_v17  ;;  %vm1609_vm0 = vcmp.eq.s32.totalorder %v4996_v14, %v8042_v17  ;;  %vm1610_vm6 = vcmp.eq.s32.totalorder %v4999_v5, %v8042_v17 }
 0x262   : > { %3927 = vset.pattern.permute.xlu1 %v7915_v58  ;;  %vm1611_vm7 = vcmp.eq.s32.totalorder %v5002_v24, %v8042_v17  ;;  %v1497_v61 = vadd.f32 %v1433_v42, %v1193_v10  ;;  %v1499_v28 = vadd.f32 %v1435_v6, %v1195_v47  ;;  %vm1909_vm1 = vcmp.eq.s32.totalorder %v4996_v14, %v6336_v15 }
 0x263   : > { %2593 = vperm.xlu1 %3927, %v6150_v46   ;;  %v2097_v46 = vadd.f32 %v2033_v56, %v6198_v32  ;;  %v1432_v56 = vsel %vm1304_vm5, %v8041_v60, 0.0  ;;  %vm1908_vm5 = vcmp.eq.s32.totalorder %v4988_v16, %v6336_v15  ;;  %vm1910_vm10 = vcmp.eq.s32.totalorder %v4999_v5, %v6336_v15 }
 0x264   : > { %v2578_v32 = vpop.permute.xlu1 %2577  ;;  %v1496_v49 = vadd.f32 %v1432_v56, %v1192_v27  ;;  %vm1911_vm11 = vcmp.eq.s32.totalorder %v5002_v24, %v6336_v15  ;;  %v2036_v63 = vsel %vm1908_vm5, %v6395_v8, 0.0  ;;  %v2037_v18 = vsel %vm1909_vm1, %v6395_v8, 0.0 }
 0x265   : > { %v2401_v50 = vadd.f32 %v2337_v0, %v2097_v46  ;;  %v2641_v38 = vsel %vm2513_vm8, %v2578_v32, 0.0  ;;  %v2643_v45 = vsel %vm2515_vm9, %v2578_v32, 0.0  ;;  %v2640_v23 = vsel %vm2512_vm4, %v2578_v32, 0.0 }
 0x266   : > { %v2642_v34 = vsel %vm2514_vm15, %v2578_v32, 0.0  ;;  %v2707_v29 = vadd.f32 %v2643_v45, %v2403_v22  ;;  %v2704_v33 = vadd.f32 %v2640_v23, %v2400_v59  ;;  %v1498_v0 = vadd.f32 %v1434_v13, %v1194_v7  ;;  %v8044_v59 = vld [vmem:[#allocation34_spill] sm:$0xff]  ;;  %v8048_v13 = vld [vmem:[#allocation77_spill] sm:$0xff] }
 0x267   : > { %3928 = vset.pattern.permute.xlu1 %v7907_v44  ;;  %v2705_v43 = vadd.f32 %v2641_v38, %v2401_v50  ;;  %v2706_v9 = vadd.f32 %v2642_v34, %v2402_v21  ;;  %v8043_v50 = vld [vmem:[#allocation11_spill] sm:$0xff]  ;;  %vm700_vm15 = vcmp.eq.s32.totalorder %v4988_v16, %v8044_v59  ;;  %v8045_v21 = vld [vmem:[#allocation21_spill] sm:$0xff]  ;;  %vm701_vm14 = vcmp.eq.s32.totalorder %v4996_v14, %v8044_v59 }
 0x268   : > { %2171 = vperm.xlu1 %3928, %v6323_v54   ;;  %3046 = vmatprep.mubr.f32.mxu1 %v2707_v29  ;;  %vm380_vm2 = vcmp.eq.s32.totalorder %v4988_v16, %v8043_v50  ;;  %vm381_vm8 = vcmp.eq.s32.totalorder %v4996_v14, %v8043_v50  ;;  %vm382_vm9 = vcmp.eq.s32.totalorder %v4999_v5, %v8043_v50  ;;  %v2038_v15 = vsel %vm1910_vm10, %v6395_v8, 0.0 }
 0x269   : > { %2901 = vmatprep.mubr.f32.mxu0 %v2705_v43  ;;  %v6447_v11 = vpop.permute.xlu1 %2159  ;;  %3047 = vmatmul.mubr.f32.gmra.mrb[10].mxu1 %v2706_v9  ;;  %vm383_vm4 = vcmp.eq.s32.totalorder %v5002_v24, %v8043_v50  ;;  %v524_v32 = vsel %vm380_vm2, %v8045_v21, 0.0  ;;  %v6495_v45 = vsel %vm381_vm8, %v8045_v21, 0.0  ;;  %v6498_v23 = vsel %vm382_vm9, %v8045_v21, 0.0 }
 0x26a   : > { %2902 = vmatmul.mubr.f32.gmra.mrb[10].mxu0 %v2704_v33  ;;  %v527_v34 = vsel %vm383_vm4, %v8045_v21, 0.0  ;;  %vm702_vm12 = vcmp.eq.s32.totalorder %v4999_v5, %v8044_v59  ;;  %vm703_vm13 = vcmp.eq.s32.totalorder %v5002_v24, %v8044_v59  ;;  %v2039_v55 = vsel %vm1911_vm11, %v6395_v8, 0.0 }
 0x26b   : > { %vm1004_vm2 = vcmp.eq.s32.totalorder %v4988_v16, %v8047_v31  ;;  %vm1005_vm8 = vcmp.eq.s32.totalorder %v4996_v14, %v8047_v31  ;;  %vm1006_vm9 = vcmp.eq.s32.totalorder %v4999_v5, %v8047_v31  ;;  %vm1007_vm4 = vcmp.eq.s32.totalorder %v5002_v24, %v8047_v31 }
 0x26c   : > { %3929 = vset.pattern.permute.xlu1 %v7903_v41  ;;  %v2101_v47 = vadd.f32 %v2037_v18, %v6328_v4  ;;  %v2103_v60 = vadd.f32 %v2039_v55, %v6332_v37  ;;  %v2100_v56 = vadd.f32 %v2036_v63, %v6326_v19  ;;  %v2102_v42 = vadd.f32 %v2038_v15, %v6330_v35  ;;  %v6600_v15 = vld [vmem:[%s4223_s9 + $0x60] sm:$0xff] }
 0x26d   : > { %1689 = vperm.xlu1 %3929, %v6444_v39   ;;  %v1132_v6 = vsel %vm1004_vm2, %v8048_v13, 0.0  ;;  %v1133_v17 = vsel %vm1005_vm8, %v8048_v13, 0.0 }
 0x26e   : > { %v1674_v25 = vpop.permute.xlu1 %1673 }
 0x26f   : > { %v1736_v46 = vsel %vm1608_vm3, %v1674_v25, 0.0  ;;  %v1737_v62 = vsel %vm1609_vm0, %v1674_v25, 0.0  ;;  %v1738_v3 = vsel %vm1610_vm6, %v1674_v25, 0.0  ;;  %v1739_v1 = vsel %vm1611_vm7, %v1674_v25, 0.0 }
 0x270   : > { %v6469_v20 = vadd.f32 %v1736_v46, %v1496_v49  ;;  %v6471_v52 = vadd.f32 %v1737_v62, %v1497_v61  ;;  %v6473_v57 = vadd.f32 %v1738_v3, %v1498_v0  ;;  %v6475_v40 = vadd.f32 %v1739_v1, %v1499_v28 }
 0x271   : > { %3930 = vset.pattern.permute.xlu1 %v7924_v30  ;;  %vm2212_vm3 = vcmp.eq.s32.totalorder %v4988_v16, %v6447_v11  ;;  %vm2213_vm0 = vcmp.eq.s32.totalorder %v4996_v14, %v6447_v11  ;;  %vm2214_vm6 = vcmp.eq.s32.totalorder %v4999_v5, %v6447_v11  ;;  %vm2215_vm7 = vcmp.eq.s32.totalorder %v5002_v24, %v6447_v11 }
 0x272   : > { %1870 = vperm.xlu1 %3930, %v6466_v12   ;;  %v2340_v8 = vsel %vm2212_vm3, %v2278_v53, 0.0  ;;  %v2342_v10 = vsel %vm2214_vm6, %v2278_v53, 0.0  ;;  %v2343_v7 = vsel %vm2215_vm7, %v2278_v53, 0.0  ;;  %v1134_v49 = vsel %vm1006_vm9, %v8048_v13, 0.0 }
 0x273   : > { %v6481_v22 = vpop.permute.xlu1 %1858  ;;  %v1135_v61 = vsel %vm1007_vm4, %v8048_v13, 0.0  ;;  %v2407_v4 = vadd.f32 %v2343_v7, %v2103_v60  ;;  %v2404_v0 = vadd.f32 %v2340_v8, %v2100_v56  ;;  %v2406_v37 = vadd.f32 %v2342_v10, %v2102_v42 }
 0x276   : > { %3931 = vset.pattern.permute.xlu1 %v7915_v58 }
 0x277   : > { %2475 = vperm.xlu1 %3931, %v6323_v54   ;;  %v8046_v54 = vld [vmem:[#allocation49_spill] sm:$0xff] }
 0x278   : > { %v828_v38 = vsel %vm700_vm15, %v8046_v54, 0.0  ;;  %v2464_v43 = vpop.permute.xlu1 %2463  ;;  %v829_v29 = vsel %vm701_vm14, %v8046_v54, 0.0  ;;  %v830_v33 = vsel %vm702_vm12, %v8046_v54, 0.0  ;;  %v831_v9 = vsel %vm703_vm13, %v8046_v54, 0.0 }
 0x279   : > { %v892_v2 = vadd.f32 %v828_v38, %v524_v32  ;;  %vm2517_vm15 = vcmp.eq.s32.totalorder %v4996_v14, %v2464_v43  ;;  %vm2519_vm14 = vcmp.eq.s32.totalorder %v5002_v24, %v2464_v43  ;;  %vm2516_vm12 = vcmp.eq.s32.totalorder %v4988_v16, %v2464_v43  ;;  %v6573_v38 = vld [vmem:[%s4292_s12 + $0x60] sm:$0xff] }
 0x27a   : > { %vm2518_vm13 = vcmp.eq.s32.totalorder %v4999_v5, %v2464_v43  ;;  %v893_v59 = vadd.f32 %v829_v29, %v6495_v45  ;;  %v894_v21 = vadd.f32 %v830_v33, %v6498_v23  ;;  %v895_v32 = vadd.f32 %v831_v9, %v527_v34  ;;  %v8049_v45 = vld [vmem:[#allocation93_spill] sm:$0xff]  ;;  %v8050_v23 = vld [vmem:[#allocation104_spill] sm:$0xff] }
 0x27b   : > { %3932 = vset.pattern.permute.xlu1 %v7924_v30  ;;  %v1196_v54 = vadd.f32 %v1132_v6, %v892_v2  ;;  %vm1308_vm5 = vcmp.eq.s32.totalorder %v4988_v16, %v8049_v45  ;;  %vm1309_vm1 = vcmp.eq.s32.totalorder %v4996_v14, %v8049_v45  ;;  %vm1310_vm10 = vcmp.eq.s32.totalorder %v4999_v5, %v8049_v45  ;;  %v8051_v2 = vld [vmem:[#allocation28_spill] sm:$0xff] }
 0x27c   : > { %1993 = vperm.xlu1 %3932, %v6444_v39   ;;  %v1197_v43 = vadd.f32 %v1133_v17, %v893_v59  ;;  %v1199_v63 = vadd.f32 %v1135_v61, %v895_v32  ;;  %vm1311_vm11 = vcmp.eq.s32.totalorder %v5002_v24, %v8049_v45  ;;  %v1436_v34 = vsel %vm1308_vm5, %v8050_v23, 0.0 }
 0x27d   : > { %v6541_v27 = vpop.permute.xlu1 %1977  ;;  %v1437_v29 = vsel %vm1309_vm1, %v8050_v23, 0.0  ;;  %v1438_v33 = vsel %vm1310_vm10, %v8050_v23, 0.0  ;;  %v1439_v9 = vsel %vm1311_vm11, %v8050_v23, 0.0  ;;  %vm1612_vm3 = vcmp.eq.s32.totalorder %v4988_v16, %v8051_v2 }
 0x27e   : > { %vm1614_vm6 = vcmp.eq.s32.totalorder %v4999_v5, %v8051_v2  ;;  %vm1615_vm7 = vcmp.eq.s32.totalorder %v5002_v24, %v8051_v2  ;;  %v1500_v55 = vadd.f32 %v1436_v34, %v1196_v54  ;;  %v1501_v31 = vadd.f32 %v1437_v29, %v1197_v43 }
 0x27f   : > { %vm1912_vm5 = vcmp.eq.s32.totalorder %v4988_v16, %v6481_v22  ;;  %vm1913_vm1 = vcmp.eq.s32.totalorder %v4996_v14, %v6481_v22  ;;  %vm1914_vm10 = vcmp.eq.s32.totalorder %v4999_v5, %v6481_v22  ;;  %vm1915_vm11 = vcmp.eq.s32.totalorder %v5002_v24, %v6481_v22 }
 0x280   : > { %3933 = vset.pattern.permute.xlu1 %v7915_v58  ;;  %v2040_v59 = vsel %vm1912_vm5, %v6541_v27, 0.0  ;;  %v2042_v22 = vsel %vm1914_vm10, %v6541_v27, 0.0  ;;  %v2043_v32 = vsel %vm1915_vm11, %v6541_v27, 0.0 }
 0x281   : > { %2597 = vperm.xlu1 %3933, %v6298_v51   ;;  %v2341_v51 = vsel %vm2213_vm0, %v2278_v53, 0.0  ;;  %v1198_v53 = vadd.f32 %v1134_v49, %v894_v21  ;;  %vm1613_vm0 = vcmp.eq.s32.totalorder %v4996_v14, %v8051_v2  ;;  %v8052_v49 = vld [vmem:[#allocation35_spill] sm:$0xff]  ;;  %v2041_v21 = vsel %vm1913_vm1, %v6541_v27, 0.0 }
 0x282   : > { %v2405_v11 = vadd.f32 %v2341_v51, %v2101_v47  ;;  %v2582_v28 = vpop.permute.xlu1 %2581  ;;  %v1503_v51 = vadd.f32 %v1439_v9, %v1199_v63  ;;  %vm704_vm2 = vcmp.eq.s32.totalorder %v4988_v16, %v8052_v49  ;;  %vm705_vm8 = vcmp.eq.s32.totalorder %v4996_v14, %v8052_v49  ;;  %v8056_v63 = vld [vmem:[#allocation66_spill] sm:$0xff] }
 0x283   : > { %v2645_v19 = vsel %vm2517_vm15, %v2582_v28, 0.0  ;;  %v2647_v35 = vsel %vm2519_vm14, %v2582_v28, 0.0  ;;  %v2644_v25 = vsel %vm2516_vm12, %v2582_v28, 0.0  ;;  %v2646_v46 = vsel %vm2518_vm13, %v2582_v28, 0.0 }
 0x284   : > { %v2709_v62 = vadd.f32 %v2645_v19, %v2405_v11  ;;  %v2711_v3 = vadd.f32 %v2647_v35, %v2407_v4  ;;  %v2708_v1 = vadd.f32 %v2644_v25, %v2404_v0  ;;  %v2710_v50 = vadd.f32 %v2646_v46, %v2406_v37  ;;  %v8053_v11 = vld [vmem:[#allocation50_spill] sm:$0xff] }
 0x285   : > { %3934 = vset.pattern.permute.xlu1 %v7907_v44  ;;  %v1502_v8 = vadd.f32 %v1438_v33, %v1198_v53  ;;  %vm706_vm9 = vcmp.eq.s32.totalorder %v4999_v5, %v8052_v49  ;;  %vm707_vm4 = vcmp.eq.s32.totalorder %v5002_v24, %v8052_v49  ;;  %v832_v4 = vsel %vm704_vm2, %v8053_v11, 0.0  ;;  %v8054_v0 = vld [vmem:[#allocation10_spill] sm:$0xff] }
 0x286   : > { %2174 = vperm.xlu1 %3934, %v6466_v12   ;;  %2906 = vmatprep.mubr.f32.mxu0 %v2709_v62  ;;  %vm384_vm15 = vcmp.eq.s32.totalorder %v4988_v16, %v8054_v0  ;;  %vm385_vm14 = vcmp.eq.s32.totalorder %v4996_v14, %v8054_v0  ;;  %vm386_vm12 = vcmp.eq.s32.totalorder %v4999_v5, %v8054_v0  ;;  %v833_v46 = vsel %vm705_vm8, %v8053_v11, 0.0 }
 0x287   : > { %3051 = vmatprep.mubr.f32.mxu1 %v2711_v3  ;;  %2907 = vmatmul.mubr.f32.gmra.mrb[12].mxu0 %v2708_v1  ;;  %vm387_vm13 = vcmp.eq.s32.totalorder %v5002_v24, %v8054_v0  ;;  %v834_v62 = vsel %vm706_vm9, %v8053_v11, 0.0  ;;  %v835_v3 = vsel %vm707_vm4, %v8053_v11, 0.0  ;;  %vm1008_vm2 = vcmp.eq.s32.totalorder %v4988_v16, %v8056_v63 }
 0x288   : > { %v6576_v18 = vpop.permute.xlu1 %2162  ;;  %3052 = vmatmul.mubr.f32.gmra.mrb[12].mxu1 %v2710_v50  ;;  %v2282_v50 = vpop.permute.xlu0 %2281  ;;  %v2105_v29 = vadd.f32 %v2041_v21, %v6471_v52  ;;  %v2107_v33 = vadd.f32 %v2043_v32, %v6475_v40  ;;  %v2104_v9 = vadd.f32 %v2040_v59, %v6469_v20  ;;  %v2106_v2 = vadd.f32 %v2042_v22, %v6473_v57  ;;  %v8060_v22 = vld [vmem:[#allocation30_spill] sm:$0xff] }
 0x289   : > { %vm1009_vm8 = vcmp.eq.s32.totalorder %v4996_v14, %v8056_v63  ;;  %vm1010_vm9 = vcmp.eq.s32.totalorder %v4999_v5, %v8056_v63  ;;  %vm1011_vm4 = vcmp.eq.s32.totalorder %v5002_v24, %v8056_v63 }
 0x28a   : > { %3935 = vset.pattern.permute.xlu1 %v7903_v41 }
 0x28b   : > { %1693 = vperm.xlu1 %3935, %v6573_v38  }
 0x28d   : > { %v1678_v10 = vpop.permute.xlu1 %1677 }
 0x28e   : > { %v1740_v7 = vsel %vm1612_vm3, %v1678_v10, 0.0  ;;  %v1741_v47 = vsel %vm1613_vm0, %v1678_v10, 0.0  ;;  %v1742_v60 = vsel %vm1614_vm6, %v1678_v10, 0.0  ;;  %v1743_v56 = vsel %vm1615_vm7, %v1678_v10, 0.0 }
 0x28f   : > { %3936 = vset.pattern.permute.xlu1 %v7924_v30  ;;  %v6603_v42 = vadd.f32 %v1740_v7, %v1500_v55  ;;  %v6605_v13 = vadd.f32 %v1741_v47, %v1501_v31  ;;  %v6607_v6 = vadd.f32 %v1742_v60, %v1502_v8  ;;  %v6609_v17 = vadd.f32 %v1743_v56, %v1503_v51  ;;  %v8057_v55 = vld [vmem:[#allocation80_spill] sm:$0xff] }
 0x290   : > { %1873 = vperm.xlu1 %3936, %v6600_v15   ;;  %vm2216_vm3 = vcmp.eq.s32.totalorder %v4988_v16, %v6576_v18  ;;  %vm2217_vm0 = vcmp.eq.s32.totalorder %v4996_v14, %v6576_v18  ;;  %vm2218_vm6 = vcmp.eq.s32.totalorder %v4999_v5, %v6576_v18  ;;  %vm2219_vm7 = vcmp.eq.s32.totalorder %v5002_v24, %v6576_v18 }
 0x291   : > { %v2344_v23 = vsel %vm2216_vm3, %v2282_v50, 0.0  ;;  %v2345_v34 = vsel %vm2217_vm0, %v2282_v50, 0.0  ;;  %v2347_v27 = vsel %vm2219_vm7, %v2282_v50, 0.0  ;;  %v1136_v18 = vsel %vm1008_vm2, %v8057_v55, 0.0 }
 0x292   : > { %v2409_v52 = vadd.f32 %v2345_v34, %v2105_v29  ;;  %v2411_v40 = vadd.f32 %v2347_v27, %v2107_v33  ;;  %v2408_v20 = vadd.f32 %v2344_v23, %v2104_v9  ;;  %v1137_v11 = vsel %vm1009_vm8, %v8057_v55, 0.0 }
 0x293   : > { %v6615_v61 = vpop.permute.xlu1 %1861  ;;  %v1139_v0 = vsel %vm1011_vm4, %v8057_v55, 0.0  ;;  %vm1616_vm3 = vcmp.eq.s32.totalorder %v4988_v16, %v8060_v22  ;;  %vm1617_vm0 = vcmp.eq.s32.totalorder %v4996_v14, %v8060_v22  ;;  %vm1619_vm7 = vcmp.eq.s32.totalorder %v5002_v24, %v8060_v22 }
 0x294   : > { %3937 = vset.pattern.permute.xlu1 %v7915_v58 }
 0x295   : > { %2478 = vperm.xlu1 %3937, %v6466_v12   ;;  %v8055_v12 = vld [vmem:[#allocation20_spill] sm:$0xff] }
 0x296   : > { %v528_v37 = vsel %vm384_vm15, %v8055_v12, 0.0  ;;  %v529_v28 = vsel %vm385_vm14, %v8055_v12, 0.0  ;;  %v530_v19 = vsel %vm386_vm12, %v8055_v12, 0.0  ;;  %v531_v35 = vsel %vm387_vm13, %v8055_v12, 0.0  ;;  %v8058_v12 = vld [vmem:[#allocation92_spill] sm:$0xff] }
 0x297   : > { %v6641_v1 = vadd.f32 %v832_v4, %v528_v37  ;;  %v897_v54 = vadd.f32 %v833_v46, %v529_v28  ;;  %v898_v43 = vadd.f32 %v834_v62, %v530_v19  ;;  %v899_v53 = vadd.f32 %v835_v3, %v531_v35  ;;  %v6720_v37 = vld [vmem:[%s4292_s12 + $0x68] sm:$0xff]  ;;  %v8059_v62 = vld [vmem:[#allocation106_spill] sm:$0xff] }
 0x298   : > { %v2467_v25 = vpop.permute.xlu1 %2466  ;;  %v1138_v4 = vsel %vm1010_vm9, %v8057_v55, 0.0  ;;  %vm1312_vm5 = vcmp.eq.s32.totalorder %v4988_v16, %v8058_v12  ;;  %vm1313_vm1 = vcmp.eq.s32.totalorder %v4996_v14, %v8058_v12  ;;  %vm1314_vm10 = vcmp.eq.s32.totalorder %v4999_v5, %v8058_v12 }
 0x299   : > { %3938 = vset.pattern.permute.xlu1 %v7924_v30  ;;  %vm2520_vm15 = vcmp.eq.s32.totalorder %v4988_v16, %v2467_v25  ;;  %vm2521_vm14 = vcmp.eq.s32.totalorder %v4996_v14, %v2467_v25  ;;  %vm2522_vm12 = vcmp.eq.s32.totalorder %v4999_v5, %v2467_v25  ;;  %vm2523_vm13 = vcmp.eq.s32.totalorder %v5002_v24, %v2467_v25 }
 0x29a   : > { %1997 = vperm.xlu1 %3938, %v6573_v38   ;;  %vm1315_vm11 = vcmp.eq.s32.totalorder %v5002_v24, %v8058_v12  ;;  %v1200_v19 = vadd.f32 %v1136_v18, %v6641_v1  ;;  %v1201_v35 = vadd.f32 %v1137_v11, %v897_v54  ;;  %v1202_v25 = vadd.f32 %v1138_v4, %v898_v43  ;;  %v6743_v1 = vld [vmem:[%s4223_s9 + $0x68] sm:$0xff]  ;;  %v2286_v11 = vpop.permute.xlu0 %2285 }
 0x29b   : > { %v1203_v46 = vadd.f32 %v1139_v0, %v899_v53  ;;  %v1440_v3 = vsel %vm1312_vm5, %v8059_v62, 0.0  ;;  %v1442_v59 = vsel %vm1314_vm10, %v8059_v62, 0.0  ;;  %v1443_v21 = vsel %vm1315_vm11, %v8059_v62, 0.0  ;;  %v8061_v18 = vld [vmem:[#allocation13_spill] sm:$0xff] }
 0x29c   : > { %v1504_v32 = vadd.f32 %v1440_v3, %v1200_v19  ;;  %v1506_v43 = vadd.f32 %v1442_v59, %v1202_v25  ;;  %vm388_vm2 = vcmp.eq.s32.totalorder %v4988_v16, %v8061_v18  ;;  %vm389_vm8 = vcmp.eq.s32.totalorder %v4996_v14, %v8061_v18  ;;  %v8066_v19 = vld [vmem:[#allocation79_spill] sm:$0xff] }
 0x29d   : > { %v6667_v45 = vpop.permute.xlu1 %1981  ;;  %v1507_v53 = vadd.f32 %v1443_v21, %v1203_v46  ;;  %vm390_vm9 = vcmp.eq.s32.totalorder %v4999_v5, %v8061_v18  ;;  %vm391_vm4 = vcmp.eq.s32.totalorder %v5002_v24, %v8061_v18  ;;  %vm1916_vm10 = vcmp.eq.s32.totalorder %v4988_v16, %v6615_v61 }
 0x29e   : > { %3939 = vset.pattern.permute.xlu1 %v7915_v58  ;;  %vm1917_vm11 = vcmp.eq.s32.totalorder %v4996_v14, %v6615_v61 }
 0x29f   : > { %2601 = vperm.xlu1 %3939, %v6444_v39   ;;  %v2346_v39 = vsel %vm2218_vm6, %v2282_v50, 0.0  ;;  %v1441_v50 = vsel %vm1313_vm1, %v8059_v62, 0.0  ;;  %vm1618_vm6 = vcmp.eq.s32.totalorder %v4999_v5, %v8060_v22  ;;  %v2045_v4 = vsel %vm1917_vm11, %v6667_v45, 0.0 }
 0x2a0   : > { %v2410_v31 = vadd.f32 %v2346_v39, %v2106_v2  ;;  %v1505_v54 = vadd.f32 %v1441_v50, %v1201_v35  ;;  %v2109_v46 = vadd.f32 %v2045_v4, %v6605_v13 }
 0x2a2   : > { %v2586_v57 = vpop.permute.xlu1 %2585 }
 0x2a3   : > { %3940 = vset.pattern.permute.xlu1 %v7907_v44  ;;  %v2649_v8 = vsel %vm2521_vm14, %v2586_v57, 0.0  ;;  %v2651_v51 = vsel %vm2523_vm13, %v2586_v57, 0.0  ;;  %v2648_v10 = vsel %vm2520_vm15, %v2586_v57, 0.0  ;;  %v2650_v7 = vsel %vm2522_vm12, %v2586_v57, 0.0 }
 0x2a4   : > { %2177 = vperm.xlu1 %3940, %v6600_v15   ;;  %v2713_v47 = vadd.f32 %v2649_v8, %v2409_v52  ;;  %v2715_v60 = vadd.f32 %v2651_v51, %v2411_v40  ;;  %v2712_v56 = vadd.f32 %v2648_v10, %v2408_v20  ;;  %v2714_v49 = vadd.f32 %v2650_v7, %v2410_v31  ;;  %v8062_v52 = vld [vmem:[#allocation36_spill] sm:$0xff]  ;;  %v8064_v31 = vld [vmem:[#allocation51_spill] sm:$0xff] }
 0x2a5   : > { %vm708_vm15 = vcmp.eq.s32.totalorder %v4988_v16, %v8062_v52  ;;  %vm709_vm14 = vcmp.eq.s32.totalorder %v4996_v14, %v8062_v52  ;;  %vm710_vm12 = vcmp.eq.s32.totalorder %v4999_v5, %v8062_v52  ;;  %vm711_vm13 = vcmp.eq.s32.totalorder %v5002_v24, %v8062_v52 }
 0x2a6   : > { %2911 = vmatprep.mubr.f32.mxu0 %v2713_v47  ;;  %3056 = vmatprep.mubr.f32.mxu1 %v2715_v60  ;;  %v836_v57 = vsel %vm708_vm15, %v8064_v31, 0.0  ;;  %v6788_v10 = vsel %vm709_vm14, %v8064_v31, 0.0  ;;  %v6791_v7 = vsel %vm710_vm12, %v8064_v31, 0.0  ;;  %v6794_v47 = vsel %vm711_vm13, %v8064_v31, 0.0 }
 0x2a7   : > { %v6723_v28 = vpop.permute.xlu1 %2165  ;;  %2912 = vmatmul.mubr.f32.gmra.mrb[14].mxu0 %v2712_v56  ;;  %3057 = vmatmul.mubr.f32.gmra.mrb[14].mxu1 %v2714_v49  ;;  %v8065_v49 = vld [vmem:[#allocation65_spill] sm:$0xff] }
 0x2a8   : > { %3941 = vset.pattern.permute.xlu1 %v7903_v41  ;;  %vm1012_vm5 = vcmp.eq.s32.totalorder %v4988_v16, %v8065_v49  ;;  %vm1013_vm1 = vcmp.eq.s32.totalorder %v4996_v14, %v8065_v49 }
 0x2a9   : > { %1697 = vperm.xlu1 %3941, %v6720_v37   ;;  %v1140_v35 = vsel %vm1012_vm5, %v8066_v19, 0.0 }
 0x2ad   : > { %3942 = vset.pattern.permute.xlu1 %v7924_v30 }
 0x2ae   : > { %1876 = vperm.xlu1 %3942, %v6743_v1  }
 0x2b0   : > { %v1682_v63 = vpop.permute.xlu1 %1681 }
 0x2b1   : > { %v1744_v23 = vsel %vm1616_vm3, %v1682_v63, 0.0  ;;  %v1745_v34 = vsel %vm1617_vm0, %v1682_v63, 0.0  ;;  %v1746_v39 = vsel %vm1618_vm6, %v1682_v63, 0.0  ;;  %v1747_v27 = vsel %vm1619_vm7, %v1682_v63, 0.0 }
 0x2b2   : > { %v6746_v29 = vadd.f32 %v1744_v23, %v1504_v32  ;;  %v6748_v33 = vadd.f32 %v1745_v34, %v1505_v54  ;;  %v6750_v9 = vadd.f32 %v1746_v39, %v1506_v43  ;;  %v6752_v2 = vadd.f32 %v1747_v27, %v1507_v53  ;;  %3943 = vset.pattern.permute.xlu1 %v7915_v58 }
 0x2b3   : > { %2481 = vperm.xlu1 %3943, %v6600_v15   ;;  %v8063_v15 = vld [vmem:[#allocation23_spill] sm:$0xff]  ;;  %vm1918_vm3 = vcmp.eq.s32.totalorder %v4999_v5, %v6615_v61  ;;  %vm1919_vm0 = vcmp.eq.s32.totalorder %v5002_v24, %v6615_v61  ;;  %vm2221_vm6 = vcmp.eq.s32.totalorder %v4996_v14, %v6723_v28  ;;  %vm2220_vm7 = vcmp.eq.s32.totalorder %v4988_v16, %v6723_v28 }
 0x2b4   : > { %v532_v40 = vsel %vm388_vm2, %v8063_v15, 0.0  ;;  %v6771_v20 = vsel %vm389_vm8, %v8063_v15, 0.0  ;;  %v6776_v8 = vsel %vm390_vm9, %v8063_v15, 0.0  ;;  %v6785_v51 = vsel %vm391_vm4, %v8063_v15, 0.0 }
 0x2b5   : > { %v6756_v55 = vpop.permute.xlu1 %1864  ;;  %v6796_v56 = vadd.f32 %v836_v57, %v532_v40  ;;  %vm2222_vm2 = vcmp.eq.s32.totalorder %v4999_v5, %v6723_v28  ;;  %vm2223_vm8 = vcmp.eq.s32.totalorder %v5002_v24, %v6723_v28  ;;  %vm1014_vm9 = vcmp.eq.s32.totalorder %v4999_v5, %v8065_v49 }
 0x2b6   : > { %v2044_v61 = vsel %vm1916_vm10, %v6667_v45, 0.0  ;;  %v2046_v0 = vsel %vm1918_vm3, %v6667_v45, 0.0  ;;  %v2047_v12 = vsel %vm1919_vm0, %v6667_v45, 0.0  ;;  %vm1015_vm4 = vcmp.eq.s32.totalorder %v5002_v24, %v8065_v49 }
 0x2b7   : > { %3944 = vset.pattern.permute.xlu1 %v7924_v30  ;;  %v2349_v28 = vsel %vm2221_vm6, %v2286_v11, 0.0  ;;  %v2348_v62 = vsel %vm2220_vm7, %v2286_v11, 0.0  ;;  %v2350_v45 = vsel %vm2222_vm2, %v2286_v11, 0.0  ;;  %v2351_v3 = vsel %vm2223_vm8, %v2286_v11, 0.0 }
 0x2b8   : > { %2001 = vperm.xlu1 %3944, %v6720_v37   ;;  %v1142_v21 = vsel %vm1014_vm9, %v8066_v19, 0.0  ;;  %v2108_v22 = vadd.f32 %v2044_v61, %v6603_v42  ;;  %v2110_v32 = vadd.f32 %v2046_v0, %v6607_v6  ;;  %v2111_v54 = vadd.f32 %v2047_v12, %v6609_v17  ;;  %v6863_v0 = vld [vmem:[%s4292_s12 + $0x70] sm:$0xff] }
 0x2b9   : > { %v1143_v13 = vsel %vm1015_vm4, %v8066_v19, 0.0  ;;  %v2413_v34 = vadd.f32 %v2349_v28, %v2109_v46  ;;  %v901_v4 = vadd.f32 %v6788_v10, %v6771_v20  ;;  %v902_v61 = vadd.f32 %v6791_v7, %v6776_v8  ;;  %v8067_v20 = vld [vmem:[#allocation95_spill] sm:$0xff] }
 0x2ba   : > { %v2470_v60 = vpop.permute.xlu1 %2469  ;;  %v2415_v42 = vadd.f32 %v2351_v3, %v2111_v54  ;;  %v2412_v6 = vadd.f32 %v2348_v62, %v2108_v22  ;;  %v2414_v39 = vadd.f32 %v2350_v45, %v2110_v32  ;;  %v1204_v12 = vadd.f32 %v1140_v35, %v6796_v56  ;;  %v8068_v8 = vld [vmem:[#allocation107_spill] sm:$0xff]  ;;  %v6891_v35 = vld [vmem:[%s4223_s9 + $0x70] sm:$0xff] }
 0x2bb   : > { %v3468_v50 = vpop.f32.mrb[0].mxu0  ;;  %v3548_v59 = vpop.f32.mrb[0].mxu1  ;;  %vm2524_vm15 = vcmp.eq.s32.totalorder %v4988_v16, %v2470_v60  ;;  %vm2525_vm14 = vcmp.eq.s32.totalorder %v4996_v14, %v2470_v60  ;;  %vm2526_vm12 = vcmp.eq.s32.totalorder %v4999_v5, %v2470_v60  ;;  %vm2527_vm13 = vcmp.eq.s32.totalorder %v5002_v24, %v2470_v60  ;;  %v8069_v56 = vld [vmem:[#allocation31_spill] sm:$0xff] }
 0x2bc   : > { %3945 = vset.pattern.permute.xlu1 %v7915_v58  ;;  %v3469_v43 = vpop.f32.mrb[1].mxu0  ;;  %v3549_v53 = vpop.f32.mrb[1].mxu1  ;;  %v903_v60 = vadd.f32 %v6794_v47, %v6785_v51  ;;  %v1206_v28 = vadd.f32 %v1142_v21, %v902_v61  ;;  %vm1316_vm5 = vcmp.eq.s32.totalorder %v4988_v16, %v8067_v20  ;;  %vm1318_vm10 = vcmp.eq.s32.totalorder %v4999_v5, %v8067_v20 }
 0x2bd   : > { %2605 = vperm.xlu1 %3945, %v6573_v38   ;;  %v1141_v38 = vsel %vm1013_vm1, %v8066_v19, 0.0  ;;  %v3470_v63 = vadd.f32 %v3469_v43, %v3468_v50  ;;  %v3550_v23 = vadd.f32 %v3549_v53, %v3548_v59  ;;  %vm1317_vm1 = vcmp.eq.s32.totalorder %v4996_v14, %v8067_v20 }
 0x2be   : > { %v1205_v19 = vadd.f32 %v1141_v38, %v901_v4  ;;  %v1207_v46 = vadd.f32 %v1143_v13, %v903_v60  ;;  %vm1319_vm11 = vcmp.eq.s32.totalorder %v5002_v24, %v8067_v20  ;;  %v1444_v51 = vsel %vm1316_vm5, %v8068_v8, 0.0  ;;  %v2290_v4 = vpop.permute.xlu0 %2289  ;;  %v8074_v20 = vld [vmem:[#allocation68_spill] sm:$0xff] }
 0x2bf   : > { %v6836_v25 = vpop.permute.xlu1 %1985  ;;  %v6853_v17 = vadd.f32 %v3550_v23, %v3470_v63  ;;  %v1445_v10 = vsel %vm1317_vm1, %v8068_v8, 0.0  ;;  %v1446_v7 = vsel %vm1318_vm10, %v8068_v8, 0.0  ;;  %v1447_v47 = vsel %vm1319_vm11, %v8068_v8, 0.0  ;;  %v8070_v23 = vld [vmem:[#allocation37_spill] sm:$0xff] }
 0x2c0   : > { %vm1620_vm3 = vcmp.eq.s32.totalorder %v4988_v16, %v8069_v56  ;;  %vm1621_vm0 = vcmp.eq.s32.totalorder %v4996_v14, %v8069_v56  ;;  %vm1622_vm6 = vcmp.eq.s32.totalorder %v4999_v5, %v8069_v56  ;;  %vm1623_vm7 = vcmp.eq.s32.totalorder %v5002_v24, %v8069_v56 }
 0x2c1   : > { %3946 = vset.pattern.permute.xlu1 %v7907_v44  ;;  %v1508_v38 = vadd.f32 %v1444_v51, %v1204_v12  ;;  %v1509_v45 = vadd.f32 %v1445_v10, %v1205_v19  ;;  %v1510_v3 = vadd.f32 %v1446_v7, %v1206_v28  ;;  %v1511_v50 = vadd.f32 %v1447_v47, %v1207_v46 }
 0x2c2   : > { %2180 = vperm.xlu1 %3946, %v6743_v1   ;;  %vm712_vm2 = vcmp.eq.s32.totalorder %v4988_v16, %v8070_v23  ;;  %vm713_vm8 = vcmp.eq.s32.totalorder %v4996_v14, %v8070_v23  ;;  %vm714_vm9 = vcmp.eq.s32.totalorder %v4999_v5, %v8070_v23  ;;  %vm715_vm4 = vcmp.eq.s32.totalorder %v5002_v24, %v8070_v23 }
 0x2c3   : > { %vm1920_vm5 = vcmp.eq.s32.totalorder %v4988_v16, %v6756_v55  ;;  %vm1921_vm1 = vcmp.eq.s32.totalorder %v4996_v14, %v6756_v55  ;;  %vm1922_vm10 = vcmp.eq.s32.totalorder %v4999_v5, %v6756_v55  ;;  %vm1923_vm11 = vcmp.eq.s32.totalorder %v5002_v24, %v6756_v55 }
 0x2c4   : > { %v2590_v27 = vpop.permute.xlu1 %2589  ;;  %v2048_v61 = vsel %vm1920_vm5, %v6836_v25, 0.0  ;;  %v2049_v55 = vsel %vm1921_vm1, %v6836_v25, 0.0  ;;  %v2050_v60 = vsel %vm1922_vm10, %v6836_v25, 0.0  ;;  %v2051_v12 = vsel %vm1923_vm11, %v6836_v25, 0.0 }
 0x2c5   : > { %v2653_v18 = vsel %vm2525_vm14, %v2590_v27, 0.0  ;;  %v2655_v52 = vsel %vm2527_vm13, %v2590_v27, 0.0  ;;  %v2652_v15 = vsel %vm2524_vm15, %v2590_v27, 0.0  ;;  %v2654_v40 = vsel %vm2526_vm12, %v2590_v27, 0.0 }
 0x2c6   : > { %3947 = vset.pattern.permute.xlu1 %v7903_v41  ;;  %v2717_v31 = vadd.f32 %v2653_v18, %v2413_v34  ;;  %v2719_v57 = vadd.f32 %v2655_v52, %v2415_v42  ;;  %v2716_v49 = vadd.f32 %v2652_v15, %v2412_v6  ;;  %v2718_v11 = vadd.f32 %v2654_v40, %v2414_v39  ;;  %v8071_v42 = vld [vmem:[#allocation52_spill] sm:$0xff]  ;;  %v8073_v39 = vld [vmem:[#allocation22_spill] sm:$0xff] }
 0x2c7   : > { %1701 = vperm.xlu1 %3947, %v6863_v0   ;;  %v840_v6 = vsel %vm712_vm2, %v8071_v42, 0.0  ;;  %vm1016_vm2 = vcmp.eq.s32.totalorder %v4988_v16, %v8074_v20  ;;  %v2112_v7 = vadd.f32 %v2048_v61, %v6746_v29  ;;  %v2113_v47 = vadd.f32 %v2049_v55, %v6748_v33  ;;  %v8077_v61 = vld [vmem:[#allocation108_spill] sm:$0xff] }
 0x2c8   : > { %2916 = vmatprep.mubr.f32.mxu0 %v2717_v31  ;;  %3061 = vmatprep.mubr.f32.mxu1 %v2719_v57  ;;  %v841_v31 = vsel %vm713_vm8, %v8071_v42, 0.0  ;;  %v842_v57 = vsel %vm714_vm9, %v8071_v42, 0.0  ;;  %v2114_v56 = vadd.f32 %v2050_v60, %v6750_v9  ;;  %v2115_v25 = vadd.f32 %v2051_v12, %v6752_v2 }
 0x2c9   : > { %v6867_v62 = vpop.permute.xlu1 %2168  ;;  %2917 = vmatmul.mubr.f32.gmra.mrb[16].mxu0 %v2716_v49  ;;  %3062 = vmatmul.mubr.f32.gmra.mrb[16].mxu1 %v2718_v11  ;;  %v843_v49 = vsel %vm715_vm4, %v8071_v42, 0.0  ;;  %vm1017_vm8 = vcmp.eq.s32.totalorder %v4996_v14, %v8074_v20  ;;  %vm1018_vm9 = vcmp.eq.s32.totalorder %v4999_v5, %v8074_v20  ;;  %vm1019_vm4 = vcmp.eq.s32.totalorder %v5002_v24, %v8074_v20 }
 0x2cb   : > { %3948 = vset.pattern.permute.xlu1 %v7924_v30 }
 0x2cc   : > { %1879 = vperm.xlu1 %3948, %v6891_v35  }
 0x2ce   : > { %v1686_v59 = vpop.permute.xlu1 %1685 }
 0x2cf   : > { %v1748_v21 = vsel %vm1620_vm3, %v1686_v59, 0.0  ;;  %v1749_v22 = vsel %vm1621_vm0, %v1686_v59, 0.0  ;;  %v1750_v32 = vsel %vm1622_vm6, %v1686_v59, 0.0  ;;  %v1751_v54 = vsel %vm1623_vm7, %v1686_v59, 0.0 }
 0x2d0   : > { %v6894_v43 = vadd.f32 %v1748_v21, %v1508_v38  ;;  %v6896_v53 = vadd.f32 %v1749_v22, %v1509_v45  ;;  %v6898_v13 = vadd.f32 %v1750_v32, %v1510_v3  ;;  %v6900_v63 = vadd.f32 %v1751_v54, %v1511_v50  ;;  %3949 = vset.pattern.permute.xlu1 %v7915_v58  ;;  %v8075_v38 = vld [vmem:[#allocation82_spill] sm:$0xff] }
 0x2d1   : > { %2484 = vperm.xlu1 %3949, %v6743_v1   ;;  %v8072_v1 = vld [vmem:[#allocation12_spill] sm:$0xff]  ;;  %vm2224_vm3 = vcmp.eq.s32.totalorder %v4988_v16, %v6867_v62  ;;  %vm2225_vm0 = vcmp.eq.s32.totalorder %v4996_v14, %v6867_v62  ;;  %vm2226_vm6 = vcmp.eq.s32.totalorder %v4999_v5, %v6867_v62  ;;  %vm2227_vm7 = vcmp.eq.s32.totalorder %v5002_v24, %v6867_v62 }
 0x2d2   : > { %vm392_vm15 = vcmp.eq.s32.totalorder %v4988_v16, %v8072_v1  ;;  %vm393_vm14 = vcmp.eq.s32.totalorder %v4996_v14, %v8072_v1  ;;  %vm394_vm12 = vcmp.eq.s32.totalorder %v4999_v5, %v8072_v1  ;;  %vm395_vm13 = vcmp.eq.s32.totalorder %v5002_v24, %v8072_v1 }
 0x2d3   : > { %v6906_v34 = vpop.permute.xlu1 %1867  ;;  %v536_v27 = vsel %vm392_vm15, %v8073_v39, 0.0  ;;  %v537_v18 = vsel %vm393_vm14, %v8073_v39, 0.0  ;;  %v538_v52 = vsel %vm394_vm12, %v8073_v39, 0.0  ;;  %v539_v15 = vsel %vm395_vm13, %v8073_v39, 0.0 }
 0x2d4   : > { %v6932_v11 = vadd.f32 %v840_v6, %v536_v27  ;;  %v905_v19 = vadd.f32 %v841_v31, %v537_v18  ;;  %v906_v28 = vadd.f32 %v842_v57, %v538_v52  ;;  %v907_v46 = vadd.f32 %v843_v49, %v539_v15  ;;  %v6993_v27 = vld [vmem:[%s4292_s12 + $0x78] sm:$0xff]  ;;  %v3102_v18 = vld [vmem:[#allocation2] sm:$0xff]  ;;  %v3103_v52 = vld [vmem:[#allocation2 + $0x8] sm:$0xff] }
 0x2d5   : > { %3951 = vset.pattern.permute.xlu1 %v7924_v30  ;;  %v2352_v62 = vsel %vm2224_vm3, %v2290_v4, 0.0  ;;  %v2353_v51 = vsel %vm2225_vm0, %v2290_v4, 0.0  ;;  %v2354_v10 = vsel %vm2226_vm6, %v2290_v4, 0.0  ;;  %v1144_v45 = vsel %vm1016_vm2, %v8075_v38, 0.0 }
 0x2d6   : > { %2005 = vperm.xlu1 %3951, %v6863_v0   ;;  %v2417_v29 = vadd.f32 %v2353_v51, %v2113_v47  ;;  %v2416_v9 = vadd.f32 %v2352_v62, %v2112_v7  ;;  %v2418_v3 = vadd.f32 %v2354_v10, %v2114_v56  ;;  %v1145_v6 = vsel %vm1017_vm8, %v8075_v38, 0.0  ;;  %v3104_v10 = vld [vmem:[#allocation2 + $0x10] sm:$0xff] }
 0x2d7   : > { %v1146_v1 = vsel %vm1018_vm9, %v8075_v38, 0.0  ;;  %v1147_v39 = vsel %vm1019_vm4, %v8075_v38, 0.0  ;;  %v1208_v31 = vadd.f32 %v1144_v45, %v6932_v11  ;;  %v1209_v57 = vadd.f32 %v1145_v6, %v905_v19  ;;  %v8078_v19 = vld [vmem:[#allocation43_spill] sm:$0xff]  ;;  %v8082_v6 = vld [vmem:[#allocation53_spill] sm:$0xff] }
 0x2d8   : > { %v2473_v40 = vpop.permute.xlu1 %2472  ;;  %v1210_v49 = vadd.f32 %v1146_v1, %v906_v28  ;;  %vm1624_vm3 = vcmp.eq.s32.totalorder %v4988_v16, %v8078_v19  ;;  %vm1625_vm0 = vcmp.eq.s32.totalorder %v4996_v14, %v8078_v19  ;;  %vm1626_vm6 = vcmp.eq.s32.totalorder %v4999_v5, %v8078_v19  ;;  %v7031_v28 = vld [vmem:[%s4223_s9 + $0x78] sm:$0xff]  ;;  %s247_s9 = sand.u32 1, %s4077_s19  }
 0x2d9   : > { %vm2528_vm15 = vcmp.eq.s32.totalorder %v4988_v16, %v2473_v40  ;;  %vm2529_vm14 = vcmp.eq.s32.totalorder %v4996_v14, %v2473_v40  ;;  %vm2530_vm12 = vcmp.eq.s32.totalorder %v4999_v5, %v2473_v40  ;;  %vm2531_vm13 = vcmp.eq.s32.totalorder %v5002_v24, %v2473_v40  ;;  %s3424_s16 = sshll.u32 %s247_s9, 7  ;;  %s7676_s22 = scalar_lea.sflag [#allocation4], %s247_s9 }
 0x2da   : > { %3952 = vset.pattern.permute.xlu1 %v7915_v58  ;;  %v3748_v40 = vpack.c.bf16 %v3103_v52, %v3102_v18  ;;  %s7621_s17 = scalar_lea.vmem [#allocation5], %s3424_s16 }
 0x2db   : > { %2609 = vperm.xlu1 %3952, %v6720_v37   ;;  %v2355_v37 = vsel %vm2227_vm7, %v2290_v4, 0.0  ;;  %v1211_v4 = vadd.f32 %v1147_v39, %v907_v46  ;;  %vm1627_vm7 = vcmp.eq.s32.totalorder %v5002_v24, %v8078_v19  ;;  %s3332_s25 = sshll.u32 %s7621_s17, 4  ;;  %s7669_s25 = int_to_ptr.vmem [resolvable:$true] %s3332_s25 }
 0x2dc   : > { %v2419_v33 = vadd.f32 %v2355_v37, %v2115_v25  ;;  %3749 = vmatprep.subr.bf16.mxu0 %v3748_v40  ;;  %3780 = vmatprep.subr.bf16.mxu1 %v3748_v40  ;;  %v3105_v37 = vld [vmem:[#allocation2 + $0x18] sm:$0xff]  ;;  %s4019_s30 = scalar_lea.vmem %s7669_s25, 2048  ;;  %p4026_p2 = scmp.lt.s32.totalorder %s7669_s25, %s4024_s10 }
 0x2dd   : > { %v6958_v8 = vpop.permute.xlu1 %1989  ;;  %3751 = vmatpush3.bf16.msra.mxu0 %v3748_v40  ;;  %3788 = vmatpush3.bf16.msra.mxu1 %v3748_v40  ;;  %p4020_p6 = scmp.ne.s32.totalorder %s7669_s25, %s4019_s30  ;;  %p4027_p3 = scmp.lt.s32.totalorder %s4025_s11, %s4019_s30 }
 0x2df   : > { %3954 = vset.pattern.permute.xlu1 %v7907_v44  ;;  %p4021_p10 = pnand %p4020_p6, %p8117_p9  ;;  %p4028_p4 = por %p4027_p3, %p4026_p2 }
 0x2e0   : > { %2183 = vperm.xlu1 %3954, %v6891_v35  }
 0x2e1   : > { %p4022_p12 = pneg %p4021_p10 }
 0x2e2   : > { %v2594_v2 = vpop.permute.xlu1 %2593 }
 0x2e3   : > { %v2657_v50 = vsel %vm2529_vm14, %v2594_v2, 0.0  ;;  %v2659_v59 = vsel %vm2531_vm13, %v2594_v2, 0.0  ;;  %v2656_v21 = vsel %vm2528_vm15, %v2594_v2, 0.0  ;;  %v2658_v22 = vsel %vm2530_vm12, %v2594_v2, 0.0  ;;  %v3107_v2 = vld [vmem:[#allocation2 + $0x28] sm:$0xff]  ;;  %p4029_p7 = pnand %p4028_p4, %p4022_p12 }
 0x2e4   : > { %3955 = vset.pattern.permute.xlu1 %v7903_v41  ;;  %v2721_v32 = vadd.f32 %v2657_v50, %v2417_v29  ;;  %v2723_v54 = vadd.f32 %v2659_v59, %v2419_v33  ;;  %v2720_v23 = vadd.f32 %v2656_v21, %v2416_v9  ;;  %v2722_v42 = vadd.f32 %v2658_v22, %v2418_v3  ;;  %v8076_v41 = vld [vmem:[#allocation94_spill] sm:$0xff]  ;;  %v3106_v3 = vld [vmem:[#allocation2 + $0x20] sm:$0xff]  ;;  %v8079_v50 = vld [vmem:[#allocation15_spill] sm:$0xff] }
 0x2e5   : > { %vm1320_vm5 = vcmp.eq.s32.totalorder %v4988_v16, %v8076_v41  ;;  %1705 = vperm.xlu1 %3955, %v6993_v27   ;;  %vm1321_vm1 = vcmp.eq.s32.totalorder %v4996_v14, %v8076_v41  ;;  %vm1322_vm10 = vcmp.eq.s32.totalorder %v4999_v5, %v8076_v41  ;;  %vm1323_vm11 = vcmp.eq.s32.totalorder %v5002_v24, %v8076_v41  ;;  %v3108_v22 = vld [vmem:[#allocation2 + $0x30] sm:$0xff] }
 0x2e6   : > { %2921 = vmatprep.mubr.f32.mxu0 %v2721_v32  ;;  %3066 = vmatprep.mubr.f32.mxu1 %v2723_v54  ;;  %v1448_v55 = vsel %vm1320_vm5, %v8077_v61, 0.0  ;;  %v1449_v60 = vsel %vm1321_vm1, %v8077_v61, 0.0  ;;  %v1450_v12 = vsel %vm1322_vm10, %v8077_v61, 0.0  ;;  %v1451_v11 = vsel %vm1323_vm11, %v8077_v61, 0.0  ;;  %v8080_v32 = vld [vmem:[#allocation25_spill] sm:$0xff]  ;;  %v3110_v61 = vld [vmem:[#allocation2 + $0x40] sm:$0xff] }
 0x2e7   : > { %v7002_v15 = vpop.permute.xlu1 %2171  ;;  %2922 = vmatmul.mubr.f32.gmra.mrb[18].mxu0 %v2720_v23  ;;  %3067 = vmatmul.mubr.f32.gmra.mrb[18].mxu1 %v2722_v42  ;;  %v1513_v46 = vadd.f32 %v1449_v60, %v1209_v57  ;;  %v1514_v20 = vadd.f32 %v1450_v12, %v1210_v49  ;;  %v1515_v62 = vadd.f32 %v1451_v11, %v1211_v4  ;;  %v8081_v23 = vld [vmem:[#allocation38_spill] sm:$0xff] }
 0x2e8   : > { %v3752_v9 = vpack.c.bf16 %v3105_v37, %v3104_v10  ;;  %vm396_vm2 = vcmp.eq.s32.totalorder %v4988_v16, %v8079_v50  ;;  %v3756_v59 = vpack.c.bf16 %v3107_v2, %v3106_v3  ;;  %vm397_vm8 = vcmp.eq.s32.totalorder %v4996_v14, %v8079_v50  ;;  %v3112_v37 = vld [vmem:[#allocation2 + $0x50] sm:$0xff] }
 0x2e9   : > { %3956 = vset.pattern.permute.xlu1 %v7924_v30  ;;  %v1512_v30 = vadd.f32 %v1448_v55, %v1208_v31  ;;  %vm398_vm9 = vcmp.eq.s32.totalorder %v4999_v5, %v8079_v50  ;;  %vm399_vm4 = vcmp.eq.s32.totalorder %v5002_v24, %v8079_v50  ;;  %v540_v54 = vsel %vm396_vm2, %v8080_v32, 0.0 }
 0x2ea   : > { %1882 = vperm.xlu1 %3956, %v7031_v28   ;;  %3753 = vmatprep.subr.bf16.mxu0 %v3752_v9  ;;  %vm716_vm15 = vcmp.eq.s32.totalorder %v4988_v16, %v8081_v23  ;;  %vm717_vm14 = vcmp.eq.s32.totalorder %v4996_v14, %v8081_v23  ;;  %v541_v42 = vsel %vm397_vm8, %v8080_v32, 0.0  ;;  %vm718_vm12 = vcmp.eq.s32.totalorder %v4999_v5, %v8081_v23 }
 0x2eb   : > { %3781 = vmatprep.subr.bf16.mxu1 %v3752_v9  ;;  %3755 = vmatpush3.bf16.msra.mxu0 %v3752_v9  ;;  %v844_v1 = vsel %vm716_vm15, %v8082_v6, 0.0  ;;  %v845_v39 = vsel %vm717_vm14, %v8082_v6, 0.0  ;;  %v542_v18 = vsel %vm398_vm9, %v8080_v32, 0.0  ;;  %vm719_vm13 = vcmp.eq.s32.totalorder %v5002_v24, %v8081_v23 }
 0x2ec   : > { %v1690_v51 = vpop.permute.xlu1 %1689  ;;  %3757 = vmatprep.subr.bf16.mxu0 %v3756_v59  ;;  %3789 = vmatpush3.bf16.msra.mxu1 %v3752_v9  ;;  %v846_v52 = vsel %vm718_vm12, %v8082_v6, 0.0  ;;  %v847_v31 = vsel %vm719_vm13, %v8082_v6, 0.0  ;;  %v7088_v57 = vadd.f32 %v844_v1, %v540_v54  ;;  %v7090_v49 = vadd.f32 %v845_v39, %v541_v42 }
 0x2ed   : > { %v1752_v7 = vsel %vm1624_vm3, %v1690_v51, 0.0  ;;  %v1753_v47 = vsel %vm1625_vm0, %v1690_v51, 0.0  ;;  %v1754_v56 = vsel %vm1626_vm6, %v1690_v51, 0.0  ;;  %v1755_v25 = vsel %vm1627_vm7, %v1690_v51, 0.0  ;;  %3782 = vmatprep.subr.bf16.mxu1 %v3756_v59 }
 0x2ee   : > { %v7046_v38 = vadd.f32 %v1752_v7, %v1512_v30  ;;  %v7048_v45 = vadd.f32 %v1753_v47, %v1513_v46  ;;  %v7050_v29 = vadd.f32 %v1754_v56, %v1514_v20  ;;  %v7052_v33 = vadd.f32 %v1755_v25, %v1515_v62  ;;  %3957 = vset.pattern.permute.xlu1 %v7915_v58  ;;  %v8083_v46 = vld [vmem:[#allocation67_spill] sm:$0xff] }
 0x2ef   : > { %2487 = vperm.xlu1 %3957, %v6891_v35   ;;  %v3109_v35 = vld [vmem:[#allocation2 + $0x38] sm:$0xff]  ;;  %3759 = vmatpush3.bf16.msra.mxu0 %v3756_v59  ;;  %vm1924_vm5 = vcmp.eq.s32.totalorder %v4988_v16, %v6906_v34  ;;  %vm1925_vm1 = vcmp.eq.s32.totalorder %v4996_v14, %v6906_v34  ;;  %vm1926_vm10 = vcmp.eq.s32.totalorder %v4999_v5, %v6906_v34 }
 0x2f0   : > { %v3760_v41 = vpack.c.bf16 %v3109_v35, %v3108_v22  ;;  %vm1927_vm11 = vcmp.eq.s32.totalorder %v5002_v24, %v6906_v34  ;;  %v2052_v4 = vsel %vm1924_vm5, %v6958_v8, 0.0  ;;  %vm2228_vm3 = vcmp.eq.s32.totalorder %v4988_v16, %v7002_v15  ;;  %v3111_v34 = vld [vmem:[#allocation2 + $0x48] sm:$0xff]  ;;  %3790 = vmatpush3.bf16.msra.mxu1 %v3756_v59  ;;  %v3113_v7 = vld [vmem:[#allocation2 + $0x58] sm:$0xff]  ;;  %v3114_v35 = vld [vmem:[#allocation2 + $0x60] sm:$0xff] }
 0x2f1   : > { %v7060_v21 = vpop.permute.xlu1 %1870  ;;  %vm2229_vm0 = vcmp.eq.s32.totalorder %v4996_v14, %v7002_v15  ;;  %vm2230_vm6 = vcmp.eq.s32.totalorder %v4999_v5, %v7002_v15  ;;  %vm2231_vm7 = vcmp.eq.s32.totalorder %v5002_v24, %v7002_v15  ;;  %v2053_v55 = vsel %vm1925_vm1, %v6958_v8, 0.0 }
 0x2f2   : > { %3761 = vmatprep.subr.bf16.mxu0 %v3760_v41  ;;  %v2054_v60 = vsel %vm1926_vm10, %v6958_v8, 0.0  ;;  %v2055_v12 = vsel %vm1927_vm11, %v6958_v8, 0.0  ;;  %v3764_v11 = vpack.c.bf16 %v3111_v34, %v3110_v61  ;;  %3783 = vmatprep.subr.bf16.mxu1 %v3760_v41  ;;  %v7114_v19 = vadd.f32 %v846_v52, %v542_v18 }
 0x2f3   : > { %2613 = vperm.xlu1 %3957, %v6863_v0   ;;  %v543_v0 = vsel %vm399_vm4, %v8080_v32, 0.0  ;;  %3763 = vmatpush3.bf16.msra.mxu0 %v3760_v41  ;;  %vm1020_vm2 = vcmp.eq.s32.totalorder %v4988_v16, %v8083_v46  ;;  %vm1021_vm8 = vcmp.eq.s32.totalorder %v4996_v14, %v8083_v46  ;;  %v2116_v47 = vadd.f32 %v2052_v4, %v6894_v43  ;;  %v3115_v32 = vld [vmem:[#allocation2 + $0x68] sm:$0xff] }
 0x2f4   : > { %v7116_v30 = vadd.f32 %v847_v31, %v543_v0  ;;  %3765 = vmatprep.subr.bf16.mxu0 %v3764_v11  ;;  %v2117_v56 = vadd.f32 %v2053_v55, %v6896_v53  ;;  %v2118_v25 = vadd.f32 %v2054_v60, %v6898_v13  ;;  %v2119_v9 = vadd.f32 %v2055_v12, %v6900_v63 }
 0x2f5   : > { %vm1022_vm9 = vcmp.eq.s32.totalorder %v4999_v5, %v8083_v46  ;;  %vm1023_vm4 = vcmp.eq.s32.totalorder %v5002_v24, %v8083_v46  ;;  %v7150_v43 = vpack.c.bf16 %v3113_v7, %v3112_v37  ;;  %3791 = vmatpush3.bf16.msra.mxu1 %v3760_v41  ;;  %v8085_v41 = vld [vmem:[#allocation96_spill] sm:$0xff]  ;;  %v3772_v52 = vpack.c.bf16 %v3115_v32, %v3114_v35 }
 0x2f6   : > { %v7085_v40 = vpop.permute.xlu1 %2475  ;;  %3784 = vmatprep.subr.bf16.mxu1 %v3764_v11  ;;  %vm1324_vm5 = vcmp.eq.s32.totalorder %v4988_v16, %v8085_v41  ;;  %vm1325_vm1 = vcmp.eq.s32.totalorder %v4996_v14, %v8085_v41  ;;  %vm1326_vm10 = vcmp.eq.s32.totalorder %v4999_v5, %v8085_v41  ;;  %vm1327_vm11 = vcmp.eq.s32.totalorder %v5002_v24, %v8085_v41 }
 0x2f7   : > { %3959 = vset.pattern.permute.xlu1 %v7907_v44  ;;  %v2294_v44 = vpop.permute.xlu0 %2293  ;;  %3767 = vmatpush3.bf16.msra.mxu0 %v3764_v11  ;;  %vm2532_vm15 = vcmp.eq.s32.totalorder %v4988_v16, %v7085_v40  ;;  %vm2533_vm14 = vcmp.eq.s32.totalorder %v4996_v14, %v7085_v40  ;;  %vm2534_vm12 = vcmp.eq.s32.totalorder %v4999_v5, %v7085_v40 }
 0x2f8   : > { %2186 = vperm.xlu1 %3959, %v7031_v28   ;;  %v2356_v62 = vsel %vm2228_vm3, %v2294_v44, 0.0  ;;  %v2357_v8 = vsel %vm2229_vm0, %v2294_v44, 0.0  ;;  %v2358_v51 = vsel %vm2230_vm6, %v2294_v44, 0.0  ;;  %v2359_v10 = vsel %vm2231_vm7, %v2294_v44, 0.0  ;;  %3769 = vmatprep.subr.bf16.mxu0 %v7150_v43  ;;  %v8086_v44 = vld [vmem:[#allocation109_spill] sm:$0xff] }
 0x2f9   : > { %v2421_v53 = vadd.f32 %v2357_v8, %v2117_v56  ;;  %v2423_v13 = vadd.f32 %v2359_v10, %v2119_v9  ;;  %v2420_v63 = vadd.f32 %v2356_v62, %v2116_v47  ;;  %v2422_v3 = vadd.f32 %v2358_v51, %v2118_v25  ;;  %3792 = vmatpush3.bf16.msra.mxu1 %v3764_v11  ;;  %v3116_v51 = vld [vmem:[#allocation2 + $0x70] sm:$0xff]  ;;  %v3117_v10 = vld [vmem:[#allocation2 + $0x78] sm:$0xff] }
 0x2fa   : > { %vm2535_vm13 = vcmp.eq.s32.totalorder %v5002_v24, %v7085_v40  ;;  %v1452_v61 = vsel %vm1324_vm5, %v8086_v44, 0.0  ;;  %v1453_v34 = vsel %vm1325_vm1, %v8086_v44, 0.0  ;;  %v1454_v46 = vsel %vm1326_vm10, %v8086_v44, 0.0  ;;  %3785 = vmatprep.subr.bf16.mxu1 %v7150_v43 }
 0x2fb   : > { %v7122_v20 = vpop.permute.xlu1 %1993  ;;  %3771 = vmatpush3.bf16.msra.mxu0 %v7150_v43  ;;  %v1455_v62 = vsel %vm1327_vm11, %v8086_v44, 0.0  ;;  %vm1931_vm5 = vcmp.eq.s32.totalorder %v5002_v24, %v7060_v21 }
 0x2fc   : > { %3960 = vset.pattern.permute.xlu1 %v7915_v58  ;;  %v8084_v58 = vld [vmem:[#allocation81_spill] sm:$0xff]  ;;  %3773 = vmatprep.subr.bf16.mxu0 %v3772_v52 }
 0x2fd   : > { %2490 = vperm.xlu1 %3960, %v7031_v28   ;;  %v1148_v15 = vsel %vm1020_vm2, %v8084_v58, 0.0  ;;  %v1149_v39 = vsel %vm1021_vm8, %v8084_v58, 0.0  ;;  %v1151_v40 = vsel %vm1023_vm4, %v8084_v58, 0.0  ;;  %3793 = vmatpush3.bf16.msra.mxu1 %v7150_v43 }
 0x2fe   : > { %v1212_v12 = vadd.f32 %v1148_v15, %v7088_v57  ;;  %v1213_v11 = vadd.f32 %v1149_v39, %v7090_v49  ;;  %v1215_v7 = vadd.f32 %v1151_v40, %v7116_v30  ;;  %3786 = vmatprep.subr.bf16.mxu1 %v3772_v52 }
 0x2ff   : > { %3775 = vmatpush3.bf16.msra.mxu0 %v3772_v52 }
 0x300   : > { %v2598_v28 = vpop.permute.xlu1 %2597  ;;  %v1516_v57 = vadd.f32 %v1452_v61, %v1212_v12  ;;  %v1517_v49 = vadd.f32 %v1453_v34, %v1213_v11  ;;  %v8090_v61 = vld [vmem:[#allocation39_spill] sm:$0xff]  ;;  %v2298_v34 = vpop.permute.xlu0 %2297 }
 0x301   : > { %2617 = vperm.xlu1 %3960, %v6993_v27   ;;  %v2661_v2 = vsel %vm2533_vm14, %v2598_v28, 0.0  ;;  %v2663_v50 = vsel %vm2535_vm13, %v2598_v28, 0.0  ;;  %v2660_v59 = vsel %vm2532_vm15, %v2598_v28, 0.0  ;;  %v2662_v22 = vsel %vm2534_vm12, %v2598_v28, 0.0  ;;  %3794 = vmatpush3.bf16.msra.mxu1 %v3772_v52 }
 0x302   : > { %v2725_v23 = vadd.f32 %v2661_v2, %v2421_v53  ;;  %v2727_v42 = vadd.f32 %v2663_v50, %v2423_v13  ;;  %v2724_v6 = vadd.f32 %v2660_v59, %v2420_v63  ;;  %v2726_v1 = vadd.f32 %v2662_v22, %v2422_v3 }
 0x303   : > { %v3471_v54 = vpop.f32.mrb[2].mxu0  ;;  %v1150_v27 = vsel %vm1022_vm9, %v8084_v58, 0.0  ;;  %v3551_v18 = vpop.f32.mrb[2].mxu1  ;;  %v1519_v53 = vadd.f32 %v1455_v62, %v1215_v7  ;;  %v3776_v63 = vpack.c.bf16 %v3117_v10, %v3116_v51  ;;  %vm720_vm15 = vcmp.eq.s32.totalorder %v4988_v16, %v8090_v61 }
 0x304   : > { %v3472_v0 = vpop.f32.mrb[3].mxu0  ;;  %2926 = vmatprep.mubr.f32.mxu0 %v2725_v23  ;;  %v3552_v4 = vpop.f32.mrb[3].mxu1  ;;  %3071 = vmatprep.mubr.f32.mxu1 %v2727_v42  ;;  %v1214_v37 = vadd.f32 %v1150_v27, %v7114_v19  ;;  %v8087_v19 = vld [vmem:[#allocation44_spill] sm:$0xff]  ;;  %vm1928_vm14 = vcmp.eq.s32.totalorder %v4988_v16, %v7060_v21  ;;  %vm1929_vm12 = vcmp.eq.s32.totalorder %v4996_v14, %v7060_v21 }
 0x305   : > { %v3473_v31 = vadd.f32 %v3472_v0, %v3471_v54  ;;  %v3553_v55 = vadd.f32 %v3552_v4, %v3551_v18  ;;  %v7185_v60 = vpop.permute.xlu1 %2174  ;;  %2927 = vmatmul.mubr.f32.gmra.mrb[20].mxu0 %v2724_v6  ;;  %3072 = vmatmul.mubr.f32.gmra.mrb[20].mxu1 %v2726_v1  ;;  %vm1628_vm3 = vcmp.eq.s32.totalorder %v4988_v16, %v8087_v19  ;;  %v8088_v18 = vld [vmem:[#allocation14_spill] sm:$0xff]  ;;  %v8089_v0 = vld [vmem:[#allocation24_spill] sm:$0xff]  ;;  %v2057_v12 = vsel %vm1929_vm12, %v7122_v20, 0.0 }
 0x306   : > { %v1518_v15 = vadd.f32 %v1454_v46, %v1214_v37  ;;  %vm1629_vm0 = vcmp.eq.s32.totalorder %v4996_v14, %v8087_v19  ;;  %vm1630_vm6 = vcmp.eq.s32.totalorder %v4999_v5, %v8087_v19  ;;  %vm1631_vm7 = vcmp.eq.s32.totalorder %v5002_v24, %v8087_v19  ;;  %3777 = vmatprep.subr.bf16.mxu0 %v3776_v63  ;;  %v8091_v46 = vld [vmem:[#allocation54_spill] sm:$0xff] }
 0x307   : > { %v3474_v8 = vpop.f32.mrb[4].mxu0  ;;  %v7193_v47 = vadd.f32 %v3553_v55, %v3473_v31  ;;  %3779 = vmatpush3.bf16.msra.mxu0 %v3776_v63  ;;  %3787 = vmatprep.subr.bf16.mxu1 %v3776_v63  ;;  %vm400_vm2 = vcmp.eq.s32.totalorder %v4988_v16, %v8088_v18  ;;  %vm401_vm8 = vcmp.eq.s32.totalorder %v4996_v14, %v8088_v18  ;;  %v2056_v55 = vsel %vm1928_vm14, %v7122_v20, 0.0 }
 0x308   : > { %v3554_v56 = vpop.f32.mrb[4].mxu1  ;;  %v3475_v25 = vpop.f32.mrb[5].mxu0  ;;  %3795 = vmatpush3.bf16.msra.mxu1 %v3776_v63  ;;  %vm402_vm9 = vcmp.eq.s32.totalorder %v4999_v5, %v8088_v18  ;;  %vm403_vm4 = vcmp.eq.s32.totalorder %v5002_v24, %v8088_v18  ;;  %v544_v52 = vsel %vm400_vm2, %v8089_v0, 0.0  ;;  %v545_v31 = vsel %vm401_vm8, %v8089_v0, 0.0 }
 0x309   : > { %v3476_v9 = vadd.f32 %v3475_v25, %v3474_v8  ;;  %v3555_v58 = vpop.f32.mrb[5].mxu1  ;;  %v546_v4 = vsel %vm402_vm9, %v8089_v0, 0.0  ;;  %v547_v44 = vsel %vm403_vm4, %v8089_v0, 0.0  ;;  %vm1930_vm13 = vcmp.eq.s32.totalorder %v4999_v5, %v7060_v21 }
 0x30a   : > { %v3556_v13 = vadd.f32 %v3555_v58, %v3554_v56  ;;  %v1694_v30 = vpop.permute.xlu1 %1693  ;;  %vm2232_vm1 = vcmp.eq.s32.totalorder %v4988_v16, %v7185_v60  ;;  %vm2233_vm10 = vcmp.eq.s32.totalorder %v4996_v14, %v7185_v60  ;;  %vm2234_vm11 = vcmp.eq.s32.totalorder %v4999_v5, %v7185_v60  ;;  %v8092_v58 = vld [vmem:[#allocation70_spill] sm:$0xff] }
 0x30b   : > { %v1756_v43 = vsel %vm1628_vm3, %v1694_v30, 0.0  ;;  %v1757_v28 = vsel %vm1629_vm0, %v1694_v30, 0.0  ;;  %v1758_v2 = vsel %vm1630_vm6, %v1694_v30, 0.0  ;;  %v1759_v50 = vsel %vm1631_vm7, %v1694_v30, 0.0 }
 0x30c   : > { %v7205_v3 = vadd.f32 %v3556_v13, %v3476_v9  ;;  %v7207_v59 = vadd.f32 %v1756_v43, %v1516_v57  ;;  %v7209_v22 = vadd.f32 %v1757_v28, %v1517_v49  ;;  %v7211_v35 = vadd.f32 %v1758_v2, %v1518_v15  ;;  %v3477_v32 = vpop.f32.mrb[6].mxu0 }
 0x30d   : > { %v3557_v54 = vpop.f32.mrb[6].mxu1  ;;  %v7213_v23 = vadd.f32 %v1759_v50, %v1519_v53  ;;  %v3478_v42 = vpop.f32.mrb[7].mxu0  ;;  %vm2235_vm3 = vcmp.eq.s32.totalorder %v5002_v24, %v7185_v60  ;;  %v2058_v11 = vsel %vm1930_vm13, %v7122_v20, 0.0  ;;  %v2059_v21 = vsel %vm1931_vm5, %v7122_v20, 0.0  ;;  %v8093_v50 = vld [vmem:[#allocation84_spill] sm:$0xff] }
 0x30e   : > { %v3558_v6 = vpop.f32.mrb[7].mxu1  ;;  %v3479_v1 = vadd.f32 %v3478_v42, %v3477_v32  ;;  %vm721_vm0 = vcmp.eq.s32.totalorder %v4996_v14, %v8090_v61  ;;  %vm722_vm6 = vcmp.eq.s32.totalorder %v4999_v5, %v8090_v61  ;;  %vm723_vm7 = vcmp.eq.s32.totalorder %v5002_v24, %v8090_v61 }
 0x30f   : > { %v3559_v39 = vadd.f32 %v3558_v6, %v3557_v54  ;;  %v7215_v27 = vpop.permute.xlu1 %1873  ;;  %v848_v60 = vsel %vm720_vm15, %v8091_v46, 0.0  ;;  %v2360_v8 = vsel %vm2232_vm1, %v2298_v34, 0.0  ;;  %v2361_v51 = vsel %vm2233_vm10, %v2298_v34, 0.0 }
 0x310   : > { %v2362_v10 = vsel %vm2234_vm11, %v2298_v34, 0.0  ;;  %v2363_v20 = vsel %vm2235_vm3, %v2298_v34, 0.0  ;;  %v2120_v37 = vadd.f32 %v2056_v55, %v7046_v38  ;;  %v2121_v7 = vadd.f32 %v2057_v12, %v7048_v45 }
 0x311   : > { %v7217_v41 = vadd.f32 %v3559_v39, %v3479_v1  ;;  %v2122_v56 = vadd.f32 %v2058_v11, %v7050_v29  ;;  %v2123_v25 = vadd.f32 %v2059_v21, %v7052_v33  ;;  %v849_v57 = vsel %vm721_vm0, %v8091_v46, 0.0 }
 0x312   : > { %v850_v49 = vsel %vm722_vm6, %v8091_v46, 0.0  ;;  %v851_v9 = vsel %vm723_vm7, %v8091_v46, 0.0  ;;  %vm1024_vm2 = vcmp.eq.s32.totalorder %v4988_v16, %v8092_v58  ;;  %v2425_v15 = vadd.f32 %v2361_v51, %v2121_v7 }
 0x313   : > { %v2427_v53 = vadd.f32 %v2363_v20, %v2123_v25  ;;  %v2424_v13 = vadd.f32 %v2360_v8, %v2120_v37  ;;  %v2426_v63 = vadd.f32 %v2362_v10, %v2122_v56  ;;  %vm1025_vm14 = vcmp.eq.s32.totalorder %v4996_v14, %v8092_v58  ;;  %v8095_v20 = vld [vmem:[#allocation112_spill] sm:$0xff]  ;;  %v8097_v37 = vld [vmem:[#allocation114_spill] sm:$0xff]  ;;  %v8098_v56 = vld [vmem:[#allocation45_spill] sm:$0xff] }
 0x314   : > { %v2479_v40 = vpop.permute.xlu1 %2478  ;;  %vm1026_vm12 = vcmp.eq.s32.totalorder %v4999_v5, %v8092_v58  ;;  %vm1027_vm13 = vcmp.eq.s32.totalorder %v5002_v24, %v8092_v58  ;;  %v1152_v32 = vsel %vm1024_vm2, %v8093_v50, 0.0  ;;  %v912_v54 = vadd.f32 %v848_v60, %v544_v52  ;;  %v8094_v60 = vld [vmem:[#allocation111_spill] sm:$0xff] }
 0x315   : > { %vm2536_vm8 = vcmp.eq.s32.totalorder %v4988_v16, %v2479_v40  ;;  %vm2537_vm9 = vcmp.eq.s32.totalorder %v4996_v14, %v2479_v40  ;;  %vm2538_vm4 = vcmp.eq.s32.totalorder %v4999_v5, %v2479_v40  ;;  %vm2539_vm15 = vcmp.eq.s32.totalorder %v5002_v24, %v2479_v40 }
 0x316   : > { %v1153_v42 = vsel %vm1025_vm14, %v8093_v50, 0.0  ;;  %v1154_v6 = vsel %vm1026_vm12, %v8093_v50, 0.0  ;;  %v1155_v1 = vsel %vm1027_vm13, %v8093_v50, 0.0  ;;  %v913_v39 = vadd.f32 %v849_v57, %v545_v31 }
 0x317   : > { %v914_v18 = vadd.f32 %v850_v49, %v546_v4  ;;  %v915_v0 = vadd.f32 %v851_v9, %v547_v44  ;;  %v1216_v34 = vadd.f32 %v1152_v32, %v912_v54  ;;  %v8096_v4 = vld [vmem:[#allocation113_spill] sm:$0xff]  ;;  %vm1632_vm5 = vcmp.eq.s32.totalorder %v4988_v16, %v8098_v56  ;;  %v8102_v32 = vld [vmem:[#allocation55_spill] sm:$0xff] }
 0x318   : > { %v1217_v52 = vadd.f32 %v1153_v42, %v913_v39  ;;  %vm1633_vm1 = vcmp.eq.s32.totalorder %v4996_v14, %v8098_v56  ;;  %vm1634_vm10 = vcmp.eq.s32.totalorder %v4999_v5, %v8098_v56  ;;  %vm1635_vm11 = vcmp.eq.s32.totalorder %v5002_v24, %v8098_v56  ;;  %v2302_v42 = vpop.permute.xlu0 %2301 }
 0x319   : > { %v7263_v62 = vpop.permute.xlu1 %1997  ;;  %v1218_v11 = vadd.f32 %v1154_v6, %v914_v18  ;;  %v1219_v21 = vadd.f32 %v1155_v1, %v915_v0  ;;  %v1520_v8 = vadd.f32 %v8094_v60, %v1216_v34  ;;  %vm1933_vm14 = vcmp.eq.s32.totalorder %v4996_v14, %v7215_v27 }
 0x31a   : > { %v1521_v31 = vadd.f32 %v8095_v20, %v1217_v52  ;;  %vm1934_vm12 = vcmp.eq.s32.totalorder %v4999_v5, %v7215_v27  ;;  %vm1935_vm13 = vcmp.eq.s32.totalorder %v5002_v24, %v7215_v27  ;;  %v2061_v1 = vsel %vm1933_vm14, %v7263_v62, 0.0 }
 0x31b   : > { %v1522_v44 = vadd.f32 %v8096_v4, %v1218_v11  ;;  %v1523_v7 = vadd.f32 %v8097_v37, %v1219_v21  ;;  %v2062_v39 = vsel %vm1934_vm12, %v7263_v62, 0.0  ;;  %v2125_v21 = vadd.f32 %v2061_v1, %v7209_v22 }
 0x31e   : > { %v2602_v38 = vpop.permute.xlu1 %2601 }
 0x31f   : > { %v2665_v45 = vsel %vm2537_vm9, %v2602_v38, 0.0  ;;  %v2667_v29 = vsel %vm2539_vm15, %v2602_v38, 0.0  ;;  %v2664_v33 = vsel %vm2536_vm8, %v2602_v38, 0.0  ;;  %v2666_v19 = vsel %vm2538_vm4, %v2602_v38, 0.0  ;;  %v3480_v61 = vpop.f32.mrb[8].mxu0  ;;  %v3560_v55 = vpop.f32.mrb[8].mxu1 }
 0x320   : > { %v2729_v30 = vadd.f32 %v2665_v45, %v2425_v15  ;;  %v2731_v43 = vadd.f32 %v2667_v29, %v2427_v53  ;;  %v2728_v28 = vadd.f32 %v2664_v33, %v2424_v13  ;;  %v2730_v2 = vadd.f32 %v2666_v19, %v2426_v63  ;;  %v3481_v12 = vpop.f32.mrb[9].mxu0  ;;  %v3561_v46 = vpop.f32.mrb[9].mxu1  ;;  %v8099_v29 = vld [vmem:[#allocation17_spill] sm:$0xff]  ;;  %v8100_v33 = vld [vmem:[#allocation27_spill] sm:$0xff] }
 0x321   : > { %v3482_v51 = vadd.f32 %v3481_v12, %v3480_v61  ;;  %v3562_v10 = vadd.f32 %v3561_v46, %v3560_v55  ;;  %vm404_vm3 = vcmp.eq.s32.totalorder %v4988_v16, %v8099_v29  ;;  %vm405_vm0 = vcmp.eq.s32.totalorder %v4996_v14, %v8099_v29 }
 0x322   : > { %2931 = vmatprep.mubr.f32.mxu0 %v2729_v30  ;;  %3076 = vmatprep.mubr.f32.mxu1 %v2731_v43  ;;  %vm406_vm6 = vcmp.eq.s32.totalorder %v4999_v5, %v8099_v29  ;;  %vm407_vm7 = vcmp.eq.s32.totalorder %v5002_v24, %v8099_v29  ;;  %v548_v19 = vsel %vm404_vm3, %v8100_v33, 0.0  ;;  %v549_v30 = vsel %vm405_vm0, %v8100_v33, 0.0 }
 0x323   : > { %v7291_v40 = vpop.permute.xlu1 %2177  ;;  %2932 = vmatmul.mubr.f32.gmra.mrb[22].mxu0 %v2728_v28  ;;  %3077 = vmatmul.mubr.f32.gmra.mrb[22].mxu1 %v2730_v2  ;;  %v7305_v25 = vadd.f32 %v3562_v10, %v3482_v51  ;;  %v550_v43 = vsel %vm406_vm6, %v8100_v33, 0.0  ;;  %v551_v28 = vsel %vm407_vm7, %v8100_v33, 0.0  ;;  %v8101_v2 = vld [vmem:[#allocation40_spill] sm:$0xff]  ;;  %vm1932_vm15 = vcmp.eq.s32.totalorder %v4988_v16, %v7215_v27 }
 0x324   : > { %vm724_vm2 = vcmp.eq.s32.totalorder %v4988_v16, %v8101_v2  ;;  %vm725_vm8 = vcmp.eq.s32.totalorder %v4996_v14, %v8101_v2  ;;  %vm726_vm9 = vcmp.eq.s32.totalorder %v4999_v5, %v8101_v2  ;;  %vm727_vm4 = vcmp.eq.s32.totalorder %v5002_v24, %v8101_v2 }
 0x325   : > { %v852_v54 = vsel %vm724_vm2, %v8102_v32, 0.0  ;;  %v2060_v6 = vsel %vm1932_vm15, %v7263_v62, 0.0  ;;  %v2063_v27 = vsel %vm1935_vm13, %v7263_v62, 0.0  ;;  %v853_v18 = vsel %vm725_vm8, %v8102_v32, 0.0 }
 0x326   : > { %v854_v0 = vsel %vm726_vm9, %v8102_v32, 0.0  ;;  %v916_v61 = vadd.f32 %v852_v54, %v548_v19  ;;  %v2124_v11 = vadd.f32 %v2060_v6, %v7207_v59  ;;  %v2126_v46 = vadd.f32 %v2062_v39, %v7211_v35 }
 0x327   : > { %v2127_v60 = vadd.f32 %v2063_v27, %v7213_v23 }
 0x328   : > { %v1698_v57 = vpop.permute.xlu1 %1697 }
 0x329   : > { %v1760_v49 = vsel %vm1632_vm5, %v1698_v57, 0.0  ;;  %v1761_v9 = vsel %vm1633_vm1, %v1698_v57, 0.0  ;;  %v1762_v58 = vsel %vm1634_vm10, %v1698_v57, 0.0  ;;  %v1763_v15 = vsel %vm1635_vm11, %v1698_v57, 0.0 }
 0x32a   : > { %v7307_v53 = vadd.f32 %v1760_v49, %v1520_v8  ;;  %v7309_v13 = vadd.f32 %v1761_v9, %v1521_v31  ;;  %v7311_v63 = vadd.f32 %v1762_v58, %v1522_v44  ;;  %v7313_v38 = vadd.f32 %v1763_v15, %v1523_v7  ;;  %v8103_v8 = vld [vmem:[#allocation69_spill] sm:$0xff]  ;;  %v8104_v58 = vld [vmem:[#allocation83_spill] sm:$0xff] }
 0x32b   : > { %vm2236_vm5 = vcmp.eq.s32.totalorder %v4988_v16, %v7291_v40  ;;  %vm2237_vm1 = vcmp.eq.s32.totalorder %v4996_v14, %v7291_v40  ;;  %vm2238_vm10 = vcmp.eq.s32.totalorder %v4999_v5, %v7291_v40  ;;  %vm2239_vm11 = vcmp.eq.s32.totalorder %v5002_v24, %v7291_v40 }
 0x32c   : > { %v855_v40 = vsel %vm727_vm4, %v8102_v32, 0.0  ;;  %v2364_v55 = vsel %vm2236_vm5, %v2302_v42, 0.0  ;;  %v2365_v62 = vsel %vm2237_vm1, %v2302_v42, 0.0  ;;  %v2366_v12 = vsel %vm2238_vm10, %v2302_v42, 0.0 }
 0x32d   : > { %v7315_v45 = vpop.permute.xlu1 %1876  ;;  %v2367_v52 = vsel %vm2239_vm11, %v2302_v42, 0.0  ;;  %vm1028_vm3 = vcmp.eq.s32.totalorder %v4988_v16, %v8103_v8  ;;  %vm1029_vm0 = vcmp.eq.s32.totalorder %v4996_v14, %v8103_v8  ;;  %vm1030_vm6 = vcmp.eq.s32.totalorder %v4999_v5, %v8103_v8 }
 0x32e   : > { %vm1031_vm7 = vcmp.eq.s32.totalorder %v5002_v24, %v8103_v8  ;;  %v2429_v51 = vadd.f32 %v2365_v62, %v2125_v21  ;;  %v2431_v59 = vadd.f32 %v2367_v52, %v2127_v60  ;;  %v2428_v10 = vadd.f32 %v2364_v55, %v2124_v11 }
 0x32f   : > { %v2430_v22 = vadd.f32 %v2366_v12, %v2126_v46  ;;  %v917_v57 = vadd.f32 %v853_v18, %v549_v30  ;;  %v918_v49 = vadd.f32 %v854_v0, %v550_v43  ;;  %v919_v9 = vadd.f32 %v855_v40, %v551_v28  ;;  %v8105_v30 = vld [vmem:[#allocation97_spill] sm:$0xff]  ;;  %v8106_v43 = vld [vmem:[#allocation115_spill] sm:$0xff] }
 0x330   : > { %v1156_v15 = vsel %vm1028_vm3, %v8104_v58, 0.0  ;;  %v1157_v29 = vsel %vm1029_vm0, %v8104_v58, 0.0  ;;  %v1158_v33 = vsel %vm1030_vm6, %v8104_v58, 0.0  ;;  %v1159_v19 = vsel %vm1031_vm7, %v8104_v58, 0.0 }
 0x331   : > { %vm1332_vm15 = vcmp.eq.s32.totalorder %v4988_v16, %v8105_v30  ;;  %vm1333_vm14 = vcmp.eq.s32.totalorder %v4996_v14, %v8105_v30  ;;  %vm1334_vm12 = vcmp.eq.s32.totalorder %v4999_v5, %v8105_v30  ;;  %vm1335_vm13 = vcmp.eq.s32.totalorder %v5002_v24, %v8105_v30 }
 0x332   : > { %v2482_v50 = vpop.permute.xlu1 %2481  ;;  %v1460_v28 = vsel %vm1332_vm15, %v8106_v43, 0.0  ;;  %v1220_v32 = vadd.f32 %v1156_v15, %v916_v61  ;;  %v1461_v54 = vsel %vm1333_vm14, %v8106_v43, 0.0  ;;  %v1462_v42 = vsel %vm1334_vm12, %v8106_v43, 0.0  ;;  %v8110_v15 = vld [vmem:[#allocation56_spill] sm:$0xff] }
 0x333   : > { %vm2540_vm2 = vcmp.eq.s32.totalorder %v4988_v16, %v2482_v50  ;;  %vm2541_vm8 = vcmp.eq.s32.totalorder %v4996_v14, %v2482_v50  ;;  %vm2542_vm9 = vcmp.eq.s32.totalorder %v4999_v5, %v2482_v50  ;;  %vm2543_vm4 = vcmp.eq.s32.totalorder %v5002_v24, %v2482_v50 }
 0x334   : > { %v1463_v6 = vsel %vm1335_vm13, %v8106_v43, 0.0  ;;  %v1221_v27 = vadd.f32 %v1157_v29, %v917_v57  ;;  %v1222_v18 = vadd.f32 %v1158_v33, %v918_v49  ;;  %v1223_v0 = vadd.f32 %v1159_v19, %v919_v9  ;;  %v8109_v57 = vld [vmem:[#allocation41_spill] sm:$0xff]  ;;  %v2306_v33 = vpop.permute.xlu0 %2305 }
 0x335   : > { %v1524_v55 = vadd.f32 %v1460_v28, %v1220_v32  ;;  %vm1636_vm5 = vcmp.eq.s32.totalorder %v4988_v16, %v5881_v26  ;;  %vm1637_vm1 = vcmp.eq.s32.totalorder %v4996_v14, %v5881_v26  ;;  %vm1638_vm10 = vcmp.eq.s32.totalorder %v4999_v5, %v5881_v26 }
 0x336   : > { %v1525_v52 = vadd.f32 %v1461_v54, %v1221_v27  ;;  %v1526_v11 = vadd.f32 %v1462_v42, %v1222_v18  ;;  %v1527_v21 = vadd.f32 %v1463_v6, %v1223_v0  ;;  %vm1639_vm11 = vcmp.eq.s32.totalorder %v5002_v24, %v5881_v26  ;;  %v8108_v26 = vld [vmem:[#allocation26_spill] sm:$0xff] }
 0x337   : > { %v7370_v34 = vpop.permute.xlu1 %2001  ;;  %vm1939_vm15 = vcmp.eq.s32.totalorder %v5002_v24, %v7315_v45 }
 0x33c   : > { %v2606_v35 = vpop.permute.xlu1 %2605  ;;  %v3563_v1 = vpop.f32.mrb[10].mxu1 }
 0x33d   : > { %v2669_v23 = vsel %vm2541_vm8, %v2606_v35, 0.0  ;;  %v2671_v20 = vsel %vm2543_vm4, %v2606_v35, 0.0  ;;  %v2668_v31 = vsel %vm2540_vm2, %v2606_v35, 0.0  ;;  %v2670_v4 = vsel %vm2542_vm9, %v2606_v35, 0.0  ;;  %v3483_v50 = vpop.f32.mrb[10].mxu0  ;;  %v3564_v40 = vpop.f32.mrb[11].mxu1 }
 0x33e   : > { %v2733_v44 = vadd.f32 %v2669_v23, %v2429_v51  ;;  %v2735_v37 = vadd.f32 %v2671_v20, %v2431_v59  ;;  %v2732_v7 = vadd.f32 %v2668_v31, %v2428_v10  ;;  %v2734_v56 = vadd.f32 %v2670_v4, %v2430_v22  ;;  %v3484_v39 = vpop.f32.mrb[11].mxu0  ;;  %v8107_v31 = vld [vmem:[#allocation16_spill] sm:$0xff] }
 0x33f   : > { %v3485_v62 = vadd.f32 %v3484_v39, %v3483_v50  ;;  %v3565_v12 = vadd.f32 %v3564_v40, %v3563_v1  ;;  %vm408_vm3 = vcmp.eq.s32.totalorder %v4988_v16, %v8107_v31  ;;  %vm409_vm0 = vcmp.eq.s32.totalorder %v4996_v14, %v8107_v31  ;;  %v8111_v39 = vld [vmem:[#allocation72_spill] sm:$0xff] }
 0x340   : > { %2936 = vmatprep.mubr.f32.mxu0 %v2733_v44  ;;  %3081 = vmatprep.mubr.f32.mxu1 %v2735_v37  ;;  %vm410_vm6 = vcmp.eq.s32.totalorder %v4999_v5, %v8107_v31  ;;  %vm411_vm7 = vcmp.eq.s32.totalorder %v5002_v24, %v8107_v31  ;;  %v552_v4 = vsel %vm408_vm3, %v8108_v26, 0.0  ;;  %v553_v37 = vsel %vm409_vm0, %v8108_v26, 0.0 }
 0x341   : > { %v7413_v2 = vpop.permute.xlu1 %2180  ;;  %2937 = vmatmul.mubr.f32.gmra.mrb[24].mxu0 %v2732_v7  ;;  %3082 = vmatmul.mubr.f32.gmra.mrb[24].mxu1 %v2734_v56  ;;  %v7426_v61 = vadd.f32 %v3565_v12, %v3485_v62  ;;  %v554_v7 = vsel %vm410_vm6, %v8108_v26, 0.0  ;;  %v555_v56 = vsel %vm411_vm7, %v8108_v26, 0.0  ;;  %vm728_vm2 = vcmp.eq.s32.totalorder %v4988_v16, %v8109_v57 }
 0x342   : > { %vm1936_vm8 = vcmp.eq.s32.totalorder %v4988_v16, %v7315_v45  ;;  %vm1937_vm9 = vcmp.eq.s32.totalorder %v4996_v14, %v7315_v45  ;;  %vm1938_vm4 = vcmp.eq.s32.totalorder %v4999_v5, %v7315_v45  ;;  %vm2240_vm14 = vcmp.eq.s32.totalorder %v4988_v16, %v7413_v2 }
 0x343   : > { %vm2241_vm12 = vcmp.eq.s32.totalorder %v4996_v14, %v7413_v2  ;;  %vm2242_vm13 = vcmp.eq.s32.totalorder %v4999_v5, %v7413_v2  ;;  %v2064_v49 = vsel %vm1936_vm8, %v7370_v34, 0.0  ;;  %v2065_v9 = vsel %vm1937_vm9, %v7370_v34, 0.0 }
 0x344   : > { %v2066_v58 = vsel %vm1938_vm4, %v7370_v34, 0.0  ;;  %v2067_v45 = vsel %vm1939_vm15, %v7370_v34, 0.0  ;;  %v856_v29 = vsel %vm728_vm2, %v8110_v15, 0.0  ;;  %v2368_v30 = vsel %vm2240_vm14, %v2306_v33, 0.0 }
 0x345   : > { %v2369_v43 = vsel %vm2241_vm12, %v2306_v33, 0.0  ;;  %v2370_v34 = vsel %vm2242_vm13, %v2306_v33, 0.0  ;;  %v2129_v50 = vadd.f32 %v2065_v9, %v7309_v13  ;;  %v2130_v32 = vadd.f32 %v2066_v58, %v7311_v63 }
 0x346   : > { %v1702_v46 = vpop.permute.xlu1 %1701  ;;  %v2131_v54 = vadd.f32 %v2067_v45, %v7313_v38  ;;  %vm1032_vm3 = vcmp.eq.s32.totalorder %v4988_v16, %v8111_v39  ;;  %vm1033_vm8 = vcmp.eq.s32.totalorder %v4996_v14, %v8111_v39  ;;  %vm1034_vm9 = vcmp.eq.s32.totalorder %v4999_v5, %v8111_v39 }
 0x347   : > { %v1764_v60 = vsel %vm1636_vm5, %v1702_v46, 0.0  ;;  %v1765_v8 = vsel %vm1637_vm1, %v1702_v46, 0.0  ;;  %v1766_v51 = vsel %vm1638_vm10, %v1702_v46, 0.0  ;;  %v1767_v59 = vsel %vm1639_vm11, %v1702_v46, 0.0 }
 0x348   : > { %v7428_v10 = vadd.f32 %v1764_v60, %v1524_v55  ;;  %v7430_v22 = vadd.f32 %v1765_v8, %v1525_v52  ;;  %v7432_v35 = vadd.f32 %v1766_v51, %v1526_v11  ;;  %v7434_v23 = vadd.f32 %v1767_v59, %v1527_v21  ;;  %v8112_v21 = vld [vmem:[#allocation85_spill] sm:$0xff] }
 0x349   : > { %vm2243_vm5 = vcmp.eq.s32.totalorder %v5002_v24, %v7413_v2  ;;  %vm729_vm1 = vcmp.eq.s32.totalorder %v4996_v14, %v8109_v57  ;;  %vm730_vm10 = vcmp.eq.s32.totalorder %v4999_v5, %v8109_v57  ;;  %vm731_vm11 = vcmp.eq.s32.totalorder %v5002_v24, %v8109_v57 }
 0x34a   : > { %v2371_v28 = vsel %vm2243_vm5, %v2306_v33, 0.0  ;;  %v2128_v2 = vadd.f32 %v2064_v49, %v7307_v53  ;;  %v857_v42 = vsel %vm729_vm1, %v8110_v15, 0.0  ;;  %v858_v6 = vsel %vm730_vm10, %v8110_v15, 0.0 }
 0x34b   : > { %v7436_v20 = vpop.permute.xlu1 %1879  ;;  %v859_v1 = vsel %vm731_vm11, %v8110_v15, 0.0  ;;  %v2433_v27 = vadd.f32 %v2369_v43, %v2129_v50  ;;  %v2435_v18 = vadd.f32 %v2371_v28, %v2131_v54  ;;  %v2434_v40 = vadd.f32 %v2370_v34, %v2130_v32 }
 0x34c   : > { %v2432_v0 = vadd.f32 %v2368_v30, %v2128_v2  ;;  %vm1035_vm4 = vcmp.eq.s32.totalorder %v5002_v24, %v8111_v39  ;;  %v1160_v46 = vsel %vm1032_vm3, %v8112_v21, 0.0  ;;  %v920_v60 = vadd.f32 %v856_v29, %v552_v4  ;;  %v8113_v30 = vld [vmem:[#allocation71_spill] sm:$0xff]  ;;  %v8114_v2 = vld [vmem:[#allocation117_spill] sm:$0xff] }
 0x34d   : > { %v1161_v8 = vsel %vm1033_vm8, %v8112_v21, 0.0  ;;  %v1162_v51 = vsel %vm1034_vm9, %v8112_v21, 0.0  ;;  %v1163_v59 = vsel %vm1035_vm4, %v8112_v21, 0.0  ;;  %v921_v31 = vadd.f32 %v857_v42, %v553_v37  ;;  %v8115_v37 = vld [vmem:[#allocation118_spill] sm:$0xff] }
 0x34e   : > { %v922_v26 = vadd.f32 %v858_v6, %v554_v7  ;;  %v1224_v9 = vadd.f32 %v1160_v46, %v920_v60  ;;  %vm1640_vm15 = vcmp.eq.s32.totalorder %v4988_v16, %v5918_v48  ;;  %vm1641_vm14 = vcmp.eq.s32.totalorder %v4996_v14, %v5918_v48 }
 0x34f   : > { %v1225_v15 = vadd.f32 %v1161_v8, %v921_v31  ;;  %vm1642_vm12 = vcmp.eq.s32.totalorder %v4999_v5, %v5918_v48  ;;  %vm1643_vm13 = vcmp.eq.s32.totalorder %v5002_v24, %v5918_v48  ;;  %vm1940_vm5 = vcmp.eq.s32.totalorder %v4988_v16, %v7436_v20 }
 0x350   : > { %v2485_v44 = vpop.permute.xlu1 %2484  ;;  %v1226_v4 = vadd.f32 %v1162_v51, %v922_v26  ;;  %v1528_v43 = vadd.f32 %v8113_v30, %v1224_v9  ;;  %vm1941_vm1 = vcmp.eq.s32.totalorder %v4996_v14, %v7436_v20  ;;  %vm1942_vm10 = vcmp.eq.s32.totalorder %v4999_v5, %v7436_v20 }
 0x351   : > { %vm2544_vm0 = vcmp.eq.s32.totalorder %v4988_v16, %v2485_v44  ;;  %vm2545_vm6 = vcmp.eq.s32.totalorder %v4996_v14, %v2485_v44  ;;  %vm2546_vm7 = vcmp.eq.s32.totalorder %v4999_v5, %v2485_v44  ;;  %vm2547_vm2 = vcmp.eq.s32.totalorder %v5002_v24, %v2485_v44 }
 0x352   : > { %v923_v44 = vadd.f32 %v859_v1, %v555_v56  ;;  %v1529_v50 = vadd.f32 %v8114_v2, %v1225_v15  ;;  %v1530_v7 = vadd.f32 %v8115_v37, %v1226_v4  ;;  %v8116_v56 = vld [vmem:[#allocation119_spill] sm:$0xff]  ;;  %vm1943_vm11 = vcmp.eq.s32.totalorder %v5002_v24, %v7436_v20 }
 0x354   : > { %v1227_v29 = vadd.f32 %v1163_v59, %v923_v44 }
 0x355   : > { %v7482_v19 = vpop.permute.xlu1 %2005 }
 0x356   : > { %v1531_v32 = vadd.f32 %v8116_v56, %v1227_v29  ;;  %v2068_v48 = vsel %vm1940_vm5, %v7482_v19, 0.0 }
 0x357   : > { %v2132_v46 = vadd.f32 %v2068_v48, %v7428_v10 }
 0x35a   : > { %v2610_v53 = vpop.permute.xlu1 %2609  ;;  %v3486_v49 = vpop.f32.mrb[12].mxu0 }
 0x35b   : > { %v2673_v13 = vsel %vm2545_vm6, %v2610_v53, 0.0  ;;  %v2675_v63 = vsel %vm2547_vm2, %v2610_v53, 0.0  ;;  %v2672_v38 = vsel %vm2544_vm0, %v2610_v53, 0.0  ;;  %v2674_v55 = vsel %vm2546_vm7, %v2610_v53, 0.0  ;;  %v3566_v58 = vpop.f32.mrb[12].mxu1  ;;  %v3487_v45 = vpop.f32.mrb[13].mxu0 }
 0x35c   : > { %v2737_v62 = vadd.f32 %v2673_v13, %v2433_v27  ;;  %v2739_v12 = vadd.f32 %v2675_v63, %v2435_v18  ;;  %v2736_v52 = vadd.f32 %v2672_v38, %v2432_v0  ;;  %v2738_v11 = vadd.f32 %v2674_v55, %v2434_v40  ;;  %v3567_v33 = vpop.f32.mrb[13].mxu1 }
 0x35d   : > { %v3488_v34 = vadd.f32 %v3487_v45, %v3486_v49  ;;  %v3568_v28 = vadd.f32 %v3567_v33, %v3566_v58  ;;  %v2069_v63 = vsel %vm1941_vm1, %v7482_v19, 0.0  ;;  %v2070_v38 = vsel %vm1942_vm10, %v7482_v19, 0.0 }
 0x35e   : > { %2941 = vmatprep.mubr.f32.mxu0 %v2737_v62  ;;  %3086 = vmatprep.mubr.f32.mxu1 %v2739_v12  ;;  %v2071_v55 = vsel %vm1943_vm11, %v7482_v19, 0.0  ;;  %v2310_v62 = vpop.permute.xlu0 %2309  ;;  %v2133_v60 = vadd.f32 %v2069_v63, %v7430_v22  ;;  %v2134_v8 = vadd.f32 %v2070_v38, %v7432_v35 }
 0x35f   : > { %v2184_v57 = vpop.permute.xlu1 %2183  ;;  %2942 = vmatmul.mubr.f32.gmra.mrb[26].mxu0 %v2736_v52  ;;  %3087 = vmatmul.mubr.f32.gmra.mrb[26].mxu1 %v2738_v11  ;;  %v7522_v54 = vadd.f32 %v3568_v28, %v3488_v34  ;;  %v2135_v51 = vadd.f32 %v2071_v55, %v7434_v23 }
 0x360   : > { %vm2244_vm3 = vcmp.eq.s32.totalorder %v4988_v16, %v2184_v57  ;;  %vm2245_vm0 = vcmp.eq.s32.totalorder %v4996_v14, %v2184_v57  ;;  %vm2246_vm6 = vcmp.eq.s32.totalorder %v4999_v5, %v2184_v57  ;;  %vm2247_vm7 = vcmp.eq.s32.totalorder %v5002_v24, %v2184_v57 }
 0x361   : > { %v2372_v12 = vsel %vm2244_vm3, %v2310_v62, 0.0  ;;  %v2373_v52 = vsel %vm2245_vm0, %v2310_v62, 0.0  ;;  %v2374_v20 = vsel %vm2246_vm6, %v2310_v62, 0.0  ;;  %v2375_v11 = vsel %vm2247_vm7, %v2310_v62, 0.0 }
 0x362   : > { %v2437_v59 = vadd.f32 %v2373_v52, %v2133_v60  ;;  %v2439_v31 = vadd.f32 %v2375_v11, %v2135_v51  ;;  %v2436_v26 = vadd.f32 %v2372_v12, %v2132_v46  ;;  %v2438_v44 = vadd.f32 %v2374_v20, %v2134_v8  ;;  %v2314_v29 = vpop.permute.xlu0 %2313 }
 0x364   : > { %v1706_v42 = vpop.permute.xlu1 %1705 }
 0x365   : > { %v1768_v6 = vsel %vm1640_vm15, %v1706_v42, 0.0  ;;  %v1769_v1 = vsel %vm1641_vm14, %v1706_v42, 0.0  ;;  %v1770_v39 = vsel %vm1642_vm12, %v1706_v42, 0.0  ;;  %v1771_v27 = vsel %vm1643_vm13, %v1706_v42, 0.0 }
 0x366   : > { %v7524_v18 = vadd.f32 %v1768_v6, %v1528_v43  ;;  %v7526_v0 = vadd.f32 %v1769_v1, %v1529_v50  ;;  %v7528_v40 = vadd.f32 %v1770_v39, %v1530_v7  ;;  %v1835_v53 = vadd.f32 %v1771_v27, %v1531_v32 }
 0x369   : > { %v1883_v13 = vpop.permute.xlu1 %1882 }
 0x36a   : > { %vm1945_vm15 = vcmp.eq.s32.totalorder %v4996_v14, %v1883_v13  ;;  %vm1947_vm14 = vcmp.eq.s32.totalorder %v5002_v24, %v1883_v13  ;;  %vm1944_vm12 = vcmp.eq.s32.totalorder %v4988_v16, %v1883_v13  ;;  %vm1946_vm13 = vcmp.eq.s32.totalorder %v4999_v5, %v1883_v13 }
 0x36b   : > { %v2073_v15 = vsel %vm1945_vm15, %v6028_v36, 0.0  ;;  %v2075_v4 = vsel %vm1947_vm14, %v6028_v36, 0.0  ;;  %v2072_v33 = vsel %vm1944_vm12, %v6028_v36, 0.0  ;;  %v2074_v30 = vsel %vm1946_vm13, %v6028_v36, 0.0 }
 0x36c   : > { %v2137_v28 = vadd.f32 %v2073_v15, %v7526_v0  ;;  %v2139_v2 = vadd.f32 %v2075_v4, %v1835_v53  ;;  %v2136_v56 = vadd.f32 %v2072_v33, %v7524_v18  ;;  %v2138_v32 = vadd.f32 %v2074_v30, %v7528_v40 }
 0x36e   : > { %v2488_v21 = vpop.permute.xlu1 %2487 }
 0x36f   : > { %vm2548_vm2 = vcmp.eq.s32.totalorder %v4988_v16, %v2488_v21  ;;  %vm2549_vm8 = vcmp.eq.s32.totalorder %v4996_v14, %v2488_v21  ;;  %vm2550_vm9 = vcmp.eq.s32.totalorder %v4999_v5, %v2488_v21  ;;  %vm2551_vm4 = vcmp.eq.s32.totalorder %v5002_v24, %v2488_v21 }
 0x372   : > { %v2614_v19 = vpop.permute.xlu1 %2613 }
 0x373   : > { %v2677_v10 = vsel %vm2549_vm8, %v2614_v19, 0.0  ;;  %v2679_v57 = vsel %vm2551_vm4, %v2614_v19, 0.0  ;;  %v2676_v22 = vsel %vm2548_vm2, %v2614_v19, 0.0  ;;  %v2678_v49 = vsel %vm2550_vm9, %v2614_v19, 0.0 }
 0x374   : > { %v2741_v35 = vadd.f32 %v2677_v10, %v2437_v59  ;;  %v2743_v9 = vadd.f32 %v2679_v57, %v2439_v31  ;;  %v2740_v23 = vadd.f32 %v2676_v22, %v2436_v26  ;;  %v2742_v58 = vadd.f32 %v2678_v49, %v2438_v44 }
 0x376   : > { %2946 = vmatprep.mubr.f32.mxu0 %v2741_v35  ;;  %3091 = vmatprep.mubr.f32.mxu1 %v2743_v9 }
 0x377   : > { %v2187_v45 = vpop.permute.xlu1 %2186  ;;  %2947 = vmatmul.mubr.f32.gmra.mrb[28].mxu0 %v2740_v23  ;;  %3092 = vmatmul.mubr.f32.gmra.mrb[28].mxu1 %v2742_v58 }
 0x378   : > { %vm2249_vm5 = vcmp.eq.s32.totalorder %v4996_v14, %v2187_v45  ;;  %vm2251_vm1 = vcmp.eq.s32.totalorder %v5002_v24, %v2187_v45  ;;  %vm2248_vm10 = vcmp.eq.s32.totalorder %v4988_v16, %v2187_v45  ;;  %vm2250_vm11 = vcmp.eq.s32.totalorder %v4999_v5, %v2187_v45 }
 0x379   : > { %v2377_v43 = vsel %vm2249_vm5, %v2314_v29, 0.0  ;;  %v2379_v34 = vsel %vm2251_vm1, %v2314_v29, 0.0  ;;  %v2376_v50 = vsel %vm2248_vm10, %v2314_v29, 0.0  ;;  %v2378_v37 = vsel %vm2250_vm11, %v2314_v29, 0.0 }
 0x37a   : > { %v3489_v42 = vpop.f32.mrb[14].mxu0  ;;  %v3569_v6 = vpop.f32.mrb[14].mxu1  ;;  %v2441_v39 = vadd.f32 %v2377_v43, %v2137_v28  ;;  %v2443_v27 = vadd.f32 %v2379_v34, %v2139_v2  ;;  %v2440_v36 = vadd.f32 %v2376_v50, %v2136_v56  ;;  %v2442_v63 = vadd.f32 %v2378_v37, %v2138_v32 }
 0x37b   : > { %v3490_v1 = vpop.f32.mrb[15].mxu0  ;;  %v3570_v48 = vpop.f32.mrb[15].mxu1 }
 0x37c   : > { %v2491_v7 = vpop.permute.xlu1 %2490  ;;  %v3491_v13 = vadd.f32 %v3490_v1, %v3489_v42  ;;  %v3571_v0 = vadd.f32 %v3570_v48, %v3569_v6 }
 0x37d   : > { %vm2552_vm3 = vcmp.eq.s32.totalorder %v4988_v16, %v2491_v7  ;;  %vm2553_vm0 = vcmp.eq.s32.totalorder %v4996_v14, %v2491_v7  ;;  %vm2554_vm6 = vcmp.eq.s32.totalorder %v4999_v5, %v2491_v7  ;;  %vm2555_vm7 = vcmp.eq.s32.totalorder %v5002_v24, %v2491_v7 }
 0x37e   : > { %v7573_v62 = vadd.f32 %v3571_v0, %v3491_v13 }
 0x380   : > { %v2618_v18 = vpop.permute.xlu1 %2617 }
 0x381   : > { %v2680_v40 = vsel %vm2552_vm3, %v2618_v18, 0.0  ;;  %v2681_v53 = vsel %vm2553_vm0, %v2618_v18, 0.0  ;;  %v2682_v38 = vsel %vm2554_vm6, %v2618_v18, 0.0  ;;  %v2683_v55 = vsel %vm2555_vm7, %v2618_v18, 0.0 }
 0x382   : > { %v2745_v12 = vadd.f32 %v2681_v53, %v2441_v39  ;;  %v2747_v52 = vadd.f32 %v2683_v55, %v2443_v27  ;;  %v2744_v20 = vadd.f32 %v2680_v40, %v2440_v36  ;;  %v2746_v16 = vadd.f32 %v2682_v38, %v2442_v63 }
 0x384   : > { %2951 = vmatprep.mubr.f32.mxu0 %v2745_v12  ;;  %3096 = vmatprep.mubr.f32.mxu1 %v2747_v52 }
 0x385   : > { %2952 = vmatmul.mubr.f32.gmra.mrb[30].mxu0 %v2744_v20  ;;  %3097 = vmatmul.mubr.f32.gmra.mrb[30].mxu1 %v2746_v16  ;;  %v7608_v16 = vld [vmem:[%s7721_s4] ss:$0 sm:$0xff] }
 0x386   : > { %3660 = vmatprep.mubr.f32.mxu0 %v6853_v17 }
 0x389   : > { %3661 = vmatmul.mubr.f32.vlgmr.msra.gmra.mrb[32].mxu0 %v7193_v47 }
 0x38a   : > { %3663 = vmatprep.mubr.f32.mxu0 %v7205_v3 }
 0x38d   : > { %3664 = vmatmul.mubr.f32.gmra.mrb[34].mxu0 %v7217_v41 }
 0x38e   : > { %3666 = vmatprep.mubr.f32.mxu0 %v7305_v25 }
 0x391   : > { %3667 = vmatmul.mubr.f32.gmra.mrb[36].mxu0 %v7426_v61 }
 0x392   : > { %3669 = vmatprep.mubr.f32.mxu0 %v7522_v54 }
 0x395   : > { %3670 = vmatmul.mubr.f32.gmra.mrb[38].mxu0 %v7573_v62 }
 0x39c   : > { %v3492_v14 = vpop.f32.mrb[16].mxu0  ;;  %v3572_v5 = vpop.f32.mrb[16].mxu1 }
 0x39d   : > { %v3493_v24 = vpop.f32.mrb[17].mxu0  ;;  %v3573_v11 = vpop.f32.mrb[17].mxu1 }
 0x39e   : > { %v3494_v21 = vadd.f32 %v3493_v24, %v3492_v14  ;;  %v3574_v46 = vadd.f32 %v3573_v11, %v3572_v5 }
 0x3a0   : > { %v7583_v60 = vadd.f32 %v3574_v46, %v3494_v21 }
 0x3a2   : > { %3672 = vmatprep.mubr.f32.mxu1 %v7583_v60 }
 0x3ba   : > { %v3495_v8 = vpop.f32.mrb[18].mxu0  ;;  %v3575_v51 = vpop.f32.mrb[18].mxu1 }
 0x3bb   : > { %v3496_v59 = vpop.f32.mrb[19].mxu0  ;;  %v3576_v31 = vpop.f32.mrb[19].mxu1 }
 0x3bc   : > { %v3497_v26 = vadd.f32 %v3496_v59, %v3495_v8  ;;  %v3577_v44 = vadd.f32 %v3576_v31, %v3575_v51 }
 0x3be   : > { %v7586_v19 = vadd.f32 %v3577_v44, %v3497_v26 }
 0x3c0   : > { %3673 = vmatmul.mubr.f32.vlgmr.msra.gmra.mrb[32].mxu1 %v7586_v19 }
 0x3d8   : > { %v3498_v10 = vpop.f32.mrb[20].mxu0  ;;  %v3578_v57 = vpop.f32.mrb[20].mxu1 }
 0x3d9   : > { %v3499_v22 = vpop.f32.mrb[21].mxu0  ;;  %v3579_v49 = vpop.f32.mrb[21].mxu1 }
 0x3da   : > { %v3500_v35 = vadd.f32 %v3499_v22, %v3498_v10  ;;  %v3580_v9 = vadd.f32 %v3579_v49, %v3578_v57 }
 0x3dc   : > { %v7589_v23 = vadd.f32 %v3580_v9, %v3500_v35 }
 0x3de   : > { %3675 = vmatprep.mubr.f32.mxu1 %v7589_v23 }
 0x3f6   : > { %v3501_v58 = vpop.f32.mrb[22].mxu0  ;;  %v3581_v45 = vpop.f32.mrb[22].mxu1 }
 0x3f7   : > { %v3502_v15 = vpop.f32.mrb[23].mxu0  ;;  %v3582_v4 = vpop.f32.mrb[23].mxu1 }
 0x3f8   : > { %v3503_v29 = vadd.f32 %v3502_v15, %v3501_v58  ;;  %v3583_v33 = vadd.f32 %v3582_v4, %v3581_v45 }
 0x3fa   : > { %v7592_v30 = vadd.f32 %v3583_v33, %v3503_v29 }
 0x3fc   : > { %3676 = vmatmul.mubr.f32.gmra.mrb[34].mxu1 %v7592_v30 }
 0x414   : > { %v3504_v43 = vpop.f32.mrb[24].mxu0  ;;  %v3584_v34 = vpop.f32.mrb[24].mxu1 }
 0x415   : > { %v3505_v28 = vpop.f32.mrb[25].mxu0  ;;  %v3585_v2 = vpop.f32.mrb[25].mxu1 }
 0x416   : > { %v3506_v50 = vadd.f32 %v3505_v28, %v3504_v43  ;;  %v3586_v37 = vadd.f32 %v3585_v2, %v3584_v34 }
 0x418   : > { %v7595_v7 = vadd.f32 %v3586_v37, %v3506_v50 }
 0x41a   : > { %3678 = vmatprep.mubr.f32.mxu1 %v7595_v7 }
 0x432   : > { %v3507_v56 = vpop.f32.mrb[26].mxu0  ;;  %v3587_v32 = vpop.f32.mrb[26].mxu1 }
 0x433   : > { %v3508_v42 = vpop.f32.mrb[27].mxu0  ;;  %v3588_v6 = vpop.f32.mrb[27].mxu1 }
 0x434   : > { %v3509_v1 = vadd.f32 %v3508_v42, %v3507_v56  ;;  %v3589_v39 = vadd.f32 %v3588_v6, %v3587_v32 }
 0x436   : > { %v7598_v27 = vadd.f32 %v3589_v39, %v3509_v1 }
 0x438   : > { %3679 = vmatmul.mubr.f32.gmra.mrb[36].mxu1 %v7598_v27 }
 0x44a   : > { %v3510_v13 = vpop.f32.mrb[28].mxu0  ;;  %v3590_v48 = vpop.f32.mrb[28].mxu1 }
 0x44b   : > { %v3511_v36 = vpop.f32.mrb[29].mxu0  ;;  %v3591_v63 = vpop.f32.mrb[29].mxu1 }
 0x44c   : > { %v3512_v0 = vadd.f32 %v3511_v36, %v3510_v13  ;;  %v3592_v18 = vadd.f32 %v3591_v63, %v3590_v48 }
 0x44e   : > { %v7601_v40 = vadd.f32 %v3592_v18, %v3512_v0 }
 0x450   : > { %3681 = vmatprep.mubr.f32.mxu1 %v7601_v40 }
 0x458   : > { %v3513_v53 = vpop.f32.mrb[30].mxu0  ;;  %v3593_v38 = vpop.f32.mrb[30].mxu1 }
 0x459   : > { %v3514_v55 = vpop.f32.mrb[31].mxu0  ;;  %v3594_v12 = vpop.f32.mrb[31].mxu1 }
 0x45a   : > { %v3515_v52 = vadd.f32 %v3514_v55, %v3513_v53  ;;  %v3595_v20 = vadd.f32 %v3594_v12, %v3593_v38 }
 0x45c   : > { %v7610_v14 = vadd.f32 %v3595_v20, %v3515_v52  ;;  %v3662_v5 = vpop.f32.mrb[32].mxu0 }
 0x45d   : > { %v3197_v24 = vadd.f32 %v3662_v5, %v7608_v16  ;;  %v3191_v11 = vpop.f32.mrb[33].mxu0 }
 0x45e   : > { %v3192_v21 = vadd.f32 %v7608_v16, %v3191_v11  ;;  %3682 = vmatmul.mubr.f32.gmra.mrb[38].mxu1 %v7610_v14 }
 0x45f   : > { %v3271_v46 = vmax.f32 %v3197_v24, 0.0 }
 0x460   : > { %v3270_v8 = vmax.f32 %v3192_v21, 0.0  ;;  %v3665_v51 = vpop.f32.mrb[34].mxu0 }
 0x461   : > { %v3287_v59 = vadd.f32 %v3271_v46, %v7193_v47  ;;  %v3207_v31 = vadd.f32 %v3665_v51, %v7608_v16  ;;  %v3201_v26 = vpop.f32.mrb[35].mxu0 }
 0x462   : > { %v3286_v44 = vadd.f32 %v3270_v8, %v6853_v17  ;;  %v3202_v10 = vadd.f32 %v7608_v16, %v3201_v26 }
 0x463   : > { %3303 = vst [vmem:[%s7621_s17 + $0x8] sm:$0xff] %v3287_v59  ;;  %v3273_v57 = vmax.f32 %v3207_v31, 0.0 }
 0x464   : > { %3302 = vst [vmem:[%s7621_s17] sm:$0xff] %v3286_v44  ;;  %v3272_v22 = vmax.f32 %v3202_v10, 0.0  ;;  %v3668_v49 = vpop.f32.mrb[36].mxu0 }
 0x465   : > { %v3289_v47 = vadd.f32 %v3273_v57, %v7217_v41  ;;  %v3217_v35 = vadd.f32 %v3668_v49, %v7608_v16  ;;  %v3211_v17 = vpop.f32.mrb[37].mxu0 }
 0x466   : > { %v3288_v9 = vadd.f32 %v3272_v22, %v7205_v3  ;;  %v3212_v58 = vadd.f32 %v7608_v16, %v3211_v17 }
 0x467   : > { %3305 = vst [vmem:[%s7621_s17 + $0x18] sm:$0xff] %v3289_v47  ;;  %v3275_v45 = vmax.f32 %v3217_v35, 0.0 }
 0x468   : > { %3304 = vst [vmem:[%s7621_s17 + $0x10] sm:$0xff] %v3288_v9  ;;  %v3274_v15 = vmax.f32 %v3212_v58, 0.0  ;;  %v3671_v4 = vpop.f32.mrb[38].mxu0 }
 0x469   : > { %v3291_v29 = vadd.f32 %v3275_v45, %v7426_v61  ;;  %v3227_v33 = vadd.f32 %v3671_v4, %v7608_v16  ;;  %v3221_v41 = vpop.f32.mrb[39].mxu0 }
 0x46a   : > { %v3290_v43 = vadd.f32 %v3274_v15, %v7305_v25  ;;  %v3222_v34 = vadd.f32 %v7608_v16, %v3221_v41 }
 0x46b   : > { %3307 = vst [vmem:[%s7621_s17 + $0x28] sm:$0xff] %v3291_v29  ;;  %v3277_v3 = vmax.f32 %v3227_v33, 0.0 }
 0x46c   : > { %3306 = vst [vmem:[%s7621_s17 + $0x20] sm:$0xff] %v3290_v43  ;;  %v3276_v28 = vmax.f32 %v3222_v34, 0.0 }
 0x46d   : > { %v3293_v2 = vadd.f32 %v3277_v3, %v7573_v62 }
 0x46e   : > { %v3292_v50 = vadd.f32 %v3276_v28, %v7522_v54 }
 0x46f   : > { %3309 = vst [vmem:[%s7621_s17 + $0x38] sm:$0xff] %v3293_v2 }
 0x470   : > { %3308 = vst [vmem:[%s7621_s17 + $0x30] sm:$0xff] %v3292_v50 }
 0x493   : > { %v3674_v61 = vpop.f32.mrb[32].mxu1 }
 0x494   : > { %v3237_v37 = vadd.f32 %v3674_v61, %v7608_v16  ;;  %v3231_v56 = vpop.f32.mrb[33].mxu1 }
 0x495   : > { %v3232_v25 = vadd.f32 %v7608_v16, %v3231_v56 }
 0x496   : > { %v3279_v32 = vmax.f32 %v3237_v37, 0.0 }
 0x497   : > { %v3278_v42 = vmax.f32 %v3232_v25, 0.0 }
 0x498   : > { %v3295_v6 = vadd.f32 %v3279_v32, %v7586_v19 }
 0x499   : > { %v3294_v1 = vadd.f32 %v3278_v42, %v7583_v60 }
 0x49a   : > { %3311 = vst [vmem:[%s7621_s17 + $0x48] sm:$0xff] %v3295_v6 }
 0x49b   : > { %3310 = vst [vmem:[%s7621_s17 + $0x40] sm:$0xff] %v3294_v1 }
 0x4cf   : > { %v3677_v62 = vpop.f32.mrb[34].mxu1 }
 0x4d0   : > { %v3247_v54 = vadd.f32 %v3677_v62, %v7608_v16  ;;  %v3241_v39 = vpop.f32.mrb[35].mxu1 }
 0x4d1   : > { %v3242_v13 = vadd.f32 %v7608_v16, %v3241_v39 }
 0x4d2   : > { %v3281_v48 = vmax.f32 %v3247_v54, 0.0 }
 0x4d3   : > { %v3280_v36 = vmax.f32 %v3242_v13, 0.0 }
 0x4d4   : > { %v3297_v63 = vadd.f32 %v3281_v48, %v7592_v30 }
 0x4d5   : > { %v3296_v0 = vadd.f32 %v3280_v36, %v7589_v23 }
 0x4d6   : > { %3313 = vst [vmem:[%s7621_s17 + $0x58] sm:$0xff] %v3297_v63 }
 0x4d7   : > { %3312 = vst [vmem:[%s7621_s17 + $0x50] sm:$0xff] %v3296_v0 }
 0x50b   : > { %v3680_v60 = vpop.f32.mrb[36].mxu1 }
 0x50c   : > { %v3257_v19 = vadd.f32 %v3680_v60, %v7608_v16  ;;  %v3251_v18 = vpop.f32.mrb[37].mxu1 }
 0x50d   : > { %v3252_v53 = vadd.f32 %v7608_v16, %v3251_v18 }
 0x50e   : > { %v3283_v38 = vmax.f32 %v3257_v19, 0.0 }
 0x50f   : > { %v3282_v55 = vmax.f32 %v3252_v53, 0.0 }
 0x510   : > { %v3299_v12 = vadd.f32 %v3283_v38, %v7598_v27 }
 0x511   : > { %v3298_v52 = vadd.f32 %v3282_v55, %v7595_v7 }
 0x512   : > { %3315 = vst [vmem:[%s7621_s17 + $0x68] sm:$0xff] %v3299_v12 }
 0x513   : > { %3314 = vst [vmem:[%s7621_s17 + $0x60] sm:$0xff] %v3298_v52 }
 0x531   : > { %v3683_v23 = vpop.f32.mrb[38].mxu1 }
 0x532   : > { %v3267_v30 = vadd.f32 %v3683_v23, %v7608_v16  ;;  %v3261_v20 = vpop.f32.mrb[39].mxu1 }
 0x533   : > { %v3262_v5 = vadd.f32 %v7608_v16, %v3261_v20 }
 0x534   : > { %v3285_v24 = vmax.f32 %v3267_v30, 0.0 }
 0x535   : > { %v3284_v11 = vmax.f32 %v3262_v5, 0.0 }
 0x536   : > { %v3301_v27 = vadd.f32 %v3285_v24, %v7610_v14 }
 0x537   : > { %v3300_v7 = vadd.f32 %v3284_v11, %v7601_v40 }
 0x538   : > { %3317 = vst [vmem:[%s7621_s17 + $0x78] sm:$0xff] %v3301_v27 }
 0x539   : > { %3316 = vst [vmem:[%s7621_s17 + $0x70] sm:$0xff] %v3300_v7 }
 0x53a   : > { %4032 = shalt.err (!%p4029_p7)
}
 0x53b   : > { %s4033_s13 = scalar_lea.hbm %s7667_s7, 2048  ;;  %s4037_s12 = scalar_lea.hbm %s7722_s5, 4096 }
 0x53c   : > { %p4034_p8 = scmp.ne.s32.totalorder %s7667_s7, %s4033_s13  ;;  %p4038_p1 = scmp.lt.u32.totalorder %s7667_s7, %s7722_s5 }
 0x53d   : > { %p4039_p0 = scmp.lt.u32.totalorder %s4037_s12, %s4033_s13  ;;  %p4041_p6 = scmp.lt.u32.totalorder %s4033_s13, %s7667_s7 }
 0x53e   : > { %p4035_p11 = pnand %p4034_p8, %p8117_p9 }
 0x53f   : > { %p4040_p5 = por %p4039_p0, %p4038_p1 }
 0x540   : > { %p4036_p13 = pneg %p4035_p11 }
 0x541   : > { %p4042_p10 = por %p4041_p6, %p4040_p5 }
 0x543   : > { %p4043_p12 = pnand %p4042_p10, %p4036_p13 }
 0x545   : > { %4046 = shalt.err (!%p4043_p12)
}
 0x546   : > { %s4099_s17 = smov 128   ;;  %s4100_s23 = smov 8  }
 0x547   : > { %3800 = dma.vmem_to_hbm [thread:$0]  (%p8117_p9), %s7669_s25, 2048, %s7667_s7, %s7676_s22, %s4099_s17, %s4099_s17, %s4100_s23  }
 0x548 PF: > { %p3812_p2 = scmp.ge.s32.totalorder %s4085_s21, 2  ;;  %s3347_s26 = sand.u32 1, %s4073_s18  }
 0x549   : > { %p8118_p3 = scmp.ne.s32.totalorder %s7850_s29, 0  ;;  %s3348_s6 = scalar_lea.sflag [#allocation4], %s3347_s26 }
 0x54b   : > { %p3807_p4 = pnand %p3812_p2, %p8118_p3 }
 0x54d   : > { %4068 = dma.done.wait (!%p3807_p4), %s3348_s6, 2048  }
 0x54e   : > { %4070 = vsyncadd (!%p3807_p4), %s3348_s6, 4294965248  ;;  %p16_p7 = scmp.ge.s32.totalorder %s4156_s24, 4   ;;  %s8119_s18 = smov %s4077_s19 }
 0x54f   : > { %s8120_s19 = smov %s4081_s20  ;;  %s8121_s20 = smov %s4167_s27 }
 0x550   : > { %s8122_s21 = smov %s4156_s24  ;;  %18 = sbr.rel (!%p16_p7) target bundleno = 4 (0x4), region = 83 }
 0x557   :  { %3353 = vsyncpa [#allocation3], 1 }
 0x558   :  { %3355 = vsyncpa [#allocation3 + $0x1], 1 }
 0x559   :  { %3356 = vsyncpa [#allocation4], 1 }
 0x55a   :  { %3358 = vsyncpa [#allocation4 + $0x1], 1 }

</bundles_post_ra>
